<compile_context>
chip_gen: v7x
topology: tpu7x:2x2x1
jax: 0.10.0
libtpu: 0.0.40
codegen_flags: <defaults>
</compile_context>

<pallas_src>
import jax
import jax.numpy as jnp
from jax.experimental import pallas as pl
from jax.experimental.pallas import tpu as pltpu

# ---- static config (mirrors config.MODEL.* / config.*) ----
IC_DIM = 8
GEN_DIM = 32
CON_DIM = 16
CO_DIM = 4
CI_ENC_DIM = 8              # ci feature dim = 2 * CI_ENC_DIM
EXT_INPUT_DIM = 2
LATENT_DIM = 8
RECON_SEQ_LEN = 8
CELL_CLIP = 5.0
DROPOUT_RATE = 0.0          # dropout == identity in eval mode

CI2 = 2 * CI_ENC_DIM
G3C = 3 * CON_DIM           # 48
G3G = 3 * GEN_DIM           # 96
BP_TILE = 8                 # batch rows per grid step (one sublane tile)

# MXU operand dtype for the recurrent serial chain (f32 accumulation is kept).
MM_DTYPE = jnp.bfloat16

# ---- packed per-step input slab lane layout (SEQ_W lanes) ----
SEQ_W = 32
CI_OFF = 0                  # ci:  lanes  0:16
EXT_OFF = 16                # ext: lanes 16:18
EPS_OFF = 24                # eps: lanes 24:28

# ---- packed weight slab row layout (every block starts at a multiple of 8) ----
R_W_IN_C = 0      # (SEQ_W, G3C)  seq-slab -> controller gates (ci rows only, rest zero)
R_W_IN_G = 32     # (SEQ_W, G3G)  seq-slab -> generator gates (ext rows only, rest zero)
R_W_FACIN = 64    # (LATENT_DIM, G3C)
R_W_HH_C = 72     # (CON_DIM, G3C)
R_W_CO = 88       # (CON_DIM, 2*CO_DIM)
R_W_COIN_G = 104  # (CO_DIM, G3G)
R_W_HH_G = 112    # (GEN_DIM, G3G)
R_W_FAC = 144     # (GEN_DIM, LATENT_DIM)  (kernel-normalized)
R_W_IC = 176      # (IC_DIM, GEN_DIM)
R_B_IH_C = 184    # (8, G3C)  replicated across the batch tile
R_B_HH_C = 192    # (8, G3C)
R_B_IH_G = 200    # (8, G3G)
R_B_HH_G = 208    # (8, G3G)
R_B_CO = 216      # (8, 2*CO_DIM)
R_B_IC = 224      # (8, GEN_DIM)
R_CON_H0 = 232    # (8, CON_DIM)
R_TOTAL = 240

# ---- packed output slab lane layout (128 lanes) ----
OUT_W = 128
OUT_GEN = 0       # width GEN_DIM
OUT_CON = 32      # width CON_DIM
OUT_COMEAN = 48   # width CO_DIM
OUT_COSTD = 56    # width CO_DIM
OUT_COOUT = 64    # width CO_DIM
OUT_FAC = 72      # width LATENT_DIM


def _gru_update(gi, gh, h, hsz, clip):
    """PyTorch GRUCell gate math + hidden clipping (ClippedGRUCell).

    gi = x @ W_ih^T + b_ih ; gh = h @ W_hh^T + b_hh.
    Restructured per perf review: full-width add + full-width sigmoid, slice afterwards.
    """
    s = gi + gh
    rz = jax.nn.sigmoid(s[:, 0:2 * hsz])
    r = rz[:, 0:hsz]
    z = rz[:, hsz:2 * hsz]
    n = jnp.tanh(gi[:, 2 * hsz:3 * hsz] + r * gh[:, 2 * hsz:3 * hsz])
    h_new = (1.0 - z) * n + z * h
    return jnp.clip(h_new, -clip, clip)


def _make_decoder_kernel(sample_posteriors, num_steps, bp):
    def kernel(seq_ref, ic_ref, w_ref, out_ref):
        f32 = jnp.float32
        out_ref[...] = jnp.zeros_like(out_ref)

        # ---- unpack the single weight slab (static, 8-row-aligned slices) ----
        w_in_c = w_ref[R_W_IN_C:R_W_IN_C + SEQ_W, 0:G3C]           # f32
        w_in_g = w_ref[R_W_IN_G:R_W_IN_G + SEQ_W, 0:G3G]
        w_ic = w_ref[R_W_IC:R_W_IC + IC_DIM, 0:GEN_DIM]
        b_ih_c = w_ref[R_B_IH_C:R_B_IH_C + 1, 0:G3C]               # (1, 48)
        b_ih_g = w_ref[R_B_IH_G:R_B_IH_G + 1, 0:G3G]               # (1, 96)
        b_hh_c = w_ref[R_B_HH_C:R_B_HH_C + bp, 0:G3C]              # (8, 48)
        b_hh_g = w_ref[R_B_HH_G:R_B_HH_G + bp, 0:G3G]              # (8, 96)
        b_co = w_ref[R_B_CO:R_B_CO + bp, 0:2 * CO_DIM]             # (8, 8)
        b_ic = w_ref[R_B_IC:R_B_IC + bp, 0:GEN_DIM]                # (8, 32)
        con_h0 = w_ref[R_CON_H0:R_CON_H0 + bp, 0:CON_DIM]          # (8, 16)
        # recurrent-path weights: cast to bf16 once (MXU operands), f32 accumulation
        w_facin = w_ref[R_W_FACIN:R_W_FACIN + LATENT_DIM, 0:G3C].astype(MM_DTYPE)
        w_hh_c = w_ref[R_W_HH_C:R_W_HH_C + CON_DIM, 0:G3C].astype(MM_DTYPE)
        w_co = w_ref[R_W_CO:R_W_CO + CON_DIM, 0:2 * CO_DIM].astype(MM_DTYPE)
        w_coin_g = w_ref[R_W_COIN_G:R_W_COIN_G + CO_DIM, 0:G3G].astype(MM_DTYPE)
        w_hh_g = w_ref[R_W_HH_G:R_W_HH_G + GEN_DIM, 0:G3G].astype(MM_DTYPE)
        w_fac = w_ref[R_W_FAC:R_W_FAC + GEN_DIM, 0:LATENT_DIM].astype(MM_DTYPE)

        def mxu(x, w_b16):
            return jnp.dot(x.astype(MM_DTYPE), w_b16, preferred_element_type=f32)

        # ---- preamble: batched non-recurrent projections + initial states (in-kernel glue) ----
        seq2d = seq_ref[0]                                          # (T*bp, SEQ_W)
        # eps lanes hit zero rows of w_in_c / w_in_g, so they do not pollute the projections.
        proj_c = jnp.dot(seq2d, w_in_c, preferred_element_type=f32) + b_ih_c   # (T*bp, 48)
        proj_g = jnp.dot(seq2d, w_in_g, preferred_element_type=f32) + b_ih_g   # (T*bp, 96)

        ic = ic_ref[...]                                            # (bp, IC)
        gen_state = jnp.dot(ic, w_ic, preferred_element_type=f32) + b_ic       # ic_to_g0
        out_ref[num_steps, :, OUT_GEN:OUT_GEN + GEN_DIM] = gen_state            # gen_init
        # dropout(gen_init) == identity (eval mode)
        factor = mxu(gen_state, w_fac)      # KernelNormalizedLinear (weight pre-normalized)
        con_state = con_h0

        # ---- fully unrolled sequential recurrence (num_steps small & static) ----
        for t in range(num_steps):
            r0 = t * bp
            # --- controller ClippedGRUCell: input = [ci_step, factor] (dropout == id) ---
            gi_c = proj_c[r0:r0 + bp, :] + mxu(factor, w_facin)
            gh_c = mxu(con_state, w_hh_c) + b_hh_c
            con_state = _gru_update(gi_c, gh_c, con_state, CON_DIM, CELL_CLIP)

            # --- co_linear -> posterior params ---
            co_params = mxu(con_state, w_co) + b_co                 # (bp, 2*CO)
            co_mean = co_params[:, 0:CO_DIM]
            co_std = jnp.exp(0.5 * co_params[:, CO_DIM:2 * CO_DIM])  # sqrt(exp(logvar))
            if sample_posteriors:
                eps_t = seq_ref[0, r0:r0 + bp, EPS_OFF:EPS_OFF + CO_DIM]
                con_output = co_mean + co_std * eps_t                # diagonal-Normal rsample
            else:
                con_output = co_mean

            # --- generator ClippedGRUCell: input = [con_output, ext_step] ---
            gi_g = proj_g[r0:r0 + bp, :] + mxu(con_output, w_coin_g)
            gh_g = mxu(gen_state, w_hh_g) + b_hh_g
            gen_state = _gru_update(gi_g, gh_g, gen_state, GEN_DIM, CELL_CLIP)

            # --- normalized factor readout (no bias) ---
            factor = mxu(gen_state, w_fac)

            # --- lane-packed per-step output (single 128-wide VMEM tile, one writeback DMA) ---
            out_ref[t, :, OUT_GEN:OUT_GEN + GEN_DIM] = gen_state
            out_ref[t, :, OUT_CON:OUT_CON + CON_DIM] = con_state
            out_ref[t, :, OUT_COMEAN:OUT_COMEAN + CO_DIM] = co_mean
            out_ref[t, :, OUT_COSTD:OUT_COSTD + CO_DIM] = co_std
            out_ref[t, :, OUT_COOUT:OUT_COOUT + CO_DIM] = con_output
            out_ref[t, :, OUT_FAC:OUT_FAC + LATENT_DIM] = factor

    return kernel


def init_params(key):
    ks = jax.random.split(key, 12)

    def lin_w(k, out_d, in_d):
        return jax.random.normal(k, (out_d, in_d), jnp.float32) / jnp.sqrt(float(in_d))

    return dict(
        ic_to_g0_w=lin_w(ks[0], GEN_DIM, IC_DIM),
        ic_to_g0_b=jnp.zeros((GEN_DIM,), jnp.float32),
        fac_w=lin_w(ks[1], LATENT_DIM, GEN_DIM),           # KernelNormalizedLinear weight
        con_h0=jnp.zeros((1, CON_DIM), jnp.float32),       # nn.Parameter zeros
        con_w_ih=lin_w(ks[2], 3 * CON_DIM, CI2 + LATENT_DIM),
        con_w_hh=lin_w(ks[3], 3 * CON_DIM, CON_DIM),
        con_b_ih=0.1 * jax.random.normal(ks[4], (3 * CON_DIM,), jnp.float32),
        con_b_hh=0.1 * jax.random.normal(ks[5], (3 * CON_DIM,), jnp.float32),
        co_w=lin_w(ks[6], 2 * CO_DIM, CON_DIM),
        co_b=0.1 * jax.random.normal(ks[7], (2 * CO_DIM,), jnp.float32),
        gen_w_ih=lin_w(ks[8], 3 * GEN_DIM, CO_DIM + EXT_INPUT_DIM),
        gen_w_hh=lin_w(ks[9], 3 * GEN_DIM, GEN_DIM),
        gen_b_ih=0.1 * jax.random.normal(ks[10], (3 * GEN_DIM,), jnp.float32),
        gen_b_hh=0.1 * jax.random.normal(ks[11], (3 * GEN_DIM,), jnp.float32),
    )


def _pack_weight_slab(params):
    """One (R_TOTAL, 128) f32 slab; every sub-matrix starts on an 8-row boundary."""
    f32 = jnp.float32
    slab = jnp.zeros((R_TOTAL, 128), f32)

    def put(s, row, mat):
        mat = jnp.asarray(mat, f32)
        return s.at[row:row + mat.shape[0], 0:mat.shape[1]].set(mat)

    def rep(vec):  # replicate a bias / h0 across the 8-row batch tile
        return jnp.tile(jnp.reshape(jnp.asarray(vec, f32), (1, -1)), (BP_TILE, 1))

    w_ih_c = params["con_w_ih"]     # (3*CON, CI2 + LATENT)
    w_ih_g = params["gen_w_ih"]     # (3*GEN, CO + EXT)

    # Input-projection matrices laid out against the SEQ slab lanes (eps rows stay zero).
    w_in_c = jnp.zeros((SEQ_W, G3C), f32).at[CI_OFF:CI_OFF + CI2].set(w_ih_c[:, :CI2].T)
    w_in_g = jnp.zeros((SEQ_W, G3G), f32).at[EXT_OFF:EXT_OFF + EXT_INPUT_DIM].set(
        w_ih_g[:, CO_DIM:CO_DIM + EXT_INPUT_DIM].T)

    # F.normalize(weight, p=2, dim=1) for the factor readout.
    fw = params["fac_w"]
    fw = fw / jnp.maximum(jnp.sqrt(jnp.sum(fw * fw, axis=1, keepdims=True)), 1e-12)

    slab = put(slab, R_W_IN_C, w_in_c)
    slab = put(slab, R_W_IN_G, w_in_g)
    slab = put(slab, R_W_FACIN, w_ih_c[:, CI2:].T)        # (LATENT, 3*CON)
    slab = put(slab, R_W_HH_C, params["con_w_hh"].T)      # (CON, 3*CON)
    slab = put(slab, R_W_CO, params["co_w"].T)            # (CON, 2*CO)
    slab = put(slab, R_W_COIN_G, w_ih_g[:, :CO_DIM].T)    # (CO, 3*GEN)
    slab = put(slab, R_W_HH_G, params["gen_w_hh"].T)      # (GEN, 3*GEN)
    slab = put(slab, R_W_FAC, fw.T)                       # (GEN, LATENT), normalized
    slab = put(slab, R_W_IC, params["ic_to_g0_w"].T)      # (IC, GEN)
    slab = put(slab, R_B_IH_C, rep(params["con_b_ih"]))
    slab = put(slab, R_B_HH_C, rep(params["con_b_hh"]))
    slab = put(slab, R_B_IH_G, rep(params["gen_b_ih"]))
    slab = put(slab, R_B_HH_G, rep(params["gen_b_hh"]))
    slab = put(slab, R_B_CO, rep(params["co_b"]))
    slab = put(slab, R_B_IC, rep(params["ic_to_g0_b"]))
    slab = put(slab, R_CON_H0, rep(params["con_h0"]))
    return slab


def decoder_forward(params, ic_samp, ci, ext_input,
                    sample_posteriors=True, noise_key=None):
    B = ic_samp.shape[0]
    T = RECON_SEQ_LEN
    Bp = ((B + BP_TILE - 1) // BP_TILE) * BP_TILE
    NB = Bp // BP_TILE

    # pad external input up to RECON_SEQ_LEN with zeros; dropout == identity (eval)
    fwd_steps = T - ext_input.shape[1]
    if fwd_steps > 0:
        ext_input = jnp.concatenate(
            [ext_input, jnp.zeros((B, fwd_steps, EXT_INPUT_DIM), ext_input.dtype)], axis=1)
    ext_input = ext_input.astype(jnp.float32)
    ci = ci.astype(jnp.float32)

    # ---- single packed weight slab (one HBM->VMEM DMA window) ----
    wslab = _pack_weight_slab(params)

    # ---- single packed per-step input slab: [ci | ext | eps] lanes, time-major per batch chunk ----
    seq = jnp.zeros((T, Bp, SEQ_W), jnp.float32)
    seq = seq.at[:, :B, CI_OFF:CI_OFF + CI2].set(jnp.transpose(ci, (1, 0, 2)))
    seq = seq.at[:, :B, EXT_OFF:EXT_OFF + EXT_INPUT_DIM].set(jnp.transpose(ext_input, (1, 0, 2)))
    if sample_posteriors:
        eps = jax.random.normal(noise_key, (T, Bp, CO_DIM), jnp.float32)
        seq = seq.at[:, :, EPS_OFF:EPS_OFF + CO_DIM].set(eps)
    # (T, Bp, W) -> (NB, T*8, W): within a chunk rows are ordered (t, local_batch)
    seq_chunks = seq.reshape(T, NB, BP_TILE, SEQ_W).transpose(1, 0, 2, 3).reshape(
        NB, T * BP_TILE, SEQ_W)

    ic_p = jnp.zeros((Bp, IC_DIM), jnp.float32).at[:B].set(ic_samp.astype(jnp.float32))

    kernel = _make_decoder_kernel(sample_posteriors, T, BP_TILE)

    out = pl.pallas_call(
        kernel,
        out_shape=jax.ShapeDtypeStruct((T + 1, Bp, OUT_W), jnp.float32),
        grid_spec=pltpu.PrefetchScalarGridSpec(
            num_scalar_prefetch=0,
            grid=(NB,),  # batch chunks: "parallel" -> uses the 2nd TensorCore on v7x
            in_specs=[
                pl.BlockSpec((1, T * BP_TILE, SEQ_W), lambda b: (b, 0, 0)),
                pl.BlockSpec((BP_TILE, IC_DIM), lambda b: (b, 0)),
                pl.BlockSpec((R_TOTAL, 128), lambda b: (0, 0)),  # weight slab stays resident
            ],
            out_specs=pl.BlockSpec((T + 1, BP_TILE, OUT_W), lambda b: (0, b, 0)),
            scratch_shapes=(),
        ),
        compiler_params=pltpu.CompilerParams(
            dimension_semantics=("parallel",)),
    )(seq_chunks, ic_p, wslab)

    # ---- split the lane-packed output slab back into the module's state tuple ----
    states = out[:T]  # (T, Bp, 128)

    def grab(off, width):
        return jnp.transpose(states[:, :B, off:off + width], (1, 0, 2))  # (B, T, width)

    gen_states = grab(OUT_GEN, GEN_DIM)
    con_states = grab(OUT_CON, CON_DIM)
    co_means = grab(OUT_COMEAN, CO_DIM)
    co_stds = grab(OUT_COSTD, CO_DIM)
    con_outs = grab(OUT_COOUT, CO_DIM)
    factors = grab(OUT_FAC, LATENT_DIM)
    gen_init = out[T, :B, OUT_GEN:OUT_GEN + GEN_DIM]

    # gen_input state component = [controller_output, ext_input_step]
    gen_inputs = jnp.concatenate([con_outs, ext_input], axis=2)

    # mirrors: (gen_init, gen_states, con_states, co_means, co_stds, gen_inputs, factors)
    return (gen_init, gen_states, con_states, co_means, co_stds, gen_inputs, factors)


if __name__ == "__main__":
    key = jax.random.PRNGKey(0)
    pkey, k_ic, k_ci, k_ext, k_eps = jax.random.split(key, 5)
    params = init_params(pkey)

    B = 2
    ic_samp = jax.random.normal(k_ic, (B, IC_DIM), jnp.float32)
    ci = jax.random.normal(k_ci, (B, RECON_SEQ_LEN, CI2), jnp.float32)
    ext_input = jax.random.normal(
        k_ext, (B, RECON_SEQ_LEN - 2, EXT_INPUT_DIM), jnp.float32)

    out = decoder_forward(params, ic_samp, ci, ext_input,
                          sample_posteriors=True, noise_key=k_eps)
    out = jax.block_until_ready(out)

    assert out[0].shape == (B, GEN_DIM)
    assert out[1].shape == (B, RECON_SEQ_LEN, GEN_DIM)
    assert out[2].shape == (B, RECON_SEQ_LEN, CON_DIM)
    assert out[3].shape == (B, RECON_SEQ_LEN, CO_DIM)
    assert out[4].shape == (B, RECON_SEQ_LEN, CO_DIM)
    assert out[5].shape == (B, RECON_SEQ_LEN, CO_DIM + EXT_INPUT_DIM)
    assert out[6].shape == (B, RECON_SEQ_LEN, LATENT_DIM)
    assert all(bool(jnp.all(jnp.isfinite(o))) for o in out)

    # exercise the non-sampling path (con_output == co_mean) as well
    out_ns = decoder_forward(params, ic_samp, ci, ext_input, sample_posteriors=False)
    out_ns = jax.block_until_ready(out_ns)
    assert all(bool(jnp.all(jnp.isfinite(o))) for o in out_ns)

    print("KERNEL_OK")
</pallas_src>

<mosaic_0001>
module attributes {stable_mosaic.version = 11 : i64} {
  func.func @kernel(%arg0: i32, %arg1: memref<1x64x32xf32, #tpu.memory_space<vmem>>, %arg2: memref<8x8xf32, #tpu.memory_space<vmem>>, %arg3: memref<240x128xf32, #tpu.memory_space<vmem>>, %arg4: memref<9x8x128xf32, #tpu.memory_space<vmem>>) attributes {dimension_semantics = [#tpu.dimension_semantics<parallel>], iteration_bounds = array<i64: 1>, scalar_prefetch = 0 : i64, scratch_operands = 0 : i64, tpu.core_type = #tpu.core_type<tc>, window_params = [{transform_indices = @transform_0, window_bounds = array<i64: 1, 64, 32>}, {transform_indices = @transform_1, window_bounds = array<i64: 8, 8>}, {pipeline_mode = #tpu.pipeline_mode<synchronous>, transform_indices = @transform_2, window_bounds = array<i64: 240, 128>}, {transform_indices = @transform_3, window_bounds = array<i64: 9, 8, 128>}]} {
    %cst = arith.constant 0.000000e+00 : f32
    %0 = vector.broadcast %cst : f32 to vector<9x8x128xf32>
    %c0 = arith.constant 0 : index
    %c0_0 = arith.constant 0 : index
    %c0_1 = arith.constant 0 : index
    %1 = vector.load %arg4[%c0, %c0_0, %c0_1] : memref<9x8x128xf32, #tpu.memory_space<vmem>>, vector<9x8x128xf32>
    tpu.vector_store %arg4[%c0, %c0_0, %c0_1], %0 {strides = array<i32>} : memref<9x8x128xf32, #tpu.memory_space<vmem>>, vector<9x8x128xf32>,
    %c0_2 = arith.constant 0 : index
    %c0_3 = arith.constant 0 : index
    %2 = vector.load %arg3[%c0_2, %c0_3] : memref<240x128xf32, #tpu.memory_space<vmem>>, vector<32x48xf32>
    %c32 = arith.constant 32 : index
    %c0_4 = arith.constant 0 : index
    %3 = vector.load %arg3[%c32, %c0_4] : memref<240x128xf32, #tpu.memory_space<vmem>>, vector<32x96xf32>
    %c176 = arith.constant 176 : index
    %c0_5 = arith.constant 0 : index
    %4 = vector.load %arg3[%c176, %c0_5] : memref<240x128xf32, #tpu.memory_space<vmem>>, vector<8x32xf32>
    %c184 = arith.constant 184 : index
    %c0_6 = arith.constant 0 : index
    %5 = vector.load %arg3[%c184, %c0_6] : memref<240x128xf32, #tpu.memory_space<vmem>>, vector<1x48xf32>
    %c200 = arith.constant 200 : index
    %c0_7 = arith.constant 0 : index
    %6 = vector.load %arg3[%c200, %c0_7] : memref<240x128xf32, #tpu.memory_space<vmem>>, vector<1x96xf32>
    %c192 = arith.constant 192 : index
    %c0_8 = arith.constant 0 : index
    %7 = vector.load %arg3[%c192, %c0_8] : memref<240x128xf32, #tpu.memory_space<vmem>>, vector<8x48xf32>
    %c208 = arith.constant 208 : index
    %c0_9 = arith.constant 0 : index
    %8 = vector.load %arg3[%c208, %c0_9] : memref<240x128xf32, #tpu.memory_space<vmem>>, vector<8x96xf32>
    %c216 = arith.constant 216 : index
    %c0_10 = arith.constant 0 : index
    %9 = vector.load %arg3[%c216, %c0_10] : memref<240x128xf32, #tpu.memory_space<vmem>>, vector<8x8xf32>
    %c224 = arith.constant 224 : index
    %c0_11 = arith.constant 0 : index
    %10 = vector.load %arg3[%c224, %c0_11] : memref<240x128xf32, #tpu.memory_space<vmem>>, vector<8x32xf32>
    %c232 = arith.constant 232 : index
    %c0_12 = arith.constant 0 : index
    %11 = vector.load %arg3[%c232, %c0_12] : memref<240x128xf32, #tpu.memory_space<vmem>>, vector<8x16xf32>
    %c64 = arith.constant 64 : index
    %c0_13 = arith.constant 0 : index
    %12 = vector.load %arg3[%c64, %c0_13] : memref<240x128xf32, #tpu.memory_space<vmem>>, vector<8x48xf32>
    %13 = arith.truncf %12 : vector<8x48xf32> to vector<8x48xbf16>
    %c72 = arith.constant 72 : index
    %c0_14 = arith.constant 0 : index
    %14 = vector.load %arg3[%c72, %c0_14] : memref<240x128xf32, #tpu.memory_space<vmem>>, vector<16x48xf32>
    %15 = arith.truncf %14 : vector<16x48xf32> to vector<16x48xbf16>
    %c88 = arith.constant 88 : index
    %c0_15 = arith.constant 0 : index
    %16 = vector.load %arg3[%c88, %c0_15] : memref<240x128xf32, #tpu.memory_space<vmem>>, vector<16x8xf32>
    %17 = arith.truncf %16 : vector<16x8xf32> to vector<16x8xbf16>
    %c104 = arith.constant 104 : index
    %c0_16 = arith.constant 0 : index
    %18 = vector.load %arg3[%c104, %c0_16] : memref<240x128xf32, #tpu.memory_space<vmem>>, vector<4x96xf32>
    %19 = arith.truncf %18 : vector<4x96xf32> to vector<4x96xbf16>
    %c112 = arith.constant 112 : index
    %c0_17 = arith.constant 0 : index
    %20 = vector.load %arg3[%c112, %c0_17] : memref<240x128xf32, #tpu.memory_space<vmem>>, vector<32x96xf32>
    %21 = arith.truncf %20 : vector<32x96xf32> to vector<32x96xbf16>
    %c144 = arith.constant 144 : index
    %c0_18 = arith.constant 0 : index
    %22 = vector.load %arg3[%c144, %c0_18] : memref<240x128xf32, #tpu.memory_space<vmem>>, vector<32x8xf32>
    %23 = arith.truncf %22 : vector<32x8xf32> to vector<32x8xbf16>
    %c0_19 = arith.constant 0 : index
    %c0_20 = arith.constant 0 : index
    %c0_21 = arith.constant 0 : index
    %24 = vector.load %arg1[%c0_19, %c0_20, %c0_21] : memref<1x64x32xf32, #tpu.memory_space<vmem>>, vector<1x64x32xf32>
    %25 = vector.shape_cast %24 : vector<1x64x32xf32> to vector<64x32xf32>
    %cst_22 = arith.constant dense<0.000000e+00> : vector<64x48xf32>
    %26 = tpu.matmul %25, %2, %cst_22 {dimension_numbers = #tpu.dot_dimension_numbers<[1], [0], [0], [1], [0, 0, 1, 1], [], []>} : vector<64x32xf32>, vector<32x48xf32>, vector<64x48xf32> -> vector<64x48xf32>
    %27 = vector.broadcast %5 : vector<1x48xf32> to vector<64x48xf32>
    %28 = arith.addf %26, %27 : vector<64x48xf32>
    %cst_23 = arith.constant dense<0.000000e+00> : vector<64x96xf32>
    %29 = tpu.matmul %25, %3, %cst_23 {dimension_numbers = #tpu.dot_dimension_numbers<[1], [0], [0], [1], [0, 0, 1, 1], [], []>} : vector<64x32xf32>, vector<32x96xf32>, vector<64x96xf32> -> vector<64x96xf32>
    %30 = vector.broadcast %6 : vector<1x96xf32> to vector<64x96xf32>
    %31 = arith.addf %29, %30 : vector<64x96xf32>
    %c0_24 = arith.constant 0 : index
    %c0_25 = arith.constant 0 : index
    %32 = vector.load %arg2[%c0_24, %c0_25] : memref<8x8xf32, #tpu.memory_space<vmem>>, vector<8x8xf32>
    %cst_26 = arith.constant dense<0.000000e+00> : vector<8x32xf32>
    %33 = tpu.matmul %32, %4, %cst_26 {dimension_numbers = #tpu.dot_dimension_numbers<[1], [0], [0], [1], [0, 0, 1, 1], [], []>} : vector<8x8xf32>, vector<8x32xf32>, vector<8x32xf32> -> vector<8x32xf32>
    %34 = arith.addf %33, %10 : vector<8x32xf32>
    %c8 = arith.constant 8 : index
    %c0_27 = arith.constant 0 : index
    %c0_28 = arith.constant 0 : index
    %35 = vector.load %arg4[%c8, %c0_27, %c0_28] : memref<9x8x128xf32, #tpu.memory_space<vmem>>, vector<1x8x32xf32>
    %36 = vector.shape_cast %35 : vector<1x8x32xf32> to vector<8x32xf32>
    %37 = vector.shape_cast %34 : vector<8x32xf32> to vector<1x8x32xf32>
    tpu.vector_store %arg4[%c8, %c0_27, %c0_28], %37 {strides = array<i32>} : memref<9x8x128xf32, #tpu.memory_space<vmem>>, vector<1x8x32xf32>,
    %38 = arith.truncf %34 : vector<8x32xf32> to vector<8x32xbf16>
    %cst_29 = arith.constant dense<0.000000e+00> : vector<8x8xf32>
    %39 = tpu.matmul %38, %23, %cst_29 {dimension_numbers = #tpu.dot_dimension_numbers<[1], [0], [0], [1], [0, 0, 1, 1], [], []>} : vector<8x32xbf16>, vector<32x8xbf16>, vector<8x8xf32> -> vector<8x8xf32>
    %40 = vector.extract_strided_slice %28 {offsets = [0, 0], sizes = [8, 48], strides = [1, 1]} : vector<64x48xf32> to vector<8x48xf32>
    %41 = arith.truncf %39 : vector<8x8xf32> to vector<8x8xbf16>
    %cst_30 = arith.constant dense<0.000000e+00> : vector<8x48xf32>
    %42 = tpu.matmul %41, %13, %cst_30 {dimension_numbers = #tpu.dot_dimension_numbers<[1], [0], [0], [1], [0, 0, 1, 1], [], []>} : vector<8x8xbf16>, vector<8x48xbf16>, vector<8x48xf32> -> vector<8x48xf32>
    %43 = arith.addf %40, %42 : vector<8x48xf32>
    %44 = arith.truncf %11 : vector<8x16xf32> to vector<8x16xbf16>
    %cst_31 = arith.constant dense<0.000000e+00> : vector<8x48xf32>
    %45 = tpu.matmul %44, %15, %cst_31 {dimension_numbers = #tpu.dot_dimension_numbers<[1], [0], [0], [1], [0, 0, 1, 1], [], []>} : vector<8x16xbf16>, vector<16x48xbf16>, vector<8x48xf32> -> vector<8x48xf32>
    %46 = arith.addf %45, %7 : vector<8x48xf32>
    %47 = arith.addf %43, %46 : vector<8x48xf32>
    %48 = vector.extract_strided_slice %47 {offsets = [0, 0], sizes = [8, 32], strides = [1, 1]} : vector<8x48xf32> to vector<8x32xf32>
    %49 = arith.negf %48 : vector<8x32xf32>
    %50 = math.exp %49 : vector<8x32xf32>
    %cst_32 = arith.constant 1.000000e+00 : f32
    %51 = vector.broadcast %cst_32 : f32 to vector<8x32xf32>
    %52 = arith.addf %51, %50 : vector<8x32xf32>
    %53 = arith.divf %51, %52 : vector<8x32xf32>
    %54 = vector.extract_strided_slice %53 {offsets = [0, 0], sizes = [8, 16], strides = [1, 1]} : vector<8x32xf32> to vector<8x16xf32>
    %55 = vector.extract_strided_slice %53 {offsets = [0, 16], sizes = [8, 16], strides = [1, 1]} : vector<8x32xf32> to vector<8x16xf32>
    %56 = vector.extract_strided_slice %43 {offsets = [0, 32], sizes = [8, 16], strides = [1, 1]} : vector<8x48xf32> to vector<8x16xf32>
    %57 = vector.extract_strided_slice %46 {offsets = [0, 32], sizes = [8, 16], strides = [1, 1]} : vector<8x48xf32> to vector<8x16xf32>
    %58 = arith.mulf %54, %57 : vector<8x16xf32>
    %59 = arith.addf %56, %58 : vector<8x16xf32>
    %60 = math.tanh %59 : vector<8x16xf32>
    %cst_33 = arith.constant 1.000000e+00 : f32
    %61 = vector.broadcast %cst_33 : f32 to vector<8x16xf32>
    %62 = arith.subf %61, %55 : vector<8x16xf32>
    %63 = arith.mulf %62, %60 : vector<8x16xf32>
    %64 = arith.mulf %55, %11 : vector<8x16xf32>
    %65 = arith.addf %63, %64 : vector<8x16xf32>
    %cst_34 = arith.constant -5.000000e+00 : f32
    %cst_35 = arith.constant 5.000000e+00 : f32
    %66 = vector.broadcast %cst_34 : f32 to vector<8x16xf32>
    %67 = arith.maximumf %66, %65 : vector<8x16xf32>
    %68 = vector.broadcast %cst_35 : f32 to vector<8x16xf32>
    %69 = arith.minimumf %68, %67 : vector<8x16xf32>
    %70 = arith.truncf %69 : vector<8x16xf32> to vector<8x16xbf16>
    %cst_36 = arith.constant dense<0.000000e+00> : vector<8x8xf32>
    %71 = tpu.matmul %70, %17, %cst_36 {dimension_numbers = #tpu.dot_dimension_numbers<[1], [0], [0], [1], [0, 0, 1, 1], [], []>} : vector<8x16xbf16>, vector<16x8xbf16>, vector<8x8xf32> -> vector<8x8xf32>
    %72 = arith.addf %71, %9 : vector<8x8xf32>
    %73 = vector.extract_strided_slice %72 {offsets = [0, 0], sizes = [8, 4], strides = [1, 1]} : vector<8x8xf32> to vector<8x4xf32>
    %74 = vector.extract_strided_slice %72 {offsets = [0, 4], sizes = [8, 4], strides = [1, 1]} : vector<8x8xf32> to vector<8x4xf32>
    %cst_37 = arith.constant 5.000000e-01 : f32
    %75 = vector.broadcast %cst_37 : f32 to vector<8x4xf32>
    %76 = arith.mulf %75, %74 : vector<8x4xf32>
    %77 = math.exp %76 : vector<8x4xf32>
    %c0_38 = arith.constant 0 : index
    %c0_39 = arith.constant 0 : index
    %c24 = arith.constant 24 : index
    %78 = vector.load %arg1[%c0_38, %c0_39, %c24] : memref<1x64x32xf32, #tpu.memory_space<vmem>>, vector<1x8x4xf32>
    %79 = vector.shape_cast %78 : vector<1x8x4xf32> to vector<8x4xf32>
    %80 = arith.mulf %77, %79 : vector<8x4xf32>
    %81 = arith.addf %73, %80 : vector<8x4xf32>
    %82 = vector.extract_strided_slice %31 {offsets = [0, 0], sizes = [8, 96], strides = [1, 1]} : vector<64x96xf32> to vector<8x96xf32>
    %83 = arith.truncf %81 : vector<8x4xf32> to vector<8x4xbf16>
    %cst_40 = arith.constant dense<0.000000e+00> : vector<8x96xf32>
    %84 = tpu.matmul %83, %19, %cst_40 {dimension_numbers = #tpu.dot_dimension_numbers<[1], [0], [0], [1], [0, 0, 1, 1], [], []>} : vector<8x4xbf16>, vector<4x96xbf16>, vector<8x96xf32> -> vector<8x96xf32>
    %85 = arith.addf %82, %84 : vector<8x96xf32>
    %86 = arith.truncf %34 : vector<8x32xf32> to vector<8x32xbf16>
    %cst_41 = arith.constant dense<0.000000e+00> : vector<8x96xf32>
    %87 = tpu.matmul %86, %21, %cst_41 {dimension_numbers = #tpu.dot_dimension_numbers<[1], [0], [0], [1], [0, 0, 1, 1], [], []>} : vector<8x32xbf16>, vector<32x96xbf16>, vector<8x96xf32> -> vector<8x96xf32>
    %88 = arith.addf %87, %8 : vector<8x96xf32>
    %89 = arith.addf %85, %88 : vector<8x96xf32>
    %90 = vector.extract_strided_slice %89 {offsets = [0, 0], sizes = [8, 64], strides = [1, 1]} : vector<8x96xf32> to vector<8x64xf32>
    %91 = arith.negf %90 : vector<8x64xf32>
    %92 = math.exp %91 : vector<8x64xf32>
    %cst_42 = arith.constant 1.000000e+00 : f32
    %93 = vector.broadcast %cst_42 : f32 to vector<8x64xf32>
    %94 = arith.addf %93, %92 : vector<8x64xf32>
    %95 = arith.divf %93, %94 : vector<8x64xf32>
    %96 = vector.extract_strided_slice %95 {offsets = [0, 0], sizes = [8, 32], strides = [1, 1]} : vector<8x64xf32> to vector<8x32xf32>
    %97 = vector.extract_strided_slice %95 {offsets = [0, 32], sizes = [8, 32], strides = [1, 1]} : vector<8x64xf32> to vector<8x32xf32>
    %98 = vector.extract_strided_slice %85 {offsets = [0, 64], sizes = [8, 32], strides = [1, 1]} : vector<8x96xf32> to vector<8x32xf32>
    %99 = vector.extract_strided_slice %88 {offsets = [0, 64], sizes = [8, 32], strides = [1, 1]} : vector<8x96xf32> to vector<8x32xf32>
    %100 = arith.mulf %96, %99 : vector<8x32xf32>
    %101 = arith.addf %98, %100 : vector<8x32xf32>
    %102 = math.tanh %101 : vector<8x32xf32>
    %cst_43 = arith.constant 1.000000e+00 : f32
    %103 = vector.broadcast %cst_43 : f32 to vector<8x32xf32>
    %104 = arith.subf %103, %97 : vector<8x32xf32>
    %105 = arith.mulf %104, %102 : vector<8x32xf32>
    %106 = arith.mulf %97, %34 : vector<8x32xf32>
    %107 = arith.addf %105, %106 : vector<8x32xf32>
    %cst_44 = arith.constant -5.000000e+00 : f32
    %cst_45 = arith.constant 5.000000e+00 : f32
    %108 = vector.broadcast %cst_44 : f32 to vector<8x32xf32>
    %109 = arith.maximumf %108, %107 : vector<8x32xf32>
    %110 = vector.broadcast %cst_45 : f32 to vector<8x32xf32>
    %111 = arith.minimumf %110, %109 : vector<8x32xf32>
    %112 = arith.truncf %111 : vector<8x32xf32> to vector<8x32xbf16>
    %cst_46 = arith.constant dense<0.000000e+00> : vector<8x8xf32>
    %113 = tpu.matmul %112, %23, %cst_46 {dimension_numbers = #tpu.dot_dimension_numbers<[1], [0], [0], [1], [0, 0, 1, 1], [], []>} : vector<8x32xbf16>, vector<32x8xbf16>, vector<8x8xf32> -> vector<8x8xf32>
    %c0_47 = arith.constant 0 : index
    %c0_48 = arith.constant 0 : index
    %c0_49 = arith.constant 0 : index
    %114 = vector.load %arg4[%c0_47, %c0_48, %c0_49] : memref<9x8x128xf32, #tpu.memory_space<vmem>>, vector<1x8x32xf32>
    %115 = vector.shape_cast %114 : vector<1x8x32xf32> to vector<8x32xf32>
    %116 = vector.shape_cast %111 : vector<8x32xf32> to vector<1x8x32xf32>
    tpu.vector_store %arg4[%c0_47, %c0_48, %c0_49], %116 {strides = array<i32>} : memref<9x8x128xf32, #tpu.memory_space<vmem>>, vector<1x8x32xf32>,
    %c0_50 = arith.constant 0 : index
    %c0_51 = arith.constant 0 : index
    %c32_52 = arith.constant 32 : index
    %117 = vector.load %arg4[%c0_50, %c0_51, %c32_52] : memref<9x8x128xf32, #tpu.memory_space<vmem>>, vector<1x8x16xf32>
    %118 = vector.shape_cast %117 : vector<1x8x16xf32> to vector<8x16xf32>
    %119 = vector.shape_cast %69 : vector<8x16xf32> to vector<1x8x16xf32>
    tpu.vector_store %arg4[%c0_50, %c0_51, %c32_52], %119 {strides = array<i32>} : memref<9x8x128xf32, #tpu.memory_space<vmem>>, vector<1x8x16xf32>,
    %c0_53 = arith.constant 0 : index
    %c0_54 = arith.constant 0 : index
    %c48 = arith.constant 48 : index
    %120 = vector.load %arg4[%c0_53, %c0_54, %c48] : memref<9x8x128xf32, #tpu.memory_space<vmem>>, vector<1x8x4xf32>
    %121 = vector.shape_cast %120 : vector<1x8x4xf32> to vector<8x4xf32>
    %122 = vector.shape_cast %73 : vector<8x4xf32> to vector<1x8x4xf32>
    tpu.vector_store %arg4[%c0_53, %c0_54, %c48], %122 {strides = array<i32>} : memref<9x8x128xf32, #tpu.memory_space<vmem>>, vector<1x8x4xf32>,
    %c0_55 = arith.constant 0 : index
    %c0_56 = arith.constant 0 : index
    %c56 = arith.constant 56 : index
    %123 = vector.load %arg4[%c0_55, %c0_56, %c56] : memref<9x8x128xf32, #tpu.memory_space<vmem>>, vector<1x8x4xf32>
    %124 = vector.shape_cast %123 : vector<1x8x4xf32> to vector<8x4xf32>
    %125 = vector.shape_cast %77 : vector<8x4xf32> to vector<1x8x4xf32>
    tpu.vector_store %arg4[%c0_55, %c0_56, %c56], %125 {strides = array<i32>} : memref<9x8x128xf32, #tpu.memory_space<vmem>>, vector<1x8x4xf32>,
    %c0_57 = arith.constant 0 : index
    %c0_58 = arith.constant 0 : index
    %c64_59 = arith.constant 64 : index
    %126 = vector.load %arg4[%c0_57, %c0_58, %c64_59] : memref<9x8x128xf32, #tpu.memory_space<vmem>>, vector<1x8x4xf32>
    %127 = vector.shape_cast %126 : vector<1x8x4xf32> to vector<8x4xf32>
    %128 = vector.shape_cast %81 : vector<8x4xf32> to vector<1x8x4xf32>
    tpu.vector_store %arg4[%c0_57, %c0_58, %c64_59], %128 {strides = array<i32>} : memref<9x8x128xf32, #tpu.memory_space<vmem>>, vector<1x8x4xf32>,
    %c0_60 = arith.constant 0 : index
    %c0_61 = arith.constant 0 : index
    %c72_62 = arith.constant 72 : index
    %129 = vector.load %arg4[%c0_60, %c0_61, %c72_62] : memref<9x8x128xf32, #tpu.memory_space<vmem>>, vector<1x8x8xf32>
    %130 = vector.shape_cast %129 : vector<1x8x8xf32> to vector<8x8xf32>
    %131 = vector.shape_cast %113 : vector<8x8xf32> to vector<1x8x8xf32>
    tpu.vector_store %arg4[%c0_60, %c0_61, %c72_62], %131 {strides = array<i32>} : memref<9x8x128xf32, #tpu.memory_space<vmem>>, vector<1x8x8xf32>,
    %132 = vector.extract_strided_slice %28 {offsets = [8, 0], sizes = [8, 48], strides = [1, 1]} : vector<64x48xf32> to vector<8x48xf32>
    %133 = arith.truncf %113 : vector<8x8xf32> to vector<8x8xbf16>
    %cst_63 = arith.constant dense<0.000000e+00> : vector<8x48xf32>
    %134 = tpu.matmul %133, %13, %cst_63 {dimension_numbers = #tpu.dot_dimension_numbers<[1], [0], [0], [1], [0, 0, 1, 1], [], []>} : vector<8x8xbf16>, vector<8x48xbf16>, vector<8x48xf32> -> vector<8x48xf32>
    %135 = arith.addf %132, %134 : vector<8x48xf32>
    %136 = arith.truncf %69 : vector<8x16xf32> to vector<8x16xbf16>
    %cst_64 = arith.constant dense<0.000000e+00> : vector<8x48xf32>
    %137 = tpu.matmul %136, %15, %cst_64 {dimension_numbers = #tpu.dot_dimension_numbers<[1], [0], [0], [1], [0, 0, 1, 1], [], []>} : vector<8x16xbf16>, vector<16x48xbf16>, vector<8x48xf32> -> vector<8x48xf32>
    %138 = arith.addf %137, %7 : vector<8x48xf32>
    %139 = arith.addf %135, %138 : vector<8x48xf32>
    %140 = vector.extract_strided_slice %139 {offsets = [0, 0], sizes = [8, 32], strides = [1, 1]} : vector<8x48xf32> to vector<8x32xf32>
    %141 = arith.negf %140 : vector<8x32xf32>
    %142 = math.exp %141 : vector<8x32xf32>
    %cst_65 = arith.constant 1.000000e+00 : f32
    %143 = vector.broadcast %cst_65 : f32 to vector<8x32xf32>
    %144 = arith.addf %143, %142 : vector<8x32xf32>
    %145 = arith.divf %143, %144 : vector<8x32xf32>
    %146 = vector.extract_strided_slice %145 {offsets = [0, 0], sizes = [8, 16], strides = [1, 1]} : vector<8x32xf32> to vector<8x16xf32>
    %147 = vector.extract_strided_slice %145 {offsets = [0, 16], sizes = [8, 16], strides = [1, 1]} : vector<8x32xf32> to vector<8x16xf32>
    %148 = vector.extract_strided_slice %135 {offsets = [0, 32], sizes = [8, 16], strides = [1, 1]} : vector<8x48xf32> to vector<8x16xf32>
    %149 = vector.extract_strided_slice %138 {offsets = [0, 32], sizes = [8, 16], strides = [1, 1]} : vector<8x48xf32> to vector<8x16xf32>
    %150 = arith.mulf %146, %149 : vector<8x16xf32>
    %151 = arith.addf %148, %150 : vector<8x16xf32>
    %152 = math.tanh %151 : vector<8x16xf32>
    %cst_66 = arith.constant 1.000000e+00 : f32
    %153 = vector.broadcast %cst_66 : f32 to vector<8x16xf32>
    %154 = arith.subf %153, %147 : vector<8x16xf32>
    %155 = arith.mulf %154, %152 : vector<8x16xf32>
    %156 = arith.mulf %147, %69 : vector<8x16xf32>
    %157 = arith.addf %155, %156 : vector<8x16xf32>
    %cst_67 = arith.constant -5.000000e+00 : f32
    %cst_68 = arith.constant 5.000000e+00 : f32
    %158 = vector.broadcast %cst_67 : f32 to vector<8x16xf32>
    %159 = arith.maximumf %158, %157 : vector<8x16xf32>
    %160 = vector.broadcast %cst_68 : f32 to vector<8x16xf32>
    %161 = arith.minimumf %160, %159 : vector<8x16xf32>
    %162 = arith.truncf %161 : vector<8x16xf32> to vector<8x16xbf16>
    %cst_69 = arith.constant dense<0.000000e+00> : vector<8x8xf32>
    %163 = tpu.matmul %162, %17, %cst_69 {dimension_numbers = #tpu.dot_dimension_numbers<[1], [0], [0], [1], [0, 0, 1, 1], [], []>} : vector<8x16xbf16>, vector<16x8xbf16>, vector<8x8xf32> -> vector<8x8xf32>
    %164 = arith.addf %163, %9 : vector<8x8xf32>
    %165 = vector.extract_strided_slice %164 {offsets = [0, 0], sizes = [8, 4], strides = [1, 1]} : vector<8x8xf32> to vector<8x4xf32>
    %166 = vector.extract_strided_slice %164 {offsets = [0, 4], sizes = [8, 4], strides = [1, 1]} : vector<8x8xf32> to vector<8x4xf32>
    %cst_70 = arith.constant 5.000000e-01 : f32
    %167 = vector.broadcast %cst_70 : f32 to vector<8x4xf32>
    %168 = arith.mulf %167, %166 : vector<8x4xf32>
    %169 = math.exp %168 : vector<8x4xf32>
    %c0_71 = arith.constant 0 : index
    %c8_72 = arith.constant 8 : index
    %c24_73 = arith.constant 24 : index
    %170 = vector.load %arg1[%c0_71, %c8_72, %c24_73] : memref<1x64x32xf32, #tpu.memory_space<vmem>>, vector<1x8x4xf32>
    %171 = vector.shape_cast %170 : vector<1x8x4xf32> to vector<8x4xf32>
    %172 = arith.mulf %169, %171 : vector<8x4xf32>
    %173 = arith.addf %165, %172 : vector<8x4xf32>
    %174 = vector.extract_strided_slice %31 {offsets = [8, 0], sizes = [8, 96], strides = [1, 1]} : vector<64x96xf32> to vector<8x96xf32>
    %175 = arith.truncf %173 : vector<8x4xf32> to vector<8x4xbf16>
    %cst_74 = arith.constant dense<0.000000e+00> : vector<8x96xf32>
    %176 = tpu.matmul %175, %19, %cst_74 {dimension_numbers = #tpu.dot_dimension_numbers<[1], [0], [0], [1], [0, 0, 1, 1], [], []>} : vector<8x4xbf16>, vector<4x96xbf16>, vector<8x96xf32> -> vector<8x96xf32>
    %177 = arith.addf %174, %176 : vector<8x96xf32>
    %178 = arith.truncf %111 : vector<8x32xf32> to vector<8x32xbf16>
    %cst_75 = arith.constant dense<0.000000e+00> : vector<8x96xf32>
    %179 = tpu.matmul %178, %21, %cst_75 {dimension_numbers = #tpu.dot_dimension_numbers<[1], [0], [0], [1], [0, 0, 1, 1], [], []>} : vector<8x32xbf16>, vector<32x96xbf16>, vector<8x96xf32> -> vector<8x96xf32>
    %180 = arith.addf %179, %8 : vector<8x96xf32>
    %181 = arith.addf %177, %180 : vector<8x96xf32>
    %182 = vector.extract_strided_slice %181 {offsets = [0, 0], sizes = [8, 64], strides = [1, 1]} : vector<8x96xf32> to vector<8x64xf32>
    %183 = arith.negf %182 : vector<8x64xf32>
    %184 = math.exp %183 : vector<8x64xf32>
    %cst_76 = arith.constant 1.000000e+00 : f32
    %185 = vector.broadcast %cst_76 : f32 to vector<8x64xf32>
    %186 = arith.addf %185, %184 : vector<8x64xf32>
    %187 = arith.divf %185, %186 : vector<8x64xf32>
    %188 = vector.extract_strided_slice %187 {offsets = [0, 0], sizes = [8, 32], strides = [1, 1]} : vector<8x64xf32> to vector<8x32xf32>
    %189 = vector.extract_strided_slice %187 {offsets = [0, 32], sizes = [8, 32], strides = [1, 1]} : vector<8x64xf32> to vector<8x32xf32>
    %190 = vector.extract_strided_slice %177 {offsets = [0, 64], sizes = [8, 32], strides = [1, 1]} : vector<8x96xf32> to vector<8x32xf32>
    %191 = vector.extract_strided_slice %180 {offsets = [0, 64], sizes = [8, 32], strides = [1, 1]} : vector<8x96xf32> to vector<8x32xf32>
    %192 = arith.mulf %188, %191 : vector<8x32xf32>
    %193 = arith.addf %190, %192 : vector<8x32xf32>
    %194 = math.tanh %193 : vector<8x32xf32>
    %cst_77 = arith.constant 1.000000e+00 : f32
    %195 = vector.broadcast %cst_77 : f32 to vector<8x32xf32>
    %196 = arith.subf %195, %189 : vector<8x32xf32>
    %197 = arith.mulf %196, %194 : vector<8x32xf32>
    %198 = arith.mulf %189, %111 : vector<8x32xf32>
    %199 = arith.addf %197, %198 : vector<8x32xf32>
    %cst_78 = arith.constant -5.000000e+00 : f32
    %cst_79 = arith.constant 5.000000e+00 : f32
    %200 = vector.broadcast %cst_78 : f32 to vector<8x32xf32>
    %201 = arith.maximumf %200, %199 : vector<8x32xf32>
    %202 = vector.broadcast %cst_79 : f32 to vector<8x32xf32>
    %203 = arith.minimumf %202, %201 : vector<8x32xf32>
    %204 = arith.truncf %203 : vector<8x32xf32> to vector<8x32xbf16>
    %cst_80 = arith.constant dense<0.000000e+00> : vector<8x8xf32>
    %205 = tpu.matmul %204, %23, %cst_80 {dimension_numbers = #tpu.dot_dimension_numbers<[1], [0], [0], [1], [0, 0, 1, 1], [], []>} : vector<8x32xbf16>, vector<32x8xbf16>, vector<8x8xf32> -> vector<8x8xf32>
    %c1 = arith.constant 1 : index
    %c0_81 = arith.constant 0 : index
    %c0_82 = arith.constant 0 : index
    %206 = vector.load %arg4[%c1, %c0_81, %c0_82] : memref<9x8x128xf32, #tpu.memory_space<vmem>>, vector<1x8x32xf32>
    %207 = vector.shape_cast %206 : vector<1x8x32xf32> to vector<8x32xf32>
    %208 = vector.shape_cast %203 : vector<8x32xf32> to vector<1x8x32xf32>
    tpu.vector_store %arg4[%c1, %c0_81, %c0_82], %208 {strides = array<i32>} : memref<9x8x128xf32, #tpu.memory_space<vmem>>, vector<1x8x32xf32>,
    %c1_83 = arith.constant 1 : index
    %c0_84 = arith.constant 0 : index
    %c32_85 = arith.constant 32 : index
    %209 = vector.load %arg4[%c1_83, %c0_84, %c32_85] : memref<9x8x128xf32, #tpu.memory_space<vmem>>, vector<1x8x16xf32>
    %210 = vector.shape_cast %209 : vector<1x8x16xf32> to vector<8x16xf32>
    %211 = vector.shape_cast %161 : vector<8x16xf32> to vector<1x8x16xf32>
    tpu.vector_store %arg4[%c1_83, %c0_84, %c32_85], %211 {strides = array<i32>} : memref<9x8x128xf32, #tpu.memory_space<vmem>>, vector<1x8x16xf32>,
    %c1_86 = arith.constant 1 : index
    %c0_87 = arith.constant 0 : index
    %c48_88 = arith.constant 48 : index
    %212 = vector.load %arg4[%c1_86, %c0_87, %c48_88] : memref<9x8x128xf32, #tpu.memory_space<vmem>>, vector<1x8x4xf32>
    %213 = vector.shape_cast %212 : vector<1x8x4xf32> to vector<8x4xf32>
    %214 = vector.shape_cast %165 : vector<8x4xf32> to vector<1x8x4xf32>
    tpu.vector_store %arg4[%c1_86, %c0_87, %c48_88], %214 {strides = array<i32>} : memref<9x8x128xf32, #tpu.memory_space<vmem>>, vector<1x8x4xf32>,
    %c1_89 = arith.constant 1 : index
    %c0_90 = arith.constant 0 : index
    %c56_91 = arith.constant 56 : index
    %215 = vector.load %arg4[%c1_89, %c0_90, %c56_91] : memref<9x8x128xf32, #tpu.memory_space<vmem>>, vector<1x8x4xf32>
    %216 = vector.shape_cast %215 : vector<1x8x4xf32> to vector<8x4xf32>
    %217 = vector.shape_cast %169 : vector<8x4xf32> to vector<1x8x4xf32>
    tpu.vector_store %arg4[%c1_89, %c0_90, %c56_91], %217 {strides = array<i32>} : memref<9x8x128xf32, #tpu.memory_space<vmem>>, vector<1x8x4xf32>,
    %c1_92 = arith.constant 1 : index
    %c0_93 = arith.constant 0 : index
    %c64_94 = arith.constant 64 : index
    %218 = vector.load %arg4[%c1_92, %c0_93, %c64_94] : memref<9x8x128xf32, #tpu.memory_space<vmem>>, vector<1x8x4xf32>
    %219 = vector.shape_cast %218 : vector<1x8x4xf32> to vector<8x4xf32>
    %220 = vector.shape_cast %173 : vector<8x4xf32> to vector<1x8x4xf32>
    tpu.vector_store %arg4[%c1_92, %c0_93, %c64_94], %220 {strides = array<i32>} : memref<9x8x128xf32, #tpu.memory_space<vmem>>, vector<1x8x4xf32>,
    %c1_95 = arith.constant 1 : index
    %c0_96 = arith.constant 0 : index
    %c72_97 = arith.constant 72 : index
    %221 = vector.load %arg4[%c1_95, %c0_96, %c72_97] : memref<9x8x128xf32, #tpu.memory_space<vmem>>, vector<1x8x8xf32>
    %222 = vector.shape_cast %221 : vector<1x8x8xf32> to vector<8x8xf32>
    %223 = vector.shape_cast %205 : vector<8x8xf32> to vector<1x8x8xf32>
    tpu.vector_store %arg4[%c1_95, %c0_96, %c72_97], %223 {strides = array<i32>} : memref<9x8x128xf32, #tpu.memory_space<vmem>>, vector<1x8x8xf32>,
    %224 = vector.extract_strided_slice %28 {offsets = [16, 0], sizes = [8, 48], strides = [1, 1]} : vector<64x48xf32> to vector<8x48xf32>
    %225 = arith.truncf %205 : vector<8x8xf32> to vector<8x8xbf16>
    %cst_98 = arith.constant dense<0.000000e+00> : vector<8x48xf32>
    %226 = tpu.matmul %225, %13, %cst_98 {dimension_numbers = #tpu.dot_dimension_numbers<[1], [0], [0], [1], [0, 0, 1, 1], [], []>} : vector<8x8xbf16>, vector<8x48xbf16>, vector<8x48xf32> -> vector<8x48xf32>
    %227 = arith.addf %224, %226 : vector<8x48xf32>
    %228 = arith.truncf %161 : vector<8x16xf32> to vector<8x16xbf16>
    %cst_99 = arith.constant dense<0.000000e+00> : vector<8x48xf32>
    %229 = tpu.matmul %228, %15, %cst_99 {dimension_numbers = #tpu.dot_dimension_numbers<[1], [0], [0], [1], [0, 0, 1, 1], [], []>} : vector<8x16xbf16>, vector<16x48xbf16>, vector<8x48xf32> -> vector<8x48xf32>
    %230 = arith.addf %229, %7 : vector<8x48xf32>
    %231 = arith.addf %227, %230 : vector<8x48xf32>
    %232 = vector.extract_strided_slice %231 {offsets = [0, 0], sizes = [8, 32], strides = [1, 1]} : vector<8x48xf32> to vector<8x32xf32>
    %233 = arith.negf %232 : vector<8x32xf32>
    %234 = math.exp %233 : vector<8x32xf32>
    %cst_100 = arith.constant 1.000000e+00 : f32
    %235 = vector.broadcast %cst_100 : f32 to vector<8x32xf32>
    %236 = arith.addf %235, %234 : vector<8x32xf32>
    %237 = arith.divf %235, %236 : vector<8x32xf32>
    %238 = vector.extract_strided_slice %237 {offsets = [0, 0], sizes = [8, 16], strides = [1, 1]} : vector<8x32xf32> to vector<8x16xf32>
    %239 = vector.extract_strided_slice %237 {offsets = [0, 16], sizes = [8, 16], strides = [1, 1]} : vector<8x32xf32> to vector<8x16xf32>
    %240 = vector.extract_strided_slice %227 {offsets = [0, 32], sizes = [8, 16], strides = [1, 1]} : vector<8x48xf32> to vector<8x16xf32>
    %241 = vector.extract_strided_slice %230 {offsets = [0, 32], sizes = [8, 16], strides = [1, 1]} : vector<8x48xf32> to vector<8x16xf32>
    %242 = arith.mulf %238, %241 : vector<8x16xf32>
    %243 = arith.addf %240, %242 : vector<8x16xf32>
    %244 = math.tanh %243 : vector<8x16xf32>
    %cst_101 = arith.constant 1.000000e+00 : f32
    %245 = vector.broadcast %cst_101 : f32 to vector<8x16xf32>
    %246 = arith.subf %245, %239 : vector<8x16xf32>
    %247 = arith.mulf %246, %244 : vector<8x16xf32>
    %248 = arith.mulf %239, %161 : vector<8x16xf32>
    %249 = arith.addf %247, %248 : vector<8x16xf32>
    %cst_102 = arith.constant -5.000000e+00 : f32
    %cst_103 = arith.constant 5.000000e+00 : f32
    %250 = vector.broadcast %cst_102 : f32 to vector<8x16xf32>
    %251 = arith.maximumf %250, %249 : vector<8x16xf32>
    %252 = vector.broadcast %cst_103 : f32 to vector<8x16xf32>
    %253 = arith.minimumf %252, %251 : vector<8x16xf32>
    %254 = arith.truncf %253 : vector<8x16xf32> to vector<8x16xbf16>
    %cst_104 = arith.constant dense<0.000000e+00> : vector<8x8xf32>
    %255 = tpu.matmul %254, %17, %cst_104 {dimension_numbers = #tpu.dot_dimension_numbers<[1], [0], [0], [1], [0, 0, 1, 1], [], []>} : vector<8x16xbf16>, vector<16x8xbf16>, vector<8x8xf32> -> vector<8x8xf32>
    %256 = arith.addf %255, %9 : vector<8x8xf32>
    %257 = vector.extract_strided_slice %256 {offsets = [0, 0], sizes = [8, 4], strides = [1, 1]} : vector<8x8xf32> to vector<8x4xf32>
    %258 = vector.extract_strided_slice %256 {offsets = [0, 4], sizes = [8, 4], strides = [1, 1]} : vector<8x8xf32> to vector<8x4xf32>
    %cst_105 = arith.constant 5.000000e-01 : f32
    %259 = vector.broadcast %cst_105 : f32 to vector<8x4xf32>
    %260 = arith.mulf %259, %258 : vector<8x4xf32>
    %261 = math.exp %260 : vector<8x4xf32>
    %c0_106 = arith.constant 0 : index
    %c16 = arith.constant 16 : index
    %c24_107 = arith.constant 24 : index
    %262 = vector.load %arg1[%c0_106, %c16, %c24_107] : memref<1x64x32xf32, #tpu.memory_space<vmem>>, vector<1x8x4xf32>
    %263 = vector.shape_cast %262 : vector<1x8x4xf32> to vector<8x4xf32>
    %264 = arith.mulf %261, %263 : vector<8x4xf32>
    %265 = arith.addf %257, %264 : vector<8x4xf32>
    %266 = vector.extract_strided_slice %31 {offsets = [16, 0], sizes = [8, 96], strides = [1, 1]} : vector<64x96xf32> to vector<8x96xf32>
    %267 = arith.truncf %265 : vector<8x4xf32> to vector<8x4xbf16>
    %cst_108 = arith.constant dense<0.000000e+00> : vector<8x96xf32>
    %268 = tpu.matmul %267, %19, %cst_108 {dimension_numbers = #tpu.dot_dimension_numbers<[1], [0], [0], [1], [0, 0, 1, 1], [], []>} : vector<8x4xbf16>, vector<4x96xbf16>, vector<8x96xf32> -> vector<8x96xf32>
    %269 = arith.addf %266, %268 : vector<8x96xf32>
    %270 = arith.truncf %203 : vector<8x32xf32> to vector<8x32xbf16>
    %cst_109 = arith.constant dense<0.000000e+00> : vector<8x96xf32>
    %271 = tpu.matmul %270, %21, %cst_109 {dimension_numbers = #tpu.dot_dimension_numbers<[1], [0], [0], [1], [0, 0, 1, 1], [], []>} : vector<8x32xbf16>, vector<32x96xbf16>, vector<8x96xf32> -> vector<8x96xf32>
    %272 = arith.addf %271, %8 : vector<8x96xf32>
    %273 = arith.addf %269, %272 : vector<8x96xf32>
    %274 = vector.extract_strided_slice %273 {offsets = [0, 0], sizes = [8, 64], strides = [1, 1]} : vector<8x96xf32> to vector<8x64xf32>
    %275 = arith.negf %274 : vector<8x64xf32>
    %276 = math.exp %275 : vector<8x64xf32>
    %cst_110 = arith.constant 1.000000e+00 : f32
    %277 = vector.broadcast %cst_110 : f32 to vector<8x64xf32>
    %278 = arith.addf %277, %276 : vector<8x64xf32>
    %279 = arith.divf %277, %278 : vector<8x64xf32>
    %280 = vector.extract_strided_slice %279 {offsets = [0, 0], sizes = [8, 32], strides = [1, 1]} : vector<8x64xf32> to vector<8x32xf32>
    %281 = vector.extract_strided_slice %279 {offsets = [0, 32], sizes = [8, 32], strides = [1, 1]} : vector<8x64xf32> to vector<8x32xf32>
    %282 = vector.extract_strided_slice %269 {offsets = [0, 64], sizes = [8, 32], strides = [1, 1]} : vector<8x96xf32> to vector<8x32xf32>
    %283 = vector.extract_strided_slice %272 {offsets = [0, 64], sizes = [8, 32], strides = [1, 1]} : vector<8x96xf32> to vector<8x32xf32>
    %284 = arith.mulf %280, %283 : vector<8x32xf32>
    %285 = arith.addf %282, %284 : vector<8x32xf32>
    %286 = math.tanh %285 : vector<8x32xf32>
    %cst_111 = arith.constant 1.000000e+00 : f32
    %287 = vector.broadcast %cst_111 : f32 to vector<8x32xf32>
    %288 = arith.subf %287, %281 : vector<8x32xf32>
    %289 = arith.mulf %288, %286 : vector<8x32xf32>
    %290 = arith.mulf %281, %203 : vector<8x32xf32>
    %291 = arith.addf %289, %290 : vector<8x32xf32>
    %cst_112 = arith.constant -5.000000e+00 : f32
    %cst_113 = arith.constant 5.000000e+00 : f32
    %292 = vector.broadcast %cst_112 : f32 to vector<8x32xf32>
    %293 = arith.maximumf %292, %291 : vector<8x32xf32>
    %294 = vector.broadcast %cst_113 : f32 to vector<8x32xf32>
    %295 = arith.minimumf %294, %293 : vector<8x32xf32>
    %296 = arith.truncf %295 : vector<8x32xf32> to vector<8x32xbf16>
    %cst_114 = arith.constant dense<0.000000e+00> : vector<8x8xf32>
    %297 = tpu.matmul %296, %23, %cst_114 {dimension_numbers = #tpu.dot_dimension_numbers<[1], [0], [0], [1], [0, 0, 1, 1], [], []>} : vector<8x32xbf16>, vector<32x8xbf16>, vector<8x8xf32> -> vector<8x8xf32>
    %c2 = arith.constant 2 : index
    %c0_115 = arith.constant 0 : index
    %c0_116 = arith.constant 0 : index
    %298 = vector.load %arg4[%c2, %c0_115, %c0_116] : memref<9x8x128xf32, #tpu.memory_space<vmem>>, vector<1x8x32xf32>
    %299 = vector.shape_cast %298 : vector<1x8x32xf32> to vector<8x32xf32>
    %300 = vector.shape_cast %295 : vector<8x32xf32> to vector<1x8x32xf32>
    tpu.vector_store %arg4[%c2, %c0_115, %c0_116], %300 {strides = array<i32>} : memref<9x8x128xf32, #tpu.memory_space<vmem>>, vector<1x8x32xf32>,
    %c2_117 = arith.constant 2 : index
    %c0_118 = arith.constant 0 : index
    %c32_119 = arith.constant 32 : index
    %301 = vector.load %arg4[%c2_117, %c0_118, %c32_119] : memref<9x8x128xf32, #tpu.memory_space<vmem>>, vector<1x8x16xf32>
    %302 = vector.shape_cast %301 : vector<1x8x16xf32> to vector<8x16xf32>
    %303 = vector.shape_cast %253 : vector<8x16xf32> to vector<1x8x16xf32>
    tpu.vector_store %arg4[%c2_117, %c0_118, %c32_119], %303 {strides = array<i32>} : memref<9x8x128xf32, #tpu.memory_space<vmem>>, vector<1x8x16xf32>,
    %c2_120 = arith.constant 2 : index
    %c0_121 = arith.constant 0 : index
    %c48_122 = arith.constant 48 : index
    %304 = vector.load %arg4[%c2_120, %c0_121, %c48_122] : memref<9x8x128xf32, #tpu.memory_space<vmem>>, vector<1x8x4xf32>
    %305 = vector.shape_cast %304 : vector<1x8x4xf32> to vector<8x4xf32>
    %306 = vector.shape_cast %257 : vector<8x4xf32> to vector<1x8x4xf32>
    tpu.vector_store %arg4[%c2_120, %c0_121, %c48_122], %306 {strides = array<i32>} : memref<9x8x128xf32, #tpu.memory_space<vmem>>, vector<1x8x4xf32>,
    %c2_123 = arith.constant 2 : index
    %c0_124 = arith.constant 0 : index
    %c56_125 = arith.constant 56 : index
    %307 = vector.load %arg4[%c2_123, %c0_124, %c56_125] : memref<9x8x128xf32, #tpu.memory_space<vmem>>, vector<1x8x4xf32>
    %308 = vector.shape_cast %307 : vector<1x8x4xf32> to vector<8x4xf32>
    %309 = vector.shape_cast %261 : vector<8x4xf32> to vector<1x8x4xf32>
    tpu.vector_store %arg4[%c2_123, %c0_124, %c56_125], %309 {strides = array<i32>} : memref<9x8x128xf32, #tpu.memory_space<vmem>>, vector<1x8x4xf32>,
    %c2_126 = arith.constant 2 : index
    %c0_127 = arith.constant 0 : index
    %c64_128 = arith.constant 64 : index
    %310 = vector.load %arg4[%c2_126, %c0_127, %c64_128] : memref<9x8x128xf32, #tpu.memory_space<vmem>>, vector<1x8x4xf32>
    %311 = vector.shape_cast %310 : vector<1x8x4xf32> to vector<8x4xf32>
    %312 = vector.shape_cast %265 : vector<8x4xf32> to vector<1x8x4xf32>
    tpu.vector_store %arg4[%c2_126, %c0_127, %c64_128], %312 {strides = array<i32>} : memref<9x8x128xf32, #tpu.memory_space<vmem>>, vector<1x8x4xf32>,
    %c2_129 = arith.constant 2 : index
    %c0_130 = arith.constant 0 : index
    %c72_131 = arith.constant 72 : index
    %313 = vector.load %arg4[%c2_129, %c0_130, %c72_131] : memref<9x8x128xf32, #tpu.memory_space<vmem>>, vector<1x8x8xf32>
    %314 = vector.shape_cast %313 : vector<1x8x8xf32> to vector<8x8xf32>
    %315 = vector.shape_cast %297 : vector<8x8xf32> to vector<1x8x8xf32>
    tpu.vector_store %arg4[%c2_129, %c0_130, %c72_131], %315 {strides = array<i32>} : memref<9x8x128xf32, #tpu.memory_space<vmem>>, vector<1x8x8xf32>,
    %316 = vector.extract_strided_slice %28 {offsets = [24, 0], sizes = [8, 48], strides = [1, 1]} : vector<64x48xf32> to vector<8x48xf32>
    %317 = arith.truncf %297 : vector<8x8xf32> to vector<8x8xbf16>
    %cst_132 = arith.constant dense<0.000000e+00> : vector<8x48xf32>
    %318 = tpu.matmul %317, %13, %cst_132 {dimension_numbers = #tpu.dot_dimension_numbers<[1], [0], [0], [1], [0, 0, 1, 1], [], []>} : vector<8x8xbf16>, vector<8x48xbf16>, vector<8x48xf32> -> vector<8x48xf32>
    %319 = arith.addf %316, %318 : vector<8x48xf32>
    %320 = arith.truncf %253 : vector<8x16xf32> to vector<8x16xbf16>
    %cst_133 = arith.constant dense<0.000000e+00> : vector<8x48xf32>
    %321 = tpu.matmul %320, %15, %cst_133 {dimension_numbers = #tpu.dot_dimension_numbers<[1], [0], [0], [1], [0, 0, 1, 1], [], []>} : vector<8x16xbf16>, vector<16x48xbf16>, vector<8x48xf32> -> vector<8x48xf32>
    %322 = arith.addf %321, %7 : vector<8x48xf32>
    %323 = arith.addf %319, %322 : vector<8x48xf32>
    %324 = vector.extract_strided_slice %323 {offsets = [0, 0], sizes = [8, 32], strides = [1, 1]} : vector<8x48xf32> to vector<8x32xf32>
    %325 = arith.negf %324 : vector<8x32xf32>
    %326 = math.exp %325 : vector<8x32xf32>
    %cst_134 = arith.constant 1.000000e+00 : f32
    %327 = vector.broadcast %cst_134 : f32 to vector<8x32xf32>
    %328 = arith.addf %327, %326 : vector<8x32xf32>
    %329 = arith.divf %327, %328 : vector<8x32xf32>
    %330 = vector.extract_strided_slice %329 {offsets = [0, 0], sizes = [8, 16], strides = [1, 1]} : vector<8x32xf32> to vector<8x16xf32>
    %331 = vector.extract_strided_slice %329 {offsets = [0, 16], sizes = [8, 16], strides = [1, 1]} : vector<8x32xf32> to vector<8x16xf32>
    %332 = vector.extract_strided_slice %319 {offsets = [0, 32], sizes = [8, 16], strides = [1, 1]} : vector<8x48xf32> to vector<8x16xf32>
    %333 = vector.extract_strided_slice %322 {offsets = [0, 32], sizes = [8, 16], strides = [1, 1]} : vector<8x48xf32> to vector<8x16xf32>
    %334 = arith.mulf %330, %333 : vector<8x16xf32>
    %335 = arith.addf %332, %334 : vector<8x16xf32>
    %336 = math.tanh %335 : vector<8x16xf32>
    %cst_135 = arith.constant 1.000000e+00 : f32
    %337 = vector.broadcast %cst_135 : f32 to vector<8x16xf32>
    %338 = arith.subf %337, %331 : vector<8x16xf32>
    %339 = arith.mulf %338, %336 : vector<8x16xf32>
    %340 = arith.mulf %331, %253 : vector<8x16xf32>
    %341 = arith.addf %339, %340 : vector<8x16xf32>
    %cst_136 = arith.constant -5.000000e+00 : f32
    %cst_137 = arith.constant 5.000000e+00 : f32
    %342 = vector.broadcast %cst_136 : f32 to vector<8x16xf32>
    %343 = arith.maximumf %342, %341 : vector<8x16xf32>
    %344 = vector.broadcast %cst_137 : f32 to vector<8x16xf32>
    %345 = arith.minimumf %344, %343 : vector<8x16xf32>
    %346 = arith.truncf %345 : vector<8x16xf32> to vector<8x16xbf16>
    %cst_138 = arith.constant dense<0.000000e+00> : vector<8x8xf32>
    %347 = tpu.matmul %346, %17, %cst_138 {dimension_numbers = #tpu.dot_dimension_numbers<[1], [0], [0], [1], [0, 0, 1, 1], [], []>} : vector<8x16xbf16>, vector<16x8xbf16>, vector<8x8xf32> -> vector<8x8xf32>
    %348 = arith.addf %347, %9 : vector<8x8xf32>
    %349 = vector.extract_strided_slice %348 {offsets = [0, 0], sizes = [8, 4], strides = [1, 1]} : vector<8x8xf32> to vector<8x4xf32>
    %350 = vector.extract_strided_slice %348 {offsets = [0, 4], sizes = [8, 4], strides = [1, 1]} : vector<8x8xf32> to vector<8x4xf32>
    %cst_139 = arith.constant 5.000000e-01 : f32
    %351 = vector.broadcast %cst_139 : f32 to vector<8x4xf32>
    %352 = arith.mulf %351, %350 : vector<8x4xf32>
    %353 = math.exp %352 : vector<8x4xf32>
    %c0_140 = arith.constant 0 : index
    %c24_141 = arith.constant 24 : index
    %c24_142 = arith.constant 24 : index
    %354 = vector.load %arg1[%c0_140, %c24_141, %c24_142] : memref<1x64x32xf32, #tpu.memory_space<vmem>>, vector<1x8x4xf32>
    %355 = vector.shape_cast %354 : vector<1x8x4xf32> to vector<8x4xf32>
    %356 = arith.mulf %353, %355 : vector<8x4xf32>
    %357 = arith.addf %349, %356 : vector<8x4xf32>
    %358 = vector.extract_strided_slice %31 {offsets = [24, 0], sizes = [8, 96], strides = [1, 1]} : vector<64x96xf32> to vector<8x96xf32>
    %359 = arith.truncf %357 : vector<8x4xf32> to vector<8x4xbf16>
    %cst_143 = arith.constant dense<0.000000e+00> : vector<8x96xf32>
    %360 = tpu.matmul %359, %19, %cst_143 {dimension_numbers = #tpu.dot_dimension_numbers<[1], [0], [0], [1], [0, 0, 1, 1], [], []>} : vector<8x4xbf16>, vector<4x96xbf16>, vector<8x96xf32> -> vector<8x96xf32>
    %361 = arith.addf %358, %360 : vector<8x96xf32>
    %362 = arith.truncf %295 : vector<8x32xf32> to vector<8x32xbf16>
    %cst_144 = arith.constant dense<0.000000e+00> : vector<8x96xf32>
    %363 = tpu.matmul %362, %21, %cst_144 {dimension_numbers = #tpu.dot_dimension_numbers<[1], [0], [0], [1], [0, 0, 1, 1], [], []>} : vector<8x32xbf16>, vector<32x96xbf16>, vector<8x96xf32> -> vector<8x96xf32>
    %364 = arith.addf %363, %8 : vector<8x96xf32>
    %365 = arith.addf %361, %364 : vector<8x96xf32>
    %366 = vector.extract_strided_slice %365 {offsets = [0, 0], sizes = [8, 64], strides = [1, 1]} : vector<8x96xf32> to vector<8x64xf32>
    %367 = arith.negf %366 : vector<8x64xf32>
    %368 = math.exp %367 : vector<8x64xf32>
    %cst_145 = arith.constant 1.000000e+00 : f32
    %369 = vector.broadcast %cst_145 : f32 to vector<8x64xf32>
    %370 = arith.addf %369, %368 : vector<8x64xf32>
    %371 = arith.divf %369, %370 : vector<8x64xf32>
    %372 = vector.extract_strided_slice %371 {offsets = [0, 0], sizes = [8, 32], strides = [1, 1]} : vector<8x64xf32> to vector<8x32xf32>
    %373 = vector.extract_strided_slice %371 {offsets = [0, 32], sizes = [8, 32], strides = [1, 1]} : vector<8x64xf32> to vector<8x32xf32>
    %374 = vector.extract_strided_slice %361 {offsets = [0, 64], sizes = [8, 32], strides = [1, 1]} : vector<8x96xf32> to vector<8x32xf32>
    %375 = vector.extract_strided_slice %364 {offsets = [0, 64], sizes = [8, 32], strides = [1, 1]} : vector<8x96xf32> to vector<8x32xf32>
    %376 = arith.mulf %372, %375 : vector<8x32xf32>
    %377 = arith.addf %374, %376 : vector<8x32xf32>
    %378 = math.tanh %377 : vector<8x32xf32>
    %cst_146 = arith.constant 1.000000e+00 : f32
    %379 = vector.broadcast %cst_146 : f32 to vector<8x32xf32>
    %380 = arith.subf %379, %373 : vector<8x32xf32>
    %381 = arith.mulf %380, %378 : vector<8x32xf32>
    %382 = arith.mulf %373, %295 : vector<8x32xf32>
    %383 = arith.addf %381, %382 : vector<8x32xf32>
    %cst_147 = arith.constant -5.000000e+00 : f32
    %cst_148 = arith.constant 5.000000e+00 : f32
    %384 = vector.broadcast %cst_147 : f32 to vector<8x32xf32>
    %385 = arith.maximumf %384, %383 : vector<8x32xf32>
    %386 = vector.broadcast %cst_148 : f32 to vector<8x32xf32>
    %387 = arith.minimumf %386, %385 : vector<8x32xf32>
    %388 = arith.truncf %387 : vector<8x32xf32> to vector<8x32xbf16>
    %cst_149 = arith.constant dense<0.000000e+00> : vector<8x8xf32>
    %389 = tpu.matmul %388, %23, %cst_149 {dimension_numbers = #tpu.dot_dimension_numbers<[1], [0], [0], [1], [0, 0, 1, 1], [], []>} : vector<8x32xbf16>, vector<32x8xbf16>, vector<8x8xf32> -> vector<8x8xf32>
    %c3 = arith.constant 3 : index
    %c0_150 = arith.constant 0 : index
    %c0_151 = arith.constant 0 : index
    %390 = vector.load %arg4[%c3, %c0_150, %c0_151] : memref<9x8x128xf32, #tpu.memory_space<vmem>>, vector<1x8x32xf32>
    %391 = vector.shape_cast %390 : vector<1x8x32xf32> to vector<8x32xf32>
    %392 = vector.shape_cast %387 : vector<8x32xf32> to vector<1x8x32xf32>
    tpu.vector_store %arg4[%c3, %c0_150, %c0_151], %392 {strides = array<i32>} : memref<9x8x128xf32, #tpu.memory_space<vmem>>, vector<1x8x32xf32>,
    %c3_152 = arith.constant 3 : index
    %c0_153 = arith.constant 0 : index
    %c32_154 = arith.constant 32 : index
    %393 = vector.load %arg4[%c3_152, %c0_153, %c32_154] : memref<9x8x128xf32, #tpu.memory_space<vmem>>, vector<1x8x16xf32>
    %394 = vector.shape_cast %393 : vector<1x8x16xf32> to vector<8x16xf32>
    %395 = vector.shape_cast %345 : vector<8x16xf32> to vector<1x8x16xf32>
    tpu.vector_store %arg4[%c3_152, %c0_153, %c32_154], %395 {strides = array<i32>} : memref<9x8x128xf32, #tpu.memory_space<vmem>>, vector<1x8x16xf32>,
    %c3_155 = arith.constant 3 : index
    %c0_156 = arith.constant 0 : index
    %c48_157 = arith.constant 48 : index
    %396 = vector.load %arg4[%c3_155, %c0_156, %c48_157] : memref<9x8x128xf32, #tpu.memory_space<vmem>>, vector<1x8x4xf32>
    %397 = vector.shape_cast %396 : vector<1x8x4xf32> to vector<8x4xf32>
    %398 = vector.shape_cast %349 : vector<8x4xf32> to vector<1x8x4xf32>
    tpu.vector_store %arg4[%c3_155, %c0_156, %c48_157], %398 {strides = array<i32>} : memref<9x8x128xf32, #tpu.memory_space<vmem>>, vector<1x8x4xf32>,
    %c3_158 = arith.constant 3 : index
    %c0_159 = arith.constant 0 : index
    %c56_160 = arith.constant 56 : index
    %399 = vector.load %arg4[%c3_158, %c0_159, %c56_160] : memref<9x8x128xf32, #tpu.memory_space<vmem>>, vector<1x8x4xf32>
    %400 = vector.shape_cast %399 : vector<1x8x4xf32> to vector<8x4xf32>
    %401 = vector.shape_cast %353 : vector<8x4xf32> to vector<1x8x4xf32>
    tpu.vector_store %arg4[%c3_158, %c0_159, %c56_160], %401 {strides = array<i32>} : memref<9x8x128xf32, #tpu.memory_space<vmem>>, vector<1x8x4xf32>,
    %c3_161 = arith.constant 3 : index
    %c0_162 = arith.constant 0 : index
    %c64_163 = arith.constant 64 : index
    %402 = vector.load %arg4[%c3_161, %c0_162, %c64_163] : memref<9x8x128xf32, #tpu.memory_space<vmem>>, vector<1x8x4xf32>
    %403 = vector.shape_cast %402 : vector<1x8x4xf32> to vector<8x4xf32>
    %404 = vector.shape_cast %357 : vector<8x4xf32> to vector<1x8x4xf32>
    tpu.vector_store %arg4[%c3_161, %c0_162, %c64_163], %404 {strides = array<i32>} : memref<9x8x128xf32, #tpu.memory_space<vmem>>, vector<1x8x4xf32>,
    %c3_164 = arith.constant 3 : index
    %c0_165 = arith.constant 0 : index
    %c72_166 = arith.constant 72 : index
    %405 = vector.load %arg4[%c3_164, %c0_165, %c72_166] : memref<9x8x128xf32, #tpu.memory_space<vmem>>, vector<1x8x8xf32>
    %406 = vector.shape_cast %405 : vector<1x8x8xf32> to vector<8x8xf32>
    %407 = vector.shape_cast %389 : vector<8x8xf32> to vector<1x8x8xf32>
    tpu.vector_store %arg4[%c3_164, %c0_165, %c72_166], %407 {strides = array<i32>} : memref<9x8x128xf32, #tpu.memory_space<vmem>>, vector<1x8x8xf32>,
    %408 = vector.extract_strided_slice %28 {offsets = [32, 0], sizes = [8, 48], strides = [1, 1]} : vector<64x48xf32> to vector<8x48xf32>
    %409 = arith.truncf %389 : vector<8x8xf32> to vector<8x8xbf16>
    %cst_167 = arith.constant dense<0.000000e+00> : vector<8x48xf32>
    %410 = tpu.matmul %409, %13, %cst_167 {dimension_numbers = #tpu.dot_dimension_numbers<[1], [0], [0], [1], [0, 0, 1, 1], [], []>} : vector<8x8xbf16>, vector<8x48xbf16>, vector<8x48xf32> -> vector<8x48xf32>
    %411 = arith.addf %408, %410 : vector<8x48xf32>
    %412 = arith.truncf %345 : vector<8x16xf32> to vector<8x16xbf16>
    %cst_168 = arith.constant dense<0.000000e+00> : vector<8x48xf32>
    %413 = tpu.matmul %412, %15, %cst_168 {dimension_numbers = #tpu.dot_dimension_numbers<[1], [0], [0], [1], [0, 0, 1, 1], [], []>} : vector<8x16xbf16>, vector<16x48xbf16>, vector<8x48xf32> -> vector<8x48xf32>
    %414 = arith.addf %413, %7 : vector<8x48xf32>
    %415 = arith.addf %411, %414 : vector<8x48xf32>
    %416 = vector.extract_strided_slice %415 {offsets = [0, 0], sizes = [8, 32], strides = [1, 1]} : vector<8x48xf32> to vector<8x32xf32>
    %417 = arith.negf %416 : vector<8x32xf32>
    %418 = math.exp %417 : vector<8x32xf32>
    %cst_169 = arith.constant 1.000000e+00 : f32
    %419 = vector.broadcast %cst_169 : f32 to vector<8x32xf32>
    %420 = arith.addf %419, %418 : vector<8x32xf32>
    %421 = arith.divf %419, %420 : vector<8x32xf32>
    %422 = vector.extract_strided_slice %421 {offsets = [0, 0], sizes = [8, 16], strides = [1, 1]} : vector<8x32xf32> to vector<8x16xf32>
    %423 = vector.extract_strided_slice %421 {offsets = [0, 16], sizes = [8, 16], strides = [1, 1]} : vector<8x32xf32> to vector<8x16xf32>
    %424 = vector.extract_strided_slice %411 {offsets = [0, 32], sizes = [8, 16], strides = [1, 1]} : vector<8x48xf32> to vector<8x16xf32>
    %425 = vector.extract_strided_slice %414 {offsets = [0, 32], sizes = [8, 16], strides = [1, 1]} : vector<8x48xf32> to vector<8x16xf32>
    %426 = arith.mulf %422, %425 : vector<8x16xf32>
    %427 = arith.addf %424, %426 : vector<8x16xf32>
    %428 = math.tanh %427 : vector<8x16xf32>
    %cst_170 = arith.constant 1.000000e+00 : f32
    %429 = vector.broadcast %cst_170 : f32 to vector<8x16xf32>
    %430 = arith.subf %429, %423 : vector<8x16xf32>
    %431 = arith.mulf %430, %428 : vector<8x16xf32>
    %432 = arith.mulf %423, %345 : vector<8x16xf32>
    %433 = arith.addf %431, %432 : vector<8x16xf32>
    %cst_171 = arith.constant -5.000000e+00 : f32
    %cst_172 = arith.constant 5.000000e+00 : f32
    %434 = vector.broadcast %cst_171 : f32 to vector<8x16xf32>
    %435 = arith.maximumf %434, %433 : vector<8x16xf32>
    %436 = vector.broadcast %cst_172 : f32 to vector<8x16xf32>
    %437 = arith.minimumf %436, %435 : vector<8x16xf32>
    %438 = arith.truncf %437 : vector<8x16xf32> to vector<8x16xbf16>
    %cst_173 = arith.constant dense<0.000000e+00> : vector<8x8xf32>
    %439 = tpu.matmul %438, %17, %cst_173 {dimension_numbers = #tpu.dot_dimension_numbers<[1], [0], [0], [1], [0, 0, 1, 1], [], []>} : vector<8x16xbf16>, vector<16x8xbf16>, vector<8x8xf32> -> vector<8x8xf32>
    %440 = arith.addf %439, %9 : vector<8x8xf32>
    %441 = vector.extract_strided_slice %440 {offsets = [0, 0], sizes = [8, 4], strides = [1, 1]} : vector<8x8xf32> to vector<8x4xf32>
    %442 = vector.extract_strided_slice %440 {offsets = [0, 4], sizes = [8, 4], strides = [1, 1]} : vector<8x8xf32> to vector<8x4xf32>
    %cst_174 = arith.constant 5.000000e-01 : f32
    %443 = vector.broadcast %cst_174 : f32 to vector<8x4xf32>
    %444 = arith.mulf %443, %442 : vector<8x4xf32>
    %445 = math.exp %444 : vector<8x4xf32>
    %c0_175 = arith.constant 0 : index
    %c32_176 = arith.constant 32 : index
    %c24_177 = arith.constant 24 : index
    %446 = vector.load %arg1[%c0_175, %c32_176, %c24_177] : memref<1x64x32xf32, #tpu.memory_space<vmem>>, vector<1x8x4xf32>
    %447 = vector.shape_cast %446 : vector<1x8x4xf32> to vector<8x4xf32>
    %448 = arith.mulf %445, %447 : vector<8x4xf32>
    %449 = arith.addf %441, %448 : vector<8x4xf32>
    %450 = vector.extract_strided_slice %31 {offsets = [32, 0], sizes = [8, 96], strides = [1, 1]} : vector<64x96xf32> to vector<8x96xf32>
    %451 = arith.truncf %449 : vector<8x4xf32> to vector<8x4xbf16>
    %cst_178 = arith.constant dense<0.000000e+00> : vector<8x96xf32>
    %452 = tpu.matmul %451, %19, %cst_178 {dimension_numbers = #tpu.dot_dimension_numbers<[1], [0], [0], [1], [0, 0, 1, 1], [], []>} : vector<8x4xbf16>, vector<4x96xbf16>, vector<8x96xf32> -> vector<8x96xf32>
    %453 = arith.addf %450, %452 : vector<8x96xf32>
    %454 = arith.truncf %387 : vector<8x32xf32> to vector<8x32xbf16>
    %cst_179 = arith.constant dense<0.000000e+00> : vector<8x96xf32>
    %455 = tpu.matmul %454, %21, %cst_179 {dimension_numbers = #tpu.dot_dimension_numbers<[1], [0], [0], [1], [0, 0, 1, 1], [], []>} : vector<8x32xbf16>, vector<32x96xbf16>, vector<8x96xf32> -> vector<8x96xf32>
    %456 = arith.addf %455, %8 : vector<8x96xf32>
    %457 = arith.addf %453, %456 : vector<8x96xf32>
    %458 = vector.extract_strided_slice %457 {offsets = [0, 0], sizes = [8, 64], strides = [1, 1]} : vector<8x96xf32> to vector<8x64xf32>
    %459 = arith.negf %458 : vector<8x64xf32>
    %460 = math.exp %459 : vector<8x64xf32>
    %cst_180 = arith.constant 1.000000e+00 : f32
    %461 = vector.broadcast %cst_180 : f32 to vector<8x64xf32>
    %462 = arith.addf %461, %460 : vector<8x64xf32>
    %463 = arith.divf %461, %462 : vector<8x64xf32>
    %464 = vector.extract_strided_slice %463 {offsets = [0, 0], sizes = [8, 32], strides = [1, 1]} : vector<8x64xf32> to vector<8x32xf32>
    %465 = vector.extract_strided_slice %463 {offsets = [0, 32], sizes = [8, 32], strides = [1, 1]} : vector<8x64xf32> to vector<8x32xf32>
    %466 = vector.extract_strided_slice %453 {offsets = [0, 64], sizes = [8, 32], strides = [1, 1]} : vector<8x96xf32> to vector<8x32xf32>
    %467 = vector.extract_strided_slice %456 {offsets = [0, 64], sizes = [8, 32], strides = [1, 1]} : vector<8x96xf32> to vector<8x32xf32>
    %468 = arith.mulf %464, %467 : vector<8x32xf32>
    %469 = arith.addf %466, %468 : vector<8x32xf32>
    %470 = math.tanh %469 : vector<8x32xf32>
    %cst_181 = arith.constant 1.000000e+00 : f32
    %471 = vector.broadcast %cst_181 : f32 to vector<8x32xf32>
    %472 = arith.subf %471, %465 : vector<8x32xf32>
    %473 = arith.mulf %472, %470 : vector<8x32xf32>
    %474 = arith.mulf %465, %387 : vector<8x32xf32>
    %475 = arith.addf %473, %474 : vector<8x32xf32>
    %cst_182 = arith.constant -5.000000e+00 : f32
    %cst_183 = arith.constant 5.000000e+00 : f32
    %476 = vector.broadcast %cst_182 : f32 to vector<8x32xf32>
    %477 = arith.maximumf %476, %475 : vector<8x32xf32>
    %478 = vector.broadcast %cst_183 : f32 to vector<8x32xf32>
    %479 = arith.minimumf %478, %477 : vector<8x32xf32>
    %480 = arith.truncf %479 : vector<8x32xf32> to vector<8x32xbf16>
    %cst_184 = arith.constant dense<0.000000e+00> : vector<8x8xf32>
    %481 = tpu.matmul %480, %23, %cst_184 {dimension_numbers = #tpu.dot_dimension_numbers<[1], [0], [0], [1], [0, 0, 1, 1], [], []>} : vector<8x32xbf16>, vector<32x8xbf16>, vector<8x8xf32> -> vector<8x8xf32>
    %c4 = arith.constant 4 : index
    %c0_185 = arith.constant 0 : index
    %c0_186 = arith.constant 0 : index
    %482 = vector.load %arg4[%c4, %c0_185, %c0_186] : memref<9x8x128xf32, #tpu.memory_space<vmem>>, vector<1x8x32xf32>
    %483 = vector.shape_cast %482 : vector<1x8x32xf32> to vector<8x32xf32>
    %484 = vector.shape_cast %479 : vector<8x32xf32> to vector<1x8x32xf32>
    tpu.vector_store %arg4[%c4, %c0_185, %c0_186], %484 {strides = array<i32>} : memref<9x8x128xf32, #tpu.memory_space<vmem>>, vector<1x8x32xf32>,
    %c4_187 = arith.constant 4 : index
    %c0_188 = arith.constant 0 : index
    %c32_189 = arith.constant 32 : index
    %485 = vector.load %arg4[%c4_187, %c0_188, %c32_189] : memref<9x8x128xf32, #tpu.memory_space<vmem>>, vector<1x8x16xf32>
    %486 = vector.shape_cast %485 : vector<1x8x16xf32> to vector<8x16xf32>
    %487 = vector.shape_cast %437 : vector<8x16xf32> to vector<1x8x16xf32>
    tpu.vector_store %arg4[%c4_187, %c0_188, %c32_189], %487 {strides = array<i32>} : memref<9x8x128xf32, #tpu.memory_space<vmem>>, vector<1x8x16xf32>,
    %c4_190 = arith.constant 4 : index
    %c0_191 = arith.constant 0 : index
    %c48_192 = arith.constant 48 : index
    %488 = vector.load %arg4[%c4_190, %c0_191, %c48_192] : memref<9x8x128xf32, #tpu.memory_space<vmem>>, vector<1x8x4xf32>
    %489 = vector.shape_cast %488 : vector<1x8x4xf32> to vector<8x4xf32>
    %490 = vector.shape_cast %441 : vector<8x4xf32> to vector<1x8x4xf32>
    tpu.vector_store %arg4[%c4_190, %c0_191, %c48_192], %490 {strides = array<i32>} : memref<9x8x128xf32, #tpu.memory_space<vmem>>, vector<1x8x4xf32>,
    %c4_193 = arith.constant 4 : index
    %c0_194 = arith.constant 0 : index
    %c56_195 = arith.constant 56 : index
    %491 = vector.load %arg4[%c4_193, %c0_194, %c56_195] : memref<9x8x128xf32, #tpu.memory_space<vmem>>, vector<1x8x4xf32>
    %492 = vector.shape_cast %491 : vector<1x8x4xf32> to vector<8x4xf32>
    %493 = vector.shape_cast %445 : vector<8x4xf32> to vector<1x8x4xf32>
    tpu.vector_store %arg4[%c4_193, %c0_194, %c56_195], %493 {strides = array<i32>} : memref<9x8x128xf32, #tpu.memory_space<vmem>>, vector<1x8x4xf32>,
    %c4_196 = arith.constant 4 : index
    %c0_197 = arith.constant 0 : index
    %c64_198 = arith.constant 64 : index
    %494 = vector.load %arg4[%c4_196, %c0_197, %c64_198] : memref<9x8x128xf32, #tpu.memory_space<vmem>>, vector<1x8x4xf32>
    %495 = vector.shape_cast %494 : vector<1x8x4xf32> to vector<8x4xf32>
    %496 = vector.shape_cast %449 : vector<8x4xf32> to vector<1x8x4xf32>
    tpu.vector_store %arg4[%c4_196, %c0_197, %c64_198], %496 {strides = array<i32>} : memref<9x8x128xf32, #tpu.memory_space<vmem>>, vector<1x8x4xf32>,
    %c4_199 = arith.constant 4 : index
    %c0_200 = arith.constant 0 : index
    %c72_201 = arith.constant 72 : index
    %497 = vector.load %arg4[%c4_199, %c0_200, %c72_201] : memref<9x8x128xf32, #tpu.memory_space<vmem>>, vector<1x8x8xf32>
    %498 = vector.shape_cast %497 : vector<1x8x8xf32> to vector<8x8xf32>
    %499 = vector.shape_cast %481 : vector<8x8xf32> to vector<1x8x8xf32>
    tpu.vector_store %arg4[%c4_199, %c0_200, %c72_201], %499 {strides = array<i32>} : memref<9x8x128xf32, #tpu.memory_space<vmem>>, vector<1x8x8xf32>,
    %500 = vector.extract_strided_slice %28 {offsets = [40, 0], sizes = [8, 48], strides = [1, 1]} : vector<64x48xf32> to vector<8x48xf32>
    %501 = arith.truncf %481 : vector<8x8xf32> to vector<8x8xbf16>
    %cst_202 = arith.constant dense<0.000000e+00> : vector<8x48xf32>
    %502 = tpu.matmul %501, %13, %cst_202 {dimension_numbers = #tpu.dot_dimension_numbers<[1], [0], [0], [1], [0, 0, 1, 1], [], []>} : vector<8x8xbf16>, vector<8x48xbf16>, vector<8x48xf32> -> vector<8x48xf32>
    %503 = arith.addf %500, %502 : vector<8x48xf32>
    %504 = arith.truncf %437 : vector<8x16xf32> to vector<8x16xbf16>
    %cst_203 = arith.constant dense<0.000000e+00> : vector<8x48xf32>
    %505 = tpu.matmul %504, %15, %cst_203 {dimension_numbers = #tpu.dot_dimension_numbers<[1], [0], [0], [1], [0, 0, 1, 1], [], []>} : vector<8x16xbf16>, vector<16x48xbf16>, vector<8x48xf32> -> vector<8x48xf32>
    %506 = arith.addf %505, %7 : vector<8x48xf32>
    %507 = arith.addf %503, %506 : vector<8x48xf32>
    %508 = vector.extract_strided_slice %507 {offsets = [0, 0], sizes = [8, 32], strides = [1, 1]} : vector<8x48xf32> to vector<8x32xf32>
    %509 = arith.negf %508 : vector<8x32xf32>
    %510 = math.exp %509 : vector<8x32xf32>
    %cst_204 = arith.constant 1.000000e+00 : f32
    %511 = vector.broadcast %cst_204 : f32 to vector<8x32xf32>
    %512 = arith.addf %511, %510 : vector<8x32xf32>
    %513 = arith.divf %511, %512 : vector<8x32xf32>
    %514 = vector.extract_strided_slice %513 {offsets = [0, 0], sizes = [8, 16], strides = [1, 1]} : vector<8x32xf32> to vector<8x16xf32>
    %515 = vector.extract_strided_slice %513 {offsets = [0, 16], sizes = [8, 16], strides = [1, 1]} : vector<8x32xf32> to vector<8x16xf32>
    %516 = vector.extract_strided_slice %503 {offsets = [0, 32], sizes = [8, 16], strides = [1, 1]} : vector<8x48xf32> to vector<8x16xf32>
    %517 = vector.extract_strided_slice %506 {offsets = [0, 32], sizes = [8, 16], strides = [1, 1]} : vector<8x48xf32> to vector<8x16xf32>
    %518 = arith.mulf %514, %517 : vector<8x16xf32>
    %519 = arith.addf %516, %518 : vector<8x16xf32>
    %520 = math.tanh %519 : vector<8x16xf32>
    %cst_205 = arith.constant 1.000000e+00 : f32
    %521 = vector.broadcast %cst_205 : f32 to vector<8x16xf32>
    %522 = arith.subf %521, %515 : vector<8x16xf32>
    %523 = arith.mulf %522, %520 : vector<8x16xf32>
    %524 = arith.mulf %515, %437 : vector<8x16xf32>
    %525 = arith.addf %523, %524 : vector<8x16xf32>
    %cst_206 = arith.constant -5.000000e+00 : f32
    %cst_207 = arith.constant 5.000000e+00 : f32
    %526 = vector.broadcast %cst_206 : f32 to vector<8x16xf32>
    %527 = arith.maximumf %526, %525 : vector<8x16xf32>
    %528 = vector.broadcast %cst_207 : f32 to vector<8x16xf32>
    %529 = arith.minimumf %528, %527 : vector<8x16xf32>
    %530 = arith.truncf %529 : vector<8x16xf32> to vector<8x16xbf16>
    %cst_208 = arith.constant dense<0.000000e+00> : vector<8x8xf32>
    %531 = tpu.matmul %530, %17, %cst_208 {dimension_numbers = #tpu.dot_dimension_numbers<[1], [0], [0], [1], [0, 0, 1, 1], [], []>} : vector<8x16xbf16>, vector<16x8xbf16>, vector<8x8xf32> -> vector<8x8xf32>
    %532 = arith.addf %531, %9 : vector<8x8xf32>
    %533 = vector.extract_strided_slice %532 {offsets = [0, 0], sizes = [8, 4], strides = [1, 1]} : vector<8x8xf32> to vector<8x4xf32>
    %534 = vector.extract_strided_slice %532 {offsets = [0, 4], sizes = [8, 4], strides = [1, 1]} : vector<8x8xf32> to vector<8x4xf32>
    %cst_209 = arith.constant 5.000000e-01 : f32
    %535 = vector.broadcast %cst_209 : f32 to vector<8x4xf32>
    %536 = arith.mulf %535, %534 : vector<8x4xf32>
    %537 = math.exp %536 : vector<8x4xf32>
    %c0_210 = arith.constant 0 : index
    %c40 = arith.constant 40 : index
    %c24_211 = arith.constant 24 : index
    %538 = vector.load %arg1[%c0_210, %c40, %c24_211] : memref<1x64x32xf32, #tpu.memory_space<vmem>>, vector<1x8x4xf32>
    %539 = vector.shape_cast %538 : vector<1x8x4xf32> to vector<8x4xf32>
    %540 = arith.mulf %537, %539 : vector<8x4xf32>
    %541 = arith.addf %533, %540 : vector<8x4xf32>
    %542 = vector.extract_strided_slice %31 {offsets = [40, 0], sizes = [8, 96], strides = [1, 1]} : vector<64x96xf32> to vector<8x96xf32>
    %543 = arith.truncf %541 : vector<8x4xf32> to vector<8x4xbf16>
    %cst_212 = arith.constant dense<0.000000e+00> : vector<8x96xf32>
    %544 = tpu.matmul %543, %19, %cst_212 {dimension_numbers = #tpu.dot_dimension_numbers<[1], [0], [0], [1], [0, 0, 1, 1], [], []>} : vector<8x4xbf16>, vector<4x96xbf16>, vector<8x96xf32> -> vector<8x96xf32>
    %545 = arith.addf %542, %544 : vector<8x96xf32>
    %546 = arith.truncf %479 : vector<8x32xf32> to vector<8x32xbf16>
    %cst_213 = arith.constant dense<0.000000e+00> : vector<8x96xf32>
    %547 = tpu.matmul %546, %21, %cst_213 {dimension_numbers = #tpu.dot_dimension_numbers<[1], [0], [0], [1], [0, 0, 1, 1], [], []>} : vector<8x32xbf16>, vector<32x96xbf16>, vector<8x96xf32> -> vector<8x96xf32>
    %548 = arith.addf %547, %8 : vector<8x96xf32>
    %549 = arith.addf %545, %548 : vector<8x96xf32>
    %550 = vector.extract_strided_slice %549 {offsets = [0, 0], sizes = [8, 64], strides = [1, 1]} : vector<8x96xf32> to vector<8x64xf32>
    %551 = arith.negf %550 : vector<8x64xf32>
    %552 = math.exp %551 : vector<8x64xf32>
    %cst_214 = arith.constant 1.000000e+00 : f32
    %553 = vector.broadcast %cst_214 : f32 to vector<8x64xf32>
    %554 = arith.addf %553, %552 : vector<8x64xf32>
    %555 = arith.divf %553, %554 : vector<8x64xf32>
    %556 = vector.extract_strided_slice %555 {offsets = [0, 0], sizes = [8, 32], strides = [1, 1]} : vector<8x64xf32> to vector<8x32xf32>
    %557 = vector.extract_strided_slice %555 {offsets = [0, 32], sizes = [8, 32], strides = [1, 1]} : vector<8x64xf32> to vector<8x32xf32>
    %558 = vector.extract_strided_slice %545 {offsets = [0, 64], sizes = [8, 32], strides = [1, 1]} : vector<8x96xf32> to vector<8x32xf32>
    %559 = vector.extract_strided_slice %548 {offsets = [0, 64], sizes = [8, 32], strides = [1, 1]} : vector<8x96xf32> to vector<8x32xf32>
    %560 = arith.mulf %556, %559 : vector<8x32xf32>
    %561 = arith.addf %558, %560 : vector<8x32xf32>
    %562 = math.tanh %561 : vector<8x32xf32>
    %cst_215 = arith.constant 1.000000e+00 : f32
    %563 = vector.broadcast %cst_215 : f32 to vector<8x32xf32>
    %564 = arith.subf %563, %557 : vector<8x32xf32>
    %565 = arith.mulf %564, %562 : vector<8x32xf32>
    %566 = arith.mulf %557, %479 : vector<8x32xf32>
    %567 = arith.addf %565, %566 : vector<8x32xf32>
    %cst_216 = arith.constant -5.000000e+00 : f32
    %cst_217 = arith.constant 5.000000e+00 : f32
    %568 = vector.broadcast %cst_216 : f32 to vector<8x32xf32>
    %569 = arith.maximumf %568, %567 : vector<8x32xf32>
    %570 = vector.broadcast %cst_217 : f32 to vector<8x32xf32>
    %571 = arith.minimumf %570, %569 : vector<8x32xf32>
    %572 = arith.truncf %571 : vector<8x32xf32> to vector<8x32xbf16>
    %cst_218 = arith.constant dense<0.000000e+00> : vector<8x8xf32>
    %573 = tpu.matmul %572, %23, %cst_218 {dimension_numbers = #tpu.dot_dimension_numbers<[1], [0], [0], [1], [0, 0, 1, 1], [], []>} : vector<8x32xbf16>, vector<32x8xbf16>, vector<8x8xf32> -> vector<8x8xf32>
    %c5 = arith.constant 5 : index
    %c0_219 = arith.constant 0 : index
    %c0_220 = arith.constant 0 : index
    %574 = vector.load %arg4[%c5, %c0_219, %c0_220] : memref<9x8x128xf32, #tpu.memory_space<vmem>>, vector<1x8x32xf32>
    %575 = vector.shape_cast %574 : vector<1x8x32xf32> to vector<8x32xf32>
    %576 = vector.shape_cast %571 : vector<8x32xf32> to vector<1x8x32xf32>
    tpu.vector_store %arg4[%c5, %c0_219, %c0_220], %576 {strides = array<i32>} : memref<9x8x128xf32, #tpu.memory_space<vmem>>, vector<1x8x32xf32>,
    %c5_221 = arith.constant 5 : index
    %c0_222 = arith.constant 0 : index
    %c32_223 = arith.constant 32 : index
    %577 = vector.load %arg4[%c5_221, %c0_222, %c32_223] : memref<9x8x128xf32, #tpu.memory_space<vmem>>, vector<1x8x16xf32>
    %578 = vector.shape_cast %577 : vector<1x8x16xf32> to vector<8x16xf32>
    %579 = vector.shape_cast %529 : vector<8x16xf32> to vector<1x8x16xf32>
    tpu.vector_store %arg4[%c5_221, %c0_222, %c32_223], %579 {strides = array<i32>} : memref<9x8x128xf32, #tpu.memory_space<vmem>>, vector<1x8x16xf32>,
    %c5_224 = arith.constant 5 : index
    %c0_225 = arith.constant 0 : index
    %c48_226 = arith.constant 48 : index
    %580 = vector.load %arg4[%c5_224, %c0_225, %c48_226] : memref<9x8x128xf32, #tpu.memory_space<vmem>>, vector<1x8x4xf32>
    %581 = vector.shape_cast %580 : vector<1x8x4xf32> to vector<8x4xf32>
    %582 = vector.shape_cast %533 : vector<8x4xf32> to vector<1x8x4xf32>
    tpu.vector_store %arg4[%c5_224, %c0_225, %c48_226], %582 {strides = array<i32>} : memref<9x8x128xf32, #tpu.memory_space<vmem>>, vector<1x8x4xf32>,
    %c5_227 = arith.constant 5 : index
    %c0_228 = arith.constant 0 : index
    %c56_229 = arith.constant 56 : index
    %583 = vector.load %arg4[%c5_227, %c0_228, %c56_229] : memref<9x8x128xf32, #tpu.memory_space<vmem>>, vector<1x8x4xf32>
    %584 = vector.shape_cast %583 : vector<1x8x4xf32> to vector<8x4xf32>
    %585 = vector.shape_cast %537 : vector<8x4xf32> to vector<1x8x4xf32>
    tpu.vector_store %arg4[%c5_227, %c0_228, %c56_229], %585 {strides = array<i32>} : memref<9x8x128xf32, #tpu.memory_space<vmem>>, vector<1x8x4xf32>,
    %c5_230 = arith.constant 5 : index
    %c0_231 = arith.constant 0 : index
    %c64_232 = arith.constant 64 : index
    %586 = vector.load %arg4[%c5_230, %c0_231, %c64_232] : memref<9x8x128xf32, #tpu.memory_space<vmem>>, vector<1x8x4xf32>
    %587 = vector.shape_cast %586 : vector<1x8x4xf32> to vector<8x4xf32>
    %588 = vector.shape_cast %541 : vector<8x4xf32> to vector<1x8x4xf32>
    tpu.vector_store %arg4[%c5_230, %c0_231, %c64_232], %588 {strides = array<i32>} : memref<9x8x128xf32, #tpu.memory_space<vmem>>, vector<1x8x4xf32>,
    %c5_233 = arith.constant 5 : index
    %c0_234 = arith.constant 0 : index
    %c72_235 = arith.constant 72 : index
    %589 = vector.load %arg4[%c5_233, %c0_234, %c72_235] : memref<9x8x128xf32, #tpu.memory_space<vmem>>, vector<1x8x8xf32>
    %590 = vector.shape_cast %589 : vector<1x8x8xf32> to vector<8x8xf32>
    %591 = vector.shape_cast %573 : vector<8x8xf32> to vector<1x8x8xf32>
    tpu.vector_store %arg4[%c5_233, %c0_234, %c72_235], %591 {strides = array<i32>} : memref<9x8x128xf32, #tpu.memory_space<vmem>>, vector<1x8x8xf32>,
    %592 = vector.extract_strided_slice %28 {offsets = [48, 0], sizes = [8, 48], strides = [1, 1]} : vector<64x48xf32> to vector<8x48xf32>
    %593 = arith.truncf %573 : vector<8x8xf32> to vector<8x8xbf16>
    %cst_236 = arith.constant dense<0.000000e+00> : vector<8x48xf32>
    %594 = tpu.matmul %593, %13, %cst_236 {dimension_numbers = #tpu.dot_dimension_numbers<[1], [0], [0], [1], [0, 0, 1, 1], [], []>} : vector<8x8xbf16>, vector<8x48xbf16>, vector<8x48xf32> -> vector<8x48xf32>
    %595 = arith.addf %592, %594 : vector<8x48xf32>
    %596 = arith.truncf %529 : vector<8x16xf32> to vector<8x16xbf16>
    %cst_237 = arith.constant dense<0.000000e+00> : vector<8x48xf32>
    %597 = tpu.matmul %596, %15, %cst_237 {dimension_numbers = #tpu.dot_dimension_numbers<[1], [0], [0], [1], [0, 0, 1, 1], [], []>} : vector<8x16xbf16>, vector<16x48xbf16>, vector<8x48xf32> -> vector<8x48xf32>
    %598 = arith.addf %597, %7 : vector<8x48xf32>
    %599 = arith.addf %595, %598 : vector<8x48xf32>
    %600 = vector.extract_strided_slice %599 {offsets = [0, 0], sizes = [8, 32], strides = [1, 1]} : vector<8x48xf32> to vector<8x32xf32>
    %601 = arith.negf %600 : vector<8x32xf32>
    %602 = math.exp %601 : vector<8x32xf32>
    %cst_238 = arith.constant 1.000000e+00 : f32
    %603 = vector.broadcast %cst_238 : f32 to vector<8x32xf32>
    %604 = arith.addf %603, %602 : vector<8x32xf32>
    %605 = arith.divf %603, %604 : vector<8x32xf32>
    %606 = vector.extract_strided_slice %605 {offsets = [0, 0], sizes = [8, 16], strides = [1, 1]} : vector<8x32xf32> to vector<8x16xf32>
    %607 = vector.extract_strided_slice %605 {offsets = [0, 16], sizes = [8, 16], strides = [1, 1]} : vector<8x32xf32> to vector<8x16xf32>
    %608 = vector.extract_strided_slice %595 {offsets = [0, 32], sizes = [8, 16], strides = [1, 1]} : vector<8x48xf32> to vector<8x16xf32>
    %609 = vector.extract_strided_slice %598 {offsets = [0, 32], sizes = [8, 16], strides = [1, 1]} : vector<8x48xf32> to vector<8x16xf32>
    %610 = arith.mulf %606, %609 : vector<8x16xf32>
    %611 = arith.addf %608, %610 : vector<8x16xf32>
    %612 = math.tanh %611 : vector<8x16xf32>
    %cst_239 = arith.constant 1.000000e+00 : f32
    %613 = vector.broadcast %cst_239 : f32 to vector<8x16xf32>
    %614 = arith.subf %613, %607 : vector<8x16xf32>
    %615 = arith.mulf %614, %612 : vector<8x16xf32>
    %616 = arith.mulf %607, %529 : vector<8x16xf32>
    %617 = arith.addf %615, %616 : vector<8x16xf32>
    %cst_240 = arith.constant -5.000000e+00 : f32
    %cst_241 = arith.constant 5.000000e+00 : f32
    %618 = vector.broadcast %cst_240 : f32 to vector<8x16xf32>
    %619 = arith.maximumf %618, %617 : vector<8x16xf32>
    %620 = vector.broadcast %cst_241 : f32 to vector<8x16xf32>
    %621 = arith.minimumf %620, %619 : vector<8x16xf32>
    %622 = arith.truncf %621 : vector<8x16xf32> to vector<8x16xbf16>
    %cst_242 = arith.constant dense<0.000000e+00> : vector<8x8xf32>
    %623 = tpu.matmul %622, %17, %cst_242 {dimension_numbers = #tpu.dot_dimension_numbers<[1], [0], [0], [1], [0, 0, 1, 1], [], []>} : vector<8x16xbf16>, vector<16x8xbf16>, vector<8x8xf32> -> vector<8x8xf32>
    %624 = arith.addf %623, %9 : vector<8x8xf32>
    %625 = vector.extract_strided_slice %624 {offsets = [0, 0], sizes = [8, 4], strides = [1, 1]} : vector<8x8xf32> to vector<8x4xf32>
    %626 = vector.extract_strided_slice %624 {offsets = [0, 4], sizes = [8, 4], strides = [1, 1]} : vector<8x8xf32> to vector<8x4xf32>
    %cst_243 = arith.constant 5.000000e-01 : f32
    %627 = vector.broadcast %cst_243 : f32 to vector<8x4xf32>
    %628 = arith.mulf %627, %626 : vector<8x4xf32>
    %629 = math.exp %628 : vector<8x4xf32>
    %c0_244 = arith.constant 0 : index
    %c48_245 = arith.constant 48 : index
    %c24_246 = arith.constant 24 : index
    %630 = vector.load %arg1[%c0_244, %c48_245, %c24_246] : memref<1x64x32xf32, #tpu.memory_space<vmem>>, vector<1x8x4xf32>
    %631 = vector.shape_cast %630 : vector<1x8x4xf32> to vector<8x4xf32>
    %632 = arith.mulf %629, %631 : vector<8x4xf32>
    %633 = arith.addf %625, %632 : vector<8x4xf32>
    %634 = vector.extract_strided_slice %31 {offsets = [48, 0], sizes = [8, 96], strides = [1, 1]} : vector<64x96xf32> to vector<8x96xf32>
    %635 = arith.truncf %633 : vector<8x4xf32> to vector<8x4xbf16>
    %cst_247 = arith.constant dense<0.000000e+00> : vector<8x96xf32>
    %636 = tpu.matmul %635, %19, %cst_247 {dimension_numbers = #tpu.dot_dimension_numbers<[1], [0], [0], [1], [0, 0, 1, 1], [], []>} : vector<8x4xbf16>, vector<4x96xbf16>, vector<8x96xf32> -> vector<8x96xf32>
    %637 = arith.addf %634, %636 : vector<8x96xf32>
    %638 = arith.truncf %571 : vector<8x32xf32> to vector<8x32xbf16>
    %cst_248 = arith.constant dense<0.000000e+00> : vector<8x96xf32>
    %639 = tpu.matmul %638, %21, %cst_248 {dimension_numbers = #tpu.dot_dimension_numbers<[1], [0], [0], [1], [0, 0, 1, 1], [], []>} : vector<8x32xbf16>, vector<32x96xbf16>, vector<8x96xf32> -> vector<8x96xf32>
    %640 = arith.addf %639, %8 : vector<8x96xf32>
    %641 = arith.addf %637, %640 : vector<8x96xf32>
    %642 = vector.extract_strided_slice %641 {offsets = [0, 0], sizes = [8, 64], strides = [1, 1]} : vector<8x96xf32> to vector<8x64xf32>
    %643 = arith.negf %642 : vector<8x64xf32>
    %644 = math.exp %643 : vector<8x64xf32>
    %cst_249 = arith.constant 1.000000e+00 : f32
    %645 = vector.broadcast %cst_249 : f32 to vector<8x64xf32>
    %646 = arith.addf %645, %644 : vector<8x64xf32>
    %647 = arith.divf %645, %646 : vector<8x64xf32>
    %648 = vector.extract_strided_slice %647 {offsets = [0, 0], sizes = [8, 32], strides = [1, 1]} : vector<8x64xf32> to vector<8x32xf32>
    %649 = vector.extract_strided_slice %647 {offsets = [0, 32], sizes = [8, 32], strides = [1, 1]} : vector<8x64xf32> to vector<8x32xf32>
    %650 = vector.extract_strided_slice %637 {offsets = [0, 64], sizes = [8, 32], strides = [1, 1]} : vector<8x96xf32> to vector<8x32xf32>
    %651 = vector.extract_strided_slice %640 {offsets = [0, 64], sizes = [8, 32], strides = [1, 1]} : vector<8x96xf32> to vector<8x32xf32>
    %652 = arith.mulf %648, %651 : vector<8x32xf32>
    %653 = arith.addf %650, %652 : vector<8x32xf32>
    %654 = math.tanh %653 : vector<8x32xf32>
    %cst_250 = arith.constant 1.000000e+00 : f32
    %655 = vector.broadcast %cst_250 : f32 to vector<8x32xf32>
    %656 = arith.subf %655, %649 : vector<8x32xf32>
    %657 = arith.mulf %656, %654 : vector<8x32xf32>
    %658 = arith.mulf %649, %571 : vector<8x32xf32>
    %659 = arith.addf %657, %658 : vector<8x32xf32>
    %cst_251 = arith.constant -5.000000e+00 : f32
    %cst_252 = arith.constant 5.000000e+00 : f32
    %660 = vector.broadcast %cst_251 : f32 to vector<8x32xf32>
    %661 = arith.maximumf %660, %659 : vector<8x32xf32>
    %662 = vector.broadcast %cst_252 : f32 to vector<8x32xf32>
    %663 = arith.minimumf %662, %661 : vector<8x32xf32>
    %664 = arith.truncf %663 : vector<8x32xf32> to vector<8x32xbf16>
    %cst_253 = arith.constant dense<0.000000e+00> : vector<8x8xf32>
    %665 = tpu.matmul %664, %23, %cst_253 {dimension_numbers = #tpu.dot_dimension_numbers<[1], [0], [0], [1], [0, 0, 1, 1], [], []>} : vector<8x32xbf16>, vector<32x8xbf16>, vector<8x8xf32> -> vector<8x8xf32>
    %c6 = arith.constant 6 : index
    %c0_254 = arith.constant 0 : index
    %c0_255 = arith.constant 0 : index
    %666 = vector.load %arg4[%c6, %c0_254, %c0_255] : memref<9x8x128xf32, #tpu.memory_space<vmem>>, vector<1x8x32xf32>
    %667 = vector.shape_cast %666 : vector<1x8x32xf32> to vector<8x32xf32>
    %668 = vector.shape_cast %663 : vector<8x32xf32> to vector<1x8x32xf32>
    tpu.vector_store %arg4[%c6, %c0_254, %c0_255], %668 {strides = array<i32>} : memref<9x8x128xf32, #tpu.memory_space<vmem>>, vector<1x8x32xf32>,
    %c6_256 = arith.constant 6 : index
    %c0_257 = arith.constant 0 : index
    %c32_258 = arith.constant 32 : index
    %669 = vector.load %arg4[%c6_256, %c0_257, %c32_258] : memref<9x8x128xf32, #tpu.memory_space<vmem>>, vector<1x8x16xf32>
    %670 = vector.shape_cast %669 : vector<1x8x16xf32> to vector<8x16xf32>
    %671 = vector.shape_cast %621 : vector<8x16xf32> to vector<1x8x16xf32>
    tpu.vector_store %arg4[%c6_256, %c0_257, %c32_258], %671 {strides = array<i32>} : memref<9x8x128xf32, #tpu.memory_space<vmem>>, vector<1x8x16xf32>,
    %c6_259 = arith.constant 6 : index
    %c0_260 = arith.constant 0 : index
    %c48_261 = arith.constant 48 : index
    %672 = vector.load %arg4[%c6_259, %c0_260, %c48_261] : memref<9x8x128xf32, #tpu.memory_space<vmem>>, vector<1x8x4xf32>
    %673 = vector.shape_cast %672 : vector<1x8x4xf32> to vector<8x4xf32>
    %674 = vector.shape_cast %625 : vector<8x4xf32> to vector<1x8x4xf32>
    tpu.vector_store %arg4[%c6_259, %c0_260, %c48_261], %674 {strides = array<i32>} : memref<9x8x128xf32, #tpu.memory_space<vmem>>, vector<1x8x4xf32>,
    %c6_262 = arith.constant 6 : index
    %c0_263 = arith.constant 0 : index
    %c56_264 = arith.constant 56 : index
    %675 = vector.load %arg4[%c6_262, %c0_263, %c56_264] : memref<9x8x128xf32, #tpu.memory_space<vmem>>, vector<1x8x4xf32>
    %676 = vector.shape_cast %675 : vector<1x8x4xf32> to vector<8x4xf32>
    %677 = vector.shape_cast %629 : vector<8x4xf32> to vector<1x8x4xf32>
    tpu.vector_store %arg4[%c6_262, %c0_263, %c56_264], %677 {strides = array<i32>} : memref<9x8x128xf32, #tpu.memory_space<vmem>>, vector<1x8x4xf32>,
    %c6_265 = arith.constant 6 : index
    %c0_266 = arith.constant 0 : index
    %c64_267 = arith.constant 64 : index
    %678 = vector.load %arg4[%c6_265, %c0_266, %c64_267] : memref<9x8x128xf32, #tpu.memory_space<vmem>>, vector<1x8x4xf32>
    %679 = vector.shape_cast %678 : vector<1x8x4xf32> to vector<8x4xf32>
    %680 = vector.shape_cast %633 : vector<8x4xf32> to vector<1x8x4xf32>
    tpu.vector_store %arg4[%c6_265, %c0_266, %c64_267], %680 {strides = array<i32>} : memref<9x8x128xf32, #tpu.memory_space<vmem>>, vector<1x8x4xf32>,
    %c6_268 = arith.constant 6 : index
    %c0_269 = arith.constant 0 : index
    %c72_270 = arith.constant 72 : index
    %681 = vector.load %arg4[%c6_268, %c0_269, %c72_270] : memref<9x8x128xf32, #tpu.memory_space<vmem>>, vector<1x8x8xf32>
    %682 = vector.shape_cast %681 : vector<1x8x8xf32> to vector<8x8xf32>
    %683 = vector.shape_cast %665 : vector<8x8xf32> to vector<1x8x8xf32>
    tpu.vector_store %arg4[%c6_268, %c0_269, %c72_270], %683 {strides = array<i32>} : memref<9x8x128xf32, #tpu.memory_space<vmem>>, vector<1x8x8xf32>,
    %684 = vector.extract_strided_slice %28 {offsets = [56, 0], sizes = [8, 48], strides = [1, 1]} : vector<64x48xf32> to vector<8x48xf32>
    %685 = arith.truncf %665 : vector<8x8xf32> to vector<8x8xbf16>
    %cst_271 = arith.constant dense<0.000000e+00> : vector<8x48xf32>
    %686 = tpu.matmul %685, %13, %cst_271 {dimension_numbers = #tpu.dot_dimension_numbers<[1], [0], [0], [1], [0, 0, 1, 1], [], []>} : vector<8x8xbf16>, vector<8x48xbf16>, vector<8x48xf32> -> vector<8x48xf32>
    %687 = arith.addf %684, %686 : vector<8x48xf32>
    %688 = arith.truncf %621 : vector<8x16xf32> to vector<8x16xbf16>
    %cst_272 = arith.constant dense<0.000000e+00> : vector<8x48xf32>
    %689 = tpu.matmul %688, %15, %cst_272 {dimension_numbers = #tpu.dot_dimension_numbers<[1], [0], [0], [1], [0, 0, 1, 1], [], []>} : vector<8x16xbf16>, vector<16x48xbf16>, vector<8x48xf32> -> vector<8x48xf32>
    %690 = arith.addf %689, %7 : vector<8x48xf32>
    %691 = arith.addf %687, %690 : vector<8x48xf32>
    %692 = vector.extract_strided_slice %691 {offsets = [0, 0], sizes = [8, 32], strides = [1, 1]} : vector<8x48xf32> to vector<8x32xf32>
    %693 = arith.negf %692 : vector<8x32xf32>
    %694 = math.exp %693 : vector<8x32xf32>
    %cst_273 = arith.constant 1.000000e+00 : f32
    %695 = vector.broadcast %cst_273 : f32 to vector<8x32xf32>
    %696 = arith.addf %695, %694 : vector<8x32xf32>
    %697 = arith.divf %695, %696 : vector<8x32xf32>
    %698 = vector.extract_strided_slice %697 {offsets = [0, 0], sizes = [8, 16], strides = [1, 1]} : vector<8x32xf32> to vector<8x16xf32>
    %699 = vector.extract_strided_slice %697 {offsets = [0, 16], sizes = [8, 16], strides = [1, 1]} : vector<8x32xf32> to vector<8x16xf32>
    %700 = vector.extract_strided_slice %687 {offsets = [0, 32], sizes = [8, 16], strides = [1, 1]} : vector<8x48xf32> to vector<8x16xf32>
    %701 = vector.extract_strided_slice %690 {offsets = [0, 32], sizes = [8, 16], strides = [1, 1]} : vector<8x48xf32> to vector<8x16xf32>
    %702 = arith.mulf %698, %701 : vector<8x16xf32>
    %703 = arith.addf %700, %702 : vector<8x16xf32>
    %704 = math.tanh %703 : vector<8x16xf32>
    %cst_274 = arith.constant 1.000000e+00 : f32
    %705 = vector.broadcast %cst_274 : f32 to vector<8x16xf32>
    %706 = arith.subf %705, %699 : vector<8x16xf32>
    %707 = arith.mulf %706, %704 : vector<8x16xf32>
    %708 = arith.mulf %699, %621 : vector<8x16xf32>
    %709 = arith.addf %707, %708 : vector<8x16xf32>
    %cst_275 = arith.constant -5.000000e+00 : f32
    %cst_276 = arith.constant 5.000000e+00 : f32
    %710 = vector.broadcast %cst_275 : f32 to vector<8x16xf32>
    %711 = arith.maximumf %710, %709 : vector<8x16xf32>
    %712 = vector.broadcast %cst_276 : f32 to vector<8x16xf32>
    %713 = arith.minimumf %712, %711 : vector<8x16xf32>
    %714 = arith.truncf %713 : vector<8x16xf32> to vector<8x16xbf16>
    %cst_277 = arith.constant dense<0.000000e+00> : vector<8x8xf32>
    %715 = tpu.matmul %714, %17, %cst_277 {dimension_numbers = #tpu.dot_dimension_numbers<[1], [0], [0], [1], [0, 0, 1, 1], [], []>} : vector<8x16xbf16>, vector<16x8xbf16>, vector<8x8xf32> -> vector<8x8xf32>
    %716 = arith.addf %715, %9 : vector<8x8xf32>
    %717 = vector.extract_strided_slice %716 {offsets = [0, 0], sizes = [8, 4], strides = [1, 1]} : vector<8x8xf32> to vector<8x4xf32>
    %718 = vector.extract_strided_slice %716 {offsets = [0, 4], sizes = [8, 4], strides = [1, 1]} : vector<8x8xf32> to vector<8x4xf32>
    %cst_278 = arith.constant 5.000000e-01 : f32
    %719 = vector.broadcast %cst_278 : f32 to vector<8x4xf32>
    %720 = arith.mulf %719, %718 : vector<8x4xf32>
    %721 = math.exp %720 : vector<8x4xf32>
    %c0_279 = arith.constant 0 : index
    %c56_280 = arith.constant 56 : index
    %c24_281 = arith.constant 24 : index
    %722 = vector.load %arg1[%c0_279, %c56_280, %c24_281] : memref<1x64x32xf32, #tpu.memory_space<vmem>>, vector<1x8x4xf32>
    %723 = vector.shape_cast %722 : vector<1x8x4xf32> to vector<8x4xf32>
    %724 = arith.mulf %721, %723 : vector<8x4xf32>
    %725 = arith.addf %717, %724 : vector<8x4xf32>
    %726 = vector.extract_strided_slice %31 {offsets = [56, 0], sizes = [8, 96], strides = [1, 1]} : vector<64x96xf32> to vector<8x96xf32>
    %727 = arith.truncf %725 : vector<8x4xf32> to vector<8x4xbf16>
    %cst_282 = arith.constant dense<0.000000e+00> : vector<8x96xf32>
    %728 = tpu.matmul %727, %19, %cst_282 {dimension_numbers = #tpu.dot_dimension_numbers<[1], [0], [0], [1], [0, 0, 1, 1], [], []>} : vector<8x4xbf16>, vector<4x96xbf16>, vector<8x96xf32> -> vector<8x96xf32>
    %729 = arith.addf %726, %728 : vector<8x96xf32>
    %730 = arith.truncf %663 : vector<8x32xf32> to vector<8x32xbf16>
    %cst_283 = arith.constant dense<0.000000e+00> : vector<8x96xf32>
    %731 = tpu.matmul %730, %21, %cst_283 {dimension_numbers = #tpu.dot_dimension_numbers<[1], [0], [0], [1], [0, 0, 1, 1], [], []>} : vector<8x32xbf16>, vector<32x96xbf16>, vector<8x96xf32> -> vector<8x96xf32>
    %732 = arith.addf %731, %8 : vector<8x96xf32>
    %733 = arith.addf %729, %732 : vector<8x96xf32>
    %734 = vector.extract_strided_slice %733 {offsets = [0, 0], sizes = [8, 64], strides = [1, 1]} : vector<8x96xf32> to vector<8x64xf32>
    %735 = arith.negf %734 : vector<8x64xf32>
    %736 = math.exp %735 : vector<8x64xf32>
    %cst_284 = arith.constant 1.000000e+00 : f32
    %737 = vector.broadcast %cst_284 : f32 to vector<8x64xf32>
    %738 = arith.addf %737, %736 : vector<8x64xf32>
    %739 = arith.divf %737, %738 : vector<8x64xf32>
    %740 = vector.extract_strided_slice %739 {offsets = [0, 0], sizes = [8, 32], strides = [1, 1]} : vector<8x64xf32> to vector<8x32xf32>
    %741 = vector.extract_strided_slice %739 {offsets = [0, 32], sizes = [8, 32], strides = [1, 1]} : vector<8x64xf32> to vector<8x32xf32>
    %742 = vector.extract_strided_slice %729 {offsets = [0, 64], sizes = [8, 32], strides = [1, 1]} : vector<8x96xf32> to vector<8x32xf32>
    %743 = vector.extract_strided_slice %732 {offsets = [0, 64], sizes = [8, 32], strides = [1, 1]} : vector<8x96xf32> to vector<8x32xf32>
    %744 = arith.mulf %740, %743 : vector<8x32xf32>
    %745 = arith.addf %742, %744 : vector<8x32xf32>
    %746 = math.tanh %745 : vector<8x32xf32>
    %cst_285 = arith.constant 1.000000e+00 : f32
    %747 = vector.broadcast %cst_285 : f32 to vector<8x32xf32>
    %748 = arith.subf %747, %741 : vector<8x32xf32>
    %749 = arith.mulf %748, %746 : vector<8x32xf32>
    %750 = arith.mulf %741, %663 : vector<8x32xf32>
    %751 = arith.addf %749, %750 : vector<8x32xf32>
    %cst_286 = arith.constant -5.000000e+00 : f32
    %cst_287 = arith.constant 5.000000e+00 : f32
    %752 = vector.broadcast %cst_286 : f32 to vector<8x32xf32>
    %753 = arith.maximumf %752, %751 : vector<8x32xf32>
    %754 = vector.broadcast %cst_287 : f32 to vector<8x32xf32>
    %755 = arith.minimumf %754, %753 : vector<8x32xf32>
    %756 = arith.truncf %755 : vector<8x32xf32> to vector<8x32xbf16>
    %cst_288 = arith.constant dense<0.000000e+00> : vector<8x8xf32>
    %757 = tpu.matmul %756, %23, %cst_288 {dimension_numbers = #tpu.dot_dimension_numbers<[1], [0], [0], [1], [0, 0, 1, 1], [], []>} : vector<8x32xbf16>, vector<32x8xbf16>, vector<8x8xf32> -> vector<8x8xf32>
    %c7 = arith.constant 7 : index
    %c0_289 = arith.constant 0 : index
    %c0_290 = arith.constant 0 : index
    %758 = vector.load %arg4[%c7, %c0_289, %c0_290] : memref<9x8x128xf32, #tpu.memory_space<vmem>>, vector<1x8x32xf32>
    %759 = vector.shape_cast %758 : vector<1x8x32xf32> to vector<8x32xf32>
    %760 = vector.shape_cast %755 : vector<8x32xf32> to vector<1x8x32xf32>
    tpu.vector_store %arg4[%c7, %c0_289, %c0_290], %760 {strides = array<i32>} : memref<9x8x128xf32, #tpu.memory_space<vmem>>, vector<1x8x32xf32>,
    %c7_291 = arith.constant 7 : index
    %c0_292 = arith.constant 0 : index
    %c32_293 = arith.constant 32 : index
    %761 = vector.load %arg4[%c7_291, %c0_292, %c32_293] : memref<9x8x128xf32, #tpu.memory_space<vmem>>, vector<1x8x16xf32>
    %762 = vector.shape_cast %761 : vector<1x8x16xf32> to vector<8x16xf32>
    %763 = vector.shape_cast %713 : vector<8x16xf32> to vector<1x8x16xf32>
    tpu.vector_store %arg4[%c7_291, %c0_292, %c32_293], %763 {strides = array<i32>} : memref<9x8x128xf32, #tpu.memory_space<vmem>>, vector<1x8x16xf32>,
    %c7_294 = arith.constant 7 : index
    %c0_295 = arith.constant 0 : index
    %c48_296 = arith.constant 48 : index
    %764 = vector.load %arg4[%c7_294, %c0_295, %c48_296] : memref<9x8x128xf32, #tpu.memory_space<vmem>>, vector<1x8x4xf32>
    %765 = vector.shape_cast %764 : vector<1x8x4xf32> to vector<8x4xf32>
    %766 = vector.shape_cast %717 : vector<8x4xf32> to vector<1x8x4xf32>
    tpu.vector_store %arg4[%c7_294, %c0_295, %c48_296], %766 {strides = array<i32>} : memref<9x8x128xf32, #tpu.memory_space<vmem>>, vector<1x8x4xf32>,
    %c7_297 = arith.constant 7 : index
    %c0_298 = arith.constant 0 : index
    %c56_299 = arith.constant 56 : index
    %767 = vector.load %arg4[%c7_297, %c0_298, %c56_299] : memref<9x8x128xf32, #tpu.memory_space<vmem>>, vector<1x8x4xf32>
    %768 = vector.shape_cast %767 : vector<1x8x4xf32> to vector<8x4xf32>
    %769 = vector.shape_cast %721 : vector<8x4xf32> to vector<1x8x4xf32>
    tpu.vector_store %arg4[%c7_297, %c0_298, %c56_299], %769 {strides = array<i32>} : memref<9x8x128xf32, #tpu.memory_space<vmem>>, vector<1x8x4xf32>,
    %c7_300 = arith.constant 7 : index
    %c0_301 = arith.constant 0 : index
    %c64_302 = arith.constant 64 : index
    %770 = vector.load %arg4[%c7_300, %c0_301, %c64_302] : memref<9x8x128xf32, #tpu.memory_space<vmem>>, vector<1x8x4xf32>
    %771 = vector.shape_cast %770 : vector<1x8x4xf32> to vector<8x4xf32>
    %772 = vector.shape_cast %725 : vector<8x4xf32> to vector<1x8x4xf32>
    tpu.vector_store %arg4[%c7_300, %c0_301, %c64_302], %772 {strides = array<i32>} : memref<9x8x128xf32, #tpu.memory_space<vmem>>, vector<1x8x4xf32>,
    %c7_303 = arith.constant 7 : index
    %c0_304 = arith.constant 0 : index
    %c72_305 = arith.constant 72 : index
    %773 = vector.load %arg4[%c7_303, %c0_304, %c72_305] : memref<9x8x128xf32, #tpu.memory_space<vmem>>, vector<1x8x8xf32>
    %774 = vector.shape_cast %773 : vector<1x8x8xf32> to vector<8x8xf32>
    %775 = vector.shape_cast %757 : vector<8x8xf32> to vector<1x8x8xf32>
    tpu.vector_store %arg4[%c7_303, %c0_304, %c72_305], %775 {strides = array<i32>} : memref<9x8x128xf32, #tpu.memory_space<vmem>>, vector<1x8x8xf32>,
    return
  }
  func.func @transform_0(%arg0: i32) -> (i32, i32, i32) {
    %c0_i32 = arith.constant 0 : i32
    %c0_i32_0 = arith.constant 0 : i32
    %c0_i32_1 = arith.constant 0 : i32
    return %arg0, %c0_i32, %c0_i32_0 : i32, i32, i32
  }
  func.func @transform_1(%arg0: i32) -> (i32, i32) {
    %c0_i32 = arith.constant 0 : i32
    %c0_i32_0 = arith.constant 0 : i32
    return %arg0, %c0_i32 : i32, i32
  }
  func.func @transform_2(%arg0: i32) -> (i32, i32) {
    %c0_i32 = arith.constant 0 : i32
    %c0_i32_0 = arith.constant 0 : i32
    %c0_i32_1 = arith.constant 0 : i32
    return %c0_i32, %c0_i32_0 : i32, i32
  }
  func.func @transform_3(%arg0: i32) -> (i32, i32, i32) {
    %c0_i32 = arith.constant 0 : i32
    %c0_i32_0 = arith.constant 0 : i32
    %c0_i32_1 = arith.constant 0 : i32
    return %c0_i32, %arg0, %c0_i32_0 : i32, i32, i32
  }
}

</mosaic_0001>

<bundles_post_ra>
// kernel: tpu_custom_call.1
= control target key start
LH: loop header
LB: loop body
LE: loop exit
PB: predicated region body
PF: predicated region fallthrough
CT: control target
= control target key end

     0   :  { %8 = vsyncpa [#allocation3], 0  ;;  %s5245_s0 = inlined_call_operand.vmem [shape: f32[1,64,32], index: 0, kind: input, shape index: {}]   ;;  %s5246_s1 = inlined_call_operand.vmem [shape: f32[8,8], index: 1, kind: input, shape index: {}]   ;;  %s5247_s2 = inlined_call_operand.hbm [shape: f32[240,128], index: 2, kind: input, shape index: {}]   ;;  %s5248_s3 = inlined_call_operand.hbm [shape: f32[9,8,128], index: 3, kind: output, shape index: {}]  }
   0x1   :  { %9 = vsyncpa [#allocation4], 0  ;;  %s4223_s12 = smov [#allocation2]   ;;  %s4175_s16 = scalar_lea.hbm %s5247_s2, 3840 }
   0x2   :  { %s19_s13 = sshll.u32 %s4223_s12, 4  ;;  %p4176_p0 = scmp.ne.s32.totalorder %s5247_s2, %s4175_s16  ;;  %s20_s13 = int_to_ptr.vmem [resolvable:$true] %s19_s13 }
   0x3   :  { %p4179_p1 = scmp.lt.u32.totalorder %s4175_s16, %s5247_s2 }
   0x5   :  { %p4181_p2 = pnand %p4179_p1, %p4176_p0 }
   0x7   :  { %4184 = shalt.err (!%p4181_p2)
}
   0x8   :  { %s4185_s21 = scalar_lea.vmem %s20_s13, 3840  ;;  %p4190_p4 = scmp.lt.s32.totalorder %s20_s13, %s20_s13 }
   0x9   :  { %p4186_p3 = scmp.ne.s32.totalorder %s20_s13, %s4185_s21  ;;  %p4191_p5 = scmp.lt.s32.totalorder %s4185_s21, %s4185_s21 }
   0xb   :  { %p4192_p6 = por %p4191_p5, %p4190_p4 }
   0xd   :  { %p4193_p7 = pnand %p4192_p6, %p4186_p3 }
   0xf   :  { %4196 = shalt.err (!%p4193_p7)
}
  0x10   :  { %s4224_s22 = smov 128   ;;  %s4225_s23 = smov 8  }
  0x11   :  { %25 = dma.hbm_to_vmem [thread:$0]  %s5247_s2, 3840, %s20_s13, [#allocation3], %s4224_s22, %s4224_s22, %s4225_s23  }
  0x12   :  { %4219 = dma.done.wait [#allocation3], 3840  }
  0x13   :  { %4220 = vsyncadd [#allocation3], 4294963456  ;;  %v4226_v0 = vmov 0.0   ;;  %vm89_vm0 = vcmask 261120   ;;  %v39_v1 = vld [vmem:[#allocation2] sm:$0xff]  ;;  %v40_v2 = vld [vmem:[#allocation2 + $0x8] sm:$0xff] }
  0x14   :  { %30 = vst [vmem:[#allocation5] sm:$0xff] %v4226_v0  ;;  %31 = vst [vmem:[#allocation5 + $0x8] sm:$0xff] %v4226_v0  ;;  %v41_v3 = vld [vmem:[#allocation2 + $0x10] sm:$0xff]  ;;  %v4026_v4 = vpack.c.bf16 %v40_v2, %v39_v1  ;;  %v42_v5 = vld [vmem:[#allocation2 + $0x18] sm:$0xff]  ;;  %vm4227_vm1 = vmmov 0   ;;  %vm329_vm2 = vcmask 64512  }
  0x15   :  { %32 = vst [vmem:[#allocation5 + $0x10] sm:$0xff] %v4226_v0  ;;  %33 = vst [vmem:[#allocation5 + $0x18] sm:$0xff] %v4226_v0  ;;  %v4286_v6 = vld [vmem:[%s5245_s0] sm:$0xff]  ;;  %v4030_v7 = vpack.c.bf16 %v42_v5, %v41_v3  ;;  %v44_v9 = vld [vmem:[#allocation2 + $0x28] sm:$0xff]  ;;  %vm499_vm3 = vcmask 130048   ;;  %vm453_vm4 = vcmask 1043456  }
  0x16   :  { %34 = vst [vmem:[#allocation5 + $0x20] sm:$0xff] %v4226_v0  ;;  %35 = vst [vmem:[#allocation5 + $0x28] sm:$0xff] %v4226_v0  ;;  %3661 = vmatprep.mubr.msk.f32.mxu0 %vm89_vm0, %v4286_v6  ;;  %3681 = vmatprep.mubr.msk.f32.mxu1 %vm89_vm0, %v4286_v6  ;;  %v43_v8 = vld [vmem:[#allocation2 + $0x20] sm:$0xff]  ;;  %v4295_v11 = vld [vmem:[%s5245_s0 + $0x8] sm:$0xff]  ;;  %s4229_s16 = smov 32   ;;  %s4230_s17 = smov 112  }
  0x17   :  { %36 = vst [vmem:[#allocation5 + $0x30] sm:$0xff] %v4226_v0  ;;  %37 = vst [vmem:[#allocation5 + $0x38] sm:$0xff] %v4226_v0  ;;  %4027 = vmatprep.subr.bf16.mxu0 %v4026_v4  ;;  %v4034_v10 = vpack.c.bf16 %v44_v9, %v43_v8  ;;  %v47_v12 = vld [vmem:[#allocation2 + $0xb0] sm:$0xff]  ;;  %v80_v14 = vld [vmem:[%s5245_s0 + $0x18] sm:$0xff]  ;;  %s4231_s18 = smov 16   ;;  %s4232_s19 = smov 108  }
  0x18   :  { %38 = vst [vmem:[#allocation5 + $0x40] sm:$0xff] %v4226_v0  ;;  %4029 = vmatpush3.bf16.msra.mxu0 %v4026_v4  ;;  %v4301_v13 = vld [vmem:[%s5245_s0 + $0x10] sm:$0xff]  ;;  %v81_v15 = vld [vmem:[%s5245_s0 + $0x20] sm:$0xff]  ;;  %v82_v16 = vld [vmem:[%s5245_s0 + $0x28] sm:$0xff]  ;;  %vm641_vm5 = vcmask 1041408   ;;  %s4233_s20 = smov 64  }
  0x19   :  { %4031 = vmatprep.subr.bf16.mxu0 %v4030_v7  ;;  %4035 = vmatprep.subr.bf16.mxu1 %v4034_v10  ;;  %v83_v17 = vld [vmem:[%s5245_s0 + $0x30] sm:$0xff]  ;;  %v84_v18 = vld [vmem:[%s5245_s0 + $0x38] sm:$0xff]  ;;  %v328_v19 = vld [vmem:[%s5246_s1] sm:$0xff]  ;;  %s4228_s1 = smov 96   ;;  %s4234_s21 = smov 124   ;;  %vm637_vm6 = vcmask 31744  }
  0x1a   :  { %4037 = vmatpush3.bf16.msra.mxu1 %v4034_v10  ;;  %v45_v20 = vld [vmem:[#allocation2 + $0x30] sm:$0xff]  ;;  %v46_v21 = vld [vmem:[#allocation2 + $0x38] sm:$0xff]  ;;  %v73_v26 = vld [vmem:[#allocation2 + $0xa0] sm:$0xff]  ;;  %s4236_s6 = smov 52   ;;  %s4237_s7 = smov 72   ;;  %vm814_vm7 = vcmask 392448  }
  0x1b   :  { %v4038_v22 = vpack.c.bf16 %v46_v21, %v45_v20  ;;  %v71_v23 = vld [vmem:[#allocation2 + $0x90] sm:$0xff]  ;;  %v72_v24 = vld [vmem:[#allocation2 + $0x98] sm:$0xff]  ;;  %v74_v27 = vld [vmem:[#allocation2 + $0xa8] sm:$0xff]  ;;  %vm820_vm8 = vcmask 425344   ;;  %vm826_vm9 = vcmask 490944   ;;  %vm832_vm10 = vcmask 556544  }
  0x1c   :  { %4033 = vmatpush3.bf16.msra.mxu0 %v4030_v7  ;;  %v4341_v25 = vpack.c.bf16 %v72_v24, %v71_v23  ;;  %v4349_v28 = vpack.c.bf16 %v74_v27, %v73_v26  ;;  %v4356_v29 = vld [vmem:[#allocation2 + $0xb8] ss:$0 sm:$0xff]  ;;  %v53_v45 = vld [vmem:[#allocation2 + $0xe0] sm:$0xff]  ;;  %v57_v46 = vld [vmem:[#allocation2 + $0x48] sm:$0xff]  ;;  %vm838_vm11 = vcmask 654912   ;;  %s4238_s8 = smov [#allocation5]  }
  0x1d   :  { %3693 = vmatprep.subr.mxu0 %v4226_v0  ;;  %4039 = vmatprep.subr.bf16.mxu1 %v4038_v22  ;;  %v58_v47 = vld [vmem:[#allocation2 + $0x50] sm:$0xff]  ;;  %v4396_v53 = vld [vmem:[#allocation2 + $0xe8] sm:$0xff]  ;;  %v55_v8 = vld [vmem:[#allocation2 + $0x40] sm:$0xff]  ;;  %s3400_s9 = sshll.u32 %s4238_s8, 4  ;;  %s3401_s9 = int_to_ptr.vmem [resolvable:$true] %s3400_s9 }
  0x1e   :  { %4041 = vmatpush3.bf16.msra.mxu1 %v4038_v22  ;;  %v4383_v51 = vpack.c.bf16 %v58_v47, %v57_v46  ;;  %v498_v54 = vpack.c.bf16 %v4396_v53, %v4396_v53  ;;  %v4404_v55 = vld [vmem:[#allocation2 + $0xc8] ss:$0 sm:$0xff]  ;;  %v56_v10 = vpack.c.bf16 %v55_v8, %v55_v8  ;;  %s4197_s10 = scalar_lea.vmem %s3401_s9, 1152  ;;  %p4202_p9 = scmp.lt.s32.totalorder %s3401_s9, %s3401_s9 }
  0x1f   :  { %3662 = vmatmul.mubr.msk.f32.vlgmr.msra.gmra.mrb[0].mxu0 %vm89_vm0, %v4295_v11  ;;  %3698 = vmatprep.subr.bf16.mxu1 %v4226_v0  ;;  %p4198_p8 = scmp.ne.s32.totalorder %s3401_s9, %s4197_s10  ;;  %p4203_p10 = scmp.lt.s32.totalorder %s4197_s10, %s4197_s10 }
  0x20   :  { %3694 = vmatpush3.msra.mxu0 %v47_v12  ;;  %3664 = vmatprep.mubr.msk.f32.mxu0 %vm89_vm0, %v4301_v13  ;;  %v4429_v12 = vsel %vm453_vm4, %v56_v10, 0 }
  0x21   :  { %3706 = vmatprep.subr.bf16.mxu0 %v4226_v0  ;;  %3682 = vmatmul.mubr.msk.f32.vlgmr.msra.gmra.mrb[0].mxu1 %vm89_vm0, %v4295_v11  ;;  %p4204_p11 = por %p4203_p10, %p4202_p9 }
  0x22   :  { %3684 = vmatprep.mubr.msk.f32.mxu1 %vm89_vm0, %v4301_v13  ;;  %3699 = vmatpush3.bf16.msra.mxu1 %v4341_v25 }
  0x23   :  { %3665 = vmatmul.mubr.msk.f32.gmra.mrb[2].mxu0 %vm89_vm0, %v80_v14  ;;  %3700 = vmatprep.subr.bf16.mxu1 %v4226_v0  ;;  %p4205_p12 = pnand %p4204_p11, %p4198_p8 }
  0x24   :  { %3667 = vmatprep.mubr.msk.f32.mxu0 %vm89_vm0, %v81_v15 }
  0x25   :  { %3685 = vmatmul.mubr.msk.f32.gmra.mrb[2].mxu1 %vm89_vm0, %v80_v14 }
  0x26   :  { %3687 = vmatprep.mubr.msk.f32.mxu1 %vm89_vm0, %v81_v15  ;;  %3701 = vmatpush3.bf16.msra.mxu1 %v4349_v28 }
  0x27   :  { %3668 = vmatmul.mubr.msk.f32.gmra.mrb[4].mxu0 %vm89_vm0, %v82_v16  ;;  %3712 = vmatprep.subr.bf16.mxu1 %v4226_v0 }
  0x28   :  { %3670 = vmatprep.mubr.msk.f32.mxu0 %vm89_vm0, %v83_v17 }
  0x29   :  { %3688 = vmatmul.mubr.msk.f32.gmra.mrb[4].mxu1 %vm89_vm0, %v82_v16 }
  0x2a   :  { %3690 = vmatprep.mubr.msk.f32.mxu1 %vm89_vm0, %v83_v17 }
  0x2b   :  { %3671 = vmatmul.mubr.msk.f32.gmra.mrb[6].mxu0 %vm89_vm0, %v84_v18 }
  0x2c   :  { %3695 = vmatprep.mubr.msk.f32.mxu0 %vm4227_vm1, %v4226_v0 }
  0x2d   :  { %3691 = vmatmul.mubr.msk.f32.gmra.mrb[6].mxu1 %vm89_vm0, %v84_v18 }
  0x2e   :  { %3702 = vmatprep.mubr.msk.bf16.mxu1 %vm4227_vm1, %v4226_v0 }
  0x2f   :  { %3696 = vmatmul.mubr.msk.f32.vlgmr.msra.gmra.mrb[8].mxu0 %vm329_vm2, %v328_v19  ;;  %v4436_v19 = vld [vmem:[#allocation2 + $0xc0] sm:$0xff] }
  0x30   :  { %3708 = vmatprep.mubr.msk.bf16.mxu0 %vm4227_vm1, %v4226_v0  ;;  %3707 = vmatpush3.bf16.msra.mxu0 %v4429_v12 }
  0x31   :  { %3718 = vmatprep.subr.bf16.mxu0 %v4226_v0 }
  0xf2   :  { %v3663_v30 = vpop.f32.mrb[0].mxu0 }
  0xf3   :  { %v4359_v31 = vadd.f32 %v3663_v30, %v4356_v29  ;;  %v4361_v32 = vpop.f32.mrb[1].mxu0 }
  0xf4   :  { %v3683_v56 = vpop.f32.mrb[0].mxu1  ;;  %v181_v26 = vadd.f32 %v4356_v29, %v4361_v32  ;;  %v60_v32 = vld [vmem:[#allocation2 + $0x58] sm:$0xff] }
  0xf5   :  { %v4407_v57 = vadd.f32 %v3683_v56, %v4404_v55  ;;  %v4409_v58 = vpop.f32.mrb[1].mxu1  ;;  %v61_v56 = vld [vmem:[#allocation2 + $0x60] sm:$0xff] }
  0xf6   :  { %v3666_v33 = vpop.f32.mrb[2].mxu0 }
  0xf7   :  { %v4364_v34 = vadd.f32 %v3666_v33, %v4356_v29  ;;  %v190_v35 = vpop.f32.mrb[3].mxu0 }
  0xf8   :  { %v4367_v36 = vadd.f32 %v4356_v29, %v190_v35  ;;  %v3686_v59 = vpop.f32.mrb[2].mxu1 }
  0xf9   :  { %v4412_v60 = vadd.f32 %v3686_v59, %v4404_v55  ;;  %v299_v61 = vpop.f32.mrb[3].mxu1  ;;  %v4444_v59 = vpack.c.bf16 %v61_v56, %v60_v32 }
  0xfa   :  { %v3669_v37 = vpop.f32.mrb[4].mxu0  ;;  %v4415_v62 = vadd.f32 %v4404_v55, %v299_v61 }
  0xfb   :  { %v4370_v38 = vadd.f32 %v3669_v37, %v4356_v29  ;;  %v200_v39 = vpop.f32.mrb[5].mxu0 }
  0xfc   :  { %v4373_v40 = vadd.f32 %v4356_v29, %v200_v39  ;;  %v3689_v63 = vpop.f32.mrb[4].mxu1 }
  0xfd   :  { %v4418_v1 = vadd.f32 %v3689_v63, %v4404_v55  ;;  %v309_v2 = vpop.f32.mrb[5].mxu1 }
  0xfe   :  { %v3672_v41 = vpop.f32.mrb[6].mxu0  ;;  %v4421_v3 = vadd.f32 %v4404_v55, %v309_v2 }
  0xff   :  { %v4376_v42 = vadd.f32 %v3672_v41, %v4356_v29  ;;  %v210_v43 = vpop.f32.mrb[7].mxu0 }
 0x100   :  { %v4379_v44 = vadd.f32 %v4356_v29, %v210_v43  ;;  %v3692_v4 = vpop.f32.mrb[6].mxu1 }
 0x101   :  { %v4424_v5 = vadd.f32 %v3692_v4, %v4404_v55  ;;  %v319_v7 = vpop.f32.mrb[7].mxu1 }
 0x102   :  { %v399_v48 = vpop.f32.mrb[8].mxu0  ;;  %v4427_v9 = vadd.f32 %v4404_v55, %v319_v7 }
 0x103   :  { %v4381_v49 = vadd.f32 %v399_v48, %v53_v45  ;;  %v3697_v50 = vpop.f32.mrb[9].mxu0 }
 0x105   :  { %404 = vst.msk [vmem:[#allocation5 + $0x40] sm:$0xff] %vm89_vm0, %v4381_v49  ;;  %v4389_v52 = vpack.c.bf16 %v4381_v49, %v4381_v49 }
 0x107   :  { %3703 = vmatmul.mubr.msk.bf16.vlgmr.msra.gmra.mrb[8].mxu1 %vm89_vm0, %v4389_v52 }
 0x108   :  { %3713 = vmatpush3.bf16.msra.mxu1 %v4383_v51  ;;  %3714 = vmatprep.mubr.msk.bf16.mxu1 %vm4227_vm1, %v4226_v0 }
 0x109   :  { %3724 = vmatprep.subr.bf16.mxu1 %v4226_v0 }
 0x10f   :  { %3715 = vmatmul.mubr.msk.bf16.vlgmr.msra.gmra.mrb[12].mxu1 %vm499_vm3, %v498_v54 }
 0x110   :  { %3726 = vmatprep.mubr.msk.bf16.mxu1 %vm4227_vm1, %v4226_v0 }
 0x1da   :  { %v443_v14 = vpop.f32.mrb[8].mxu1 }
 0x1db   :  { %v449_v15 = vpack.c.bf16 %v443_v14, %v443_v14  ;;  %v3704_v16 = vpop.f32.mrb[9].mxu1 }
 0x1dc   :  { %v446_v17 = vpop.f32.mrb[10].mxu1  ;;  %v66_v16 = vld [vmem:[#allocation2 + $0x78] sm:$0xff] }
 0x1dd   :  { %v3705_v18 = vpop.f32.mrb[11].mxu1  ;;  %3709 = vmatmul.mubr.msk.bf16.vlgmr.msra.gmra.mrb[12].mxu0 %vm329_vm2, %v449_v15  ;;  %v65_v15 = vld [vmem:[#allocation2 + $0x70] sm:$0xff]  ;;  %v67_v17 = vld [vmem:[#allocation2 + $0x80] sm:$0xff] }
 0x1de   :  { %3720 = vmatprep.mubr.msk.bf16.mxu0 %vm4227_vm1, %v4226_v0  ;;  %3719 = vmatpush3.bf16.msra.mxu0 %v4444_v59  ;;  %v68_v18 = vld [vmem:[#allocation2 + $0x88] sm:$0xff] }
 0x1df   :  { %3730 = vmatprep.subr.bf16.mxu0 %v4226_v0 }
 0x1e2   :  { %v537_v20 = vpop.f32.mrb[12].mxu1 }
 0x1e3   :  { %v538_v21 = vadd.f32 %v537_v20, %v4436_v19  ;;  %v3716_v22 = vpop.f32.mrb[13].mxu1 }
 0x1e4   :  { %v540_v23 = vpop.f32.mrb[14].mxu1  ;;  %v4477_v22 = vld [vmem:[#allocation2 + $0xd8] sm:$0xff] }
 0x1e5   :  { %v3717_v24 = vpop.f32.mrb[15].mxu1  ;;  %551 = vrot.lane.b32.xlu0 %v538_v21, %s4228_s1 }
 0x257   :  { %v552_v46 = vpop.permute.xlu0 %551 }
 0x2b0   :  { %v491_v27 = vpop.f32.mrb[12].mxu0 }
 0x2b1   :  { %v497_v30 = vadd.f32 %v491_v27, %v181_v26  ;;  %v3710_v33 = vpop.f32.mrb[13].mxu0 }
 0x2b2   :  { %v494_v35 = vpop.f32.mrb[14].mxu0 }
 0x2b3   :  { %v543_v37 = vadd.f32 %v538_v21, %v497_v30  ;;  %v3711_v39 = vpop.f32.mrb[15].mxu0  ;;  %v4464_v21 = vpack.c.bf16 %v68_v18, %v67_v17 }
 0x2b4   :  { %v4487_v39 = vld [vmem:[#allocation2 + $0xd0] sm:$0xff] }
 0x2b5   :  { %v3434_v41 = vmul.f32 -1.442695, %v543_v37 }
 0x2b7   :  { %4058 = vpow2.f32 %v3434_v41 }
 0x2c1   :  { %v4059_v43 = vpop.eup %4058 }
 0x2c2   :  { %v547_v45 = vadd.f32 1.0, %v4059_v43 }
 0x2c4   :  { %4060 = vrcp.f32 %v547_v45 }
 0x2ce   :  { %v4061_v47 = vpop.eup %4060 }
 0x2cf   :  { %v554_v48 = vmul.f32 %v4061_v47, %v552_v46  ;;  %v561_v63 = vsub.f32 1.0, %v4061_v47 }
 0x2d1   :  { %556 = vrot.lane.b32.xlu0 %v554_v48, %s4229_s16 }
 0x343   :  { %v557_v50 = vpop.permute.xlu0 %556 }
 0x344   :  { %v559_v54 = vadd.f32 %v557_v50, %v497_v30 }
 0x346   :  { %4062 = vtanh.f32 %v559_v54 }
 0x350   :  { %v4063_v29 = vpop.eup %4062 }
 0x351   :  { %563 = vrot.lane.b32.xlu1 %v4063_v29, %s4230_s17 }
 0x355   :  { %568 = vrot.lane.b32.xlu1 %v4396_v53, %s4231_s18  ;;  %v4457_v53 = vpack.c.bf16 %v66_v16, %v65_v15 }
 0x359   :  { %627 = vrot.lane.b32.xlu1 %v4286_v6, %s4232_s19  ;;  %v63_v6 = vld [vmem:[#allocation2 + $0x68] sm:$0xf] }
 0x35a   :  { %v64_v23 = vpack.c.bf16 %v63_v6, %v63_v6 }
 0x35c   :  { %v4479_v26 = vsel %vm641_vm5, %v64_v23, 0 }
 0x35d   :  { %3725 = vmatpush3.bf16.msra.mxu1 %v4479_v26 }
 0x35e   :  { %3738 = vmatprep.subr.bf16.mxu1 %v4226_v0 }
 0x3c3   :  { %v564_v61 = vpop.permute.xlu1 %563 }
 0x3c4   :  { %v566_v4 = vmul.f32 %v564_v61, %v561_v63  ;;  %v290_v61 = vadd.f32 %v4404_v55, %v4409_v58 }
 0x3c7   :  { %v569_v2 = vpop.permute.xlu1 %568 }
 0x3c8   :  { %v571_v7 = vmul.f32 %v4061_v47, %v569_v2 }
 0x3ca   :  { %v572_v8 = vadd.f32 %v571_v7, %v566_v4 }
 0x3cb   :  { %v628_v48 = vpop.permute.xlu1 %627 }
 0x3cc   :  { %v4450_v10 = vclamps-f32 %v572_v8, 5.0 }
 0x3ce   :  { %v575_v14 = vpack.c.bf16 %v4450_v10, %v4450_v10 }
 0x3d0   :  { %577 = vrot.lane.b32.xlu0 %v575_v14, %s4230_s17 }
 0x442   :  { %v4459_v20 = vpop.permute.xlu0 %577 }
 0x443   :  { %3721 = vmatmul.mubr.msk.bf16.vlgmr.msra.gmra.mrb[16].mxu0 %vm499_vm3, %v4459_v20 }
 0x444   :  { %3731 = vmatpush3.bf16.msra.mxu0 %v4457_v53  ;;  %3734 = vmatprep.mubr.msk.bf16.mxu0 %vm4227_vm1, %v4226_v0 }
 0x445   :  { %3732 = vmatprep.subr.bf16.mxu0 %v4226_v0 }
 0x448   :  { %3733 = vmatpush3.bf16.msra.mxu0 %v4464_v21 }
 0x449   :  { %3746 = vmatprep.subr.bf16.mxu0 %v4226_v0 }
 0x44b   :  { %3735 = vmatmul.mubr.msk.bf16.vlgmr.msra.gmra.mrb[20].mxu0 %vm89_vm0, %v4389_v52 }
 0x44c   :  { %3747 = vmatpush3.bf16.msra.mxu0 %v4429_v12  ;;  %3748 = vmatprep.mubr.msk.bf16.mxu0 %vm4227_vm1, %v4226_v0 }
 0x44d   :  { %3758 = vmatprep.subr.bf16.mxu0 %v4226_v0 }
 0x516   :  { %v616_v24 = vpop.f32.mrb[16].mxu0 }
 0x517   :  { %v4482_v27 = vadd.f32 %v616_v24, %v4477_v22  ;;  %v3722_v30 = vpop.f32.mrb[17].mxu0 }
 0x518   :  { %v619_v52 = vpop.f32.mrb[18].mxu0 }
 0x519   :  { %v622_v33 = vmul.f32 0.5, %v4482_v27  ;;  %v3723_v35 = vpop.f32.mrb[19].mxu0 }
 0x51b   :  { %v623_v37 = vmul.f32 1.442695, %v622_v33 }
 0x51d   :  { %4064 = vpow2.f32 %v623_v37 }
 0x51e   :  { %v720_v41 = vpop.f32.mrb[20].mxu0 }
 0x51f   :  { %v721_v43 = vadd.f32 %v720_v41, %v4487_v39  ;;  %v3736_v45 = vpop.f32.mrb[21].mxu0 }
 0x520   :  { %v723_v46 = vpop.f32.mrb[22].mxu0 }
 0x521   :  { %734 = vrot.lane.b32.xlu1 %v721_v43, %s4233_s20  ;;  %v3737_v47 = vpop.f32.mrb[23].mxu0 }
 0x527   :  { %v4491_v50 = vpop.eup %4064 }
 0x528   :  { %v630_v54 = vmul.f32 %v4491_v50, %v628_v48 }
 0x52a   :  { %632 = vrot.lane.b32.xlu0 %v630_v54, %s4234_s21 }
 0x593   :  { %v735_v6 = vpop.permute.xlu1 %734 }
 0x59c   :  { %v633_v29 = vpop.permute.xlu0 %632 }
 0x59d   :  { %v4496_v32 = vadd.f32 %v633_v29, %v4482_v27 }
 0x59f   :  { %v636_v56 = vpack.c.bf16 %v4496_v32, %v4496_v32 }
 0x5a1   :  { %3727 = vmatmul.mubr.msk.bf16.vlgmr.msra.gmra.mrb[16].mxu1 %vm637_vm6, %v636_v56 }
 0x5a2   :  { %3739 = vmatpush3.bf16.msra.mxu1 %v4341_v25  ;;  %3742 = vmatprep.mubr.msk.bf16.mxu1 %vm4227_vm1, %v4226_v0 }
 0x5a3   :  { %3740 = vmatprep.subr.bf16.mxu1 %v4226_v0 }
 0x5a6   :  { %3741 = vmatpush3.bf16.msra.mxu1 %v4349_v28 }
 0x5a7   :  { %3752 = vmatprep.subr.bf16.mxu1 %v4226_v0 }
 0x674   :  { %v679_v63 = vpop.f32.mrb[16].mxu1 }
 0x675   :  { %v685_v2 = vadd.f32 %v679_v63, %v290_v61  ;;  %v3728_v4 = vpop.f32.mrb[17].mxu1 }
 0x676   :  { %v682_v7 = vpop.f32.mrb[18].mxu1 }
 0x677   :  { %v726_v8 = vadd.f32 %v721_v43, %v685_v2  ;;  %v3729_v14 = vpop.f32.mrb[19].mxu1 }
 0x679   :  { %v3439_v15 = vmul.f32 -1.442695, %v726_v8 }
 0x67b   :  { %4066 = vpow2.f32 %v3439_v15 }
 0x685   :  { %v4067_v16 = vpop.eup %4066 }
 0x686   :  { %v730_v17 = vadd.f32 1.0, %v4067_v16 }
 0x688   :  { %4068 = vrcp.f32 %v730_v17 }
 0x692   :  { %v4069_v18 = vpop.eup %4068 }
 0x693   :  { %v737_v23 = vmul.f32 %v4069_v18, %v735_v6  ;;  %v744_v52 = vsub.f32 1.0, %v4069_v18 }
 0x695   :  { %739 = vrot.lane.b32.xlu0 %v737_v23, %s4233_s20 }
 0x699   :  { %751 = vrot.lane.b32.xlu0 %v4381_v49, %s4229_s16 }
 0x707   :  { %v740_v55 = vpop.permute.xlu0 %739 }
 0x708   :  { %v742_v58 = vadd.f32 %v740_v55, %v685_v2 }
 0x70a   :  { %4070 = vtanh.f32 %v742_v58 }
 0x70b   :  { %v752_v30 = vpop.permute.xlu0 %751 }
 0x70c   :  { %v754_v35 = vmul.f32 %v4069_v18, %v752_v30 }
 0x714   :  { %v4071_v24 = vpop.eup %4070 }
 0x715   :  { %746 = vrot.lane.b32.xlu1 %v4071_v24, %s4228_s1 }
 0x787   :  { %v747_v33 = vpop.permute.xlu1 %746 }
 0x788   :  { %v749_v37 = vmul.f32 %v747_v33, %v744_v52 }
 0x78a   :  { %v755_v41 = vadd.f32 %v754_v35, %v749_v37 }
 0x78c   :  { %v4513_v43 = vclamps-f32 %v755_v41, 5.0 }
 0x78e   :  { %v758_v45 = vpack.c.bf16 %v4513_v43, %v4513_v43 }
 0x790   :  { %760 = vrot.lane.b32.xlu1 %v758_v45, %s4228_s1 }
 0x802   :  { %v761_v49 = vpop.permute.xlu1 %760 }
 0x803   :  { %3743 = vmatmul.mubr.msk.bf16.vlgmr.msra.gmra.mrb[20].mxu1 %vm89_vm0, %v761_v49 }
 0x804   :  { %3753 = vmatpush3.bf16.msra.mxu1 %v4383_v51  ;;  %3754 = vmatprep.mubr.msk.bf16.mxu1 %vm4227_vm1, %v4226_v0 }
 0x805   :  { %3764 = vmatprep.subr.bf16.mxu1 %v4226_v0 }
 0x80b   :  { %3755 = vmatmul.mubr.msk.bf16.vlgmr.msra.gmra.mrb[24].mxu1 %vm499_vm3, %v4459_v20 }
 0x80c   :  { %3765 = vmatpush3.bf16.msra.mxu1 %v4479_v26  ;;  %3766 = vmatprep.mubr.msk.bf16.mxu1 %vm4227_vm1, %v4226_v0 }
 0x80d   :  { %3778 = vmatprep.subr.bf16.mxu1 %v4226_v0 }
 0x8d6   :  { %v4529_v46 = vpop.f32.mrb[20].mxu1 }
 0x8d7   :  { %v840_v47 = vpack.c.bf16 %v4529_v46, %v4529_v46  ;;  %v3744_v48 = vpop.f32.mrb[21].mxu1 }
 0x8d8   :  { %v802_v54 = vpop.f32.mrb[22].mxu1 }
 0x8d9   :  { %v3745_v29 = vpop.f32.mrb[23].mxu1  ;;  %3749 = vmatmul.mubr.msk.bf16.vlgmr.msra.gmra.mrb[24].mxu0 %vm329_vm2, %v840_v47 }
 0x8da   :  { %3759 = vmatpush3.bf16.msra.mxu0 %v4444_v59  ;;  %3760 = vmatprep.mubr.msk.bf16.mxu0 %vm4227_vm1, %v4226_v0 }
 0x8db   :  { %3770 = vmatprep.subr.bf16.mxu0 %v4226_v0 }
 0x8de   :  { %v919_v20 = vpop.f32.mrb[24].mxu1 }
 0x8df   :  { %v920_v56 = vadd.f32 %v919_v20, %v4436_v19  ;;  %v3756_v61 = vpop.f32.mrb[25].mxu1 }
 0x8e0   :  { %v922_v63 = vpop.f32.mrb[26].mxu1 }
 0x8e1   :  { %933 = vrot.lane.b32.xlu0 %v920_v56, %s4228_s1  ;;  %v3757_v2 = vpop.f32.mrb[27].mxu1 }
 0x953   :  { %v934_v55 = vpop.permute.xlu0 %933 }
 0x9ac   :  { %v878_v4 = vpop.f32.mrb[24].mxu0 }
 0x9ad   :  { %v884_v7 = vadd.f32 %v878_v4, %v4359_v31  ;;  %v3750_v8 = vpop.f32.mrb[25].mxu0 }
 0x9ae   :  { %v881_v14 = vpop.f32.mrb[26].mxu0 }
 0x9af   :  { %v925_v15 = vadd.f32 %v920_v56, %v884_v7  ;;  %v3751_v16 = vpop.f32.mrb[27].mxu0 }
 0x9b1   :  { %v3444_v17 = vmul.f32 -1.442695, %v925_v15 }
 0x9b3   :  { %4072 = vpow2.f32 %v3444_v17 }
 0x9bd   :  { %v4073_v18 = vpop.eup %4072 }
 0x9be   :  { %v929_v6 = vadd.f32 1.0, %v4073_v18 }
 0x9c0   :  { %4074 = vrcp.f32 %v929_v6 }
 0x9ca   :  { %v4075_v23 = vpop.eup %4074 }
 0x9cb   :  { %v936_v58 = vmul.f32 %v4075_v23, %v934_v55  ;;  %v943_v31 = vsub.f32 1.0, %v4075_v23  ;;  %v949_v35 = vmul.f32 %v4075_v23, %v4450_v10 }
 0x9cd   :  { %938 = vrot.lane.b32.xlu1 %v936_v58, %s4229_s16 }
 0xa3f   :  { %v939_v24 = vpop.permute.xlu1 %938 }
 0xa40   :  { %v941_v30 = vadd.f32 %v939_v24, %v884_v7 }
 0xa42   :  { %4076 = vtanh.f32 %v941_v30 }
 0xa4c   :  { %v4077_v52 = vpop.eup %4076 }
 0xa4d   :  { %945 = vrot.lane.b32.xlu0 %v4077_v52, %s4230_s17 }
 0xa51   :  { %1005 = vrot.lane.b32.xlu0 %v4295_v11, %s4232_s19 }
 0xabf   :  { %v946_v33 = vpop.permute.xlu0 %945 }
 0xac0   :  { %v948_v37 = vmul.f32 %v946_v33, %v943_v31 }
 0xac2   :  { %v950_v41 = vadd.f32 %v949_v35, %v948_v37 }
 0xac3   :  { %v1006_v14 = vpop.permute.xlu0 %1005 }
 0xac4   :  { %v4546_v45 = vclamps-f32 %v950_v41, 5.0 }
 0xac6   :  { %v953_v47 = vpack.c.bf16 %v4546_v45, %v4546_v45 }
 0xac8   :  { %955 = vrot.lane.b32.xlu1 %v953_v47, %s4230_s17 }
 0xb3a   :  { %v4551_v48 = vpop.permute.xlu1 %955 }
 0xb3b   :  { %3761 = vmatmul.mubr.msk.bf16.vlgmr.msra.gmra.mrb[28].mxu0 %vm499_vm3, %v4551_v48 }
 0xb3c   :  { %3771 = vmatpush3.bf16.msra.mxu0 %v4457_v53  ;;  %3774 = vmatprep.mubr.msk.bf16.mxu0 %vm4227_vm1, %v4226_v0 }
 0xb3d   :  { %3772 = vmatprep.subr.bf16.mxu0 %v4226_v0 }
 0xb40   :  { %3773 = vmatpush3.bf16.msra.mxu0 %v4464_v21 }
 0xb41   :  { %3786 = vmatprep.subr.bf16.mxu0 %v4226_v0 }
 0xb43   :  { %3775 = vmatmul.mubr.msk.bf16.vlgmr.msra.gmra.mrb[32].mxu0 %vm89_vm0, %v761_v49 }
 0xb44   :  { %3787 = vmatpush3.bf16.msra.mxu0 %v4429_v12  ;;  %3788 = vmatprep.mubr.msk.bf16.mxu0 %vm4227_vm1, %v4226_v0 }
 0xb45   :  { %3798 = vmatprep.subr.bf16.mxu0 %v4226_v0 }
 0xc0e   :  { %v994_v11 = vpop.f32.mrb[28].mxu0 }
 0xc0f   :  { %v4567_v54 = vadd.f32 %v994_v11, %v4477_v22  ;;  %v3762_v29 = vpop.f32.mrb[29].mxu0 }
 0xc10   :  { %v997_v20 = vpop.f32.mrb[30].mxu0 }
 0xc11   :  { %v1000_v56 = vmul.f32 0.5, %v4567_v54  ;;  %v3763_v61 = vpop.f32.mrb[31].mxu0 }
 0xc13   :  { %v1001_v63 = vmul.f32 1.442695, %v1000_v56 }
 0xc15   :  { %4078 = vpow2.f32 %v1001_v63 }
 0xc16   :  { %v1093_v2 = vpop.f32.mrb[32].mxu0 }
 0xc17   :  { %v1094_v49 = vadd.f32 %v1093_v2, %v4487_v39  ;;  %v3776_v4 = vpop.f32.mrb[33].mxu0 }
 0xc18   :  { %v1096_v7 = vpop.f32.mrb[34].mxu0 }
 0xc19   :  { %1107 = vrot.lane.b32.xlu0 %v1094_v49, %s4233_s20  ;;  %v3777_v8 = vpop.f32.mrb[35].mxu0 }
 0xc1f   :  { %v4572_v15 = vpop.eup %4078 }
 0xc20   :  { %v1008_v16 = vmul.f32 %v4572_v15, %v1006_v14 }
 0xc22   :  { %1010 = vrot.lane.b32.xlu1 %v1008_v16, %s4234_s21 }
 0xc8b   :  { %v1108_v41 = vpop.permute.xlu0 %1107 }
 0xc94   :  { %v1011_v17 = vpop.permute.xlu1 %1010 }
 0xc95   :  { %v4577_v18 = vadd.f32 %v1011_v17, %v4567_v54 }
 0xc97   :  { %v1014_v6 = vpack.c.bf16 %v4577_v18, %v4577_v18 }
 0xc99   :  { %3767 = vmatmul.mubr.msk.bf16.vlgmr.msra.gmra.mrb[28].mxu1 %vm637_vm6, %v1014_v6 }
 0xc9a   :  { %3779 = vmatpush3.bf16.msra.mxu1 %v4341_v25  ;;  %3782 = vmatprep.mubr.msk.bf16.mxu1 %vm4227_vm1, %v4226_v0 }
 0xc9b   :  { %3780 = vmatprep.subr.bf16.mxu1 %v4226_v0 }
 0xc9e   :  { %3781 = vmatpush3.bf16.msra.mxu1 %v4349_v28 }
 0xc9f   :  { %3792 = vmatprep.subr.bf16.mxu1 %v4226_v0 }
 0xd6c   :  { %v1052_v23 = vpop.f32.mrb[28].mxu1 }
 0xd6d   :  { %v1058_v55 = vadd.f32 %v1052_v23, %v4407_v57  ;;  %v3768_v58 = vpop.f32.mrb[29].mxu1 }
 0xd6e   :  { %v1055_v24 = vpop.f32.mrb[30].mxu1 }
 0xd6f   :  { %v1099_v30 = vadd.f32 %v1094_v49, %v1058_v55  ;;  %v3769_v52 = vpop.f32.mrb[31].mxu1 }
 0xd71   :  { %v3449_v31 = vmul.f32 -1.442695, %v1099_v30 }
 0xd73   :  { %4080 = vpow2.f32 %v3449_v31 }
 0xd7d   :  { %v4081_v33 = vpop.eup %4080 }
 0xd7e   :  { %v1103_v35 = vadd.f32 1.0, %v4081_v33 }
 0xd80   :  { %4082 = vrcp.f32 %v1103_v35 }
 0xd8a   :  { %v4083_v37 = vpop.eup %4082 }
 0xd8b   :  { %v1110_v47 = vmul.f32 %v4083_v37, %v1108_v41  ;;  %v1117_v57 = vsub.f32 1.0, %v4083_v37  ;;  %v1123_v61 = vmul.f32 %v4083_v37, %v4513_v43 }
 0xd8d   :  { %1112 = vrot.lane.b32.xlu1 %v1110_v47, %s4233_s20 }
 0xdff   :  { %v1113_v11 = vpop.permute.xlu1 %1112 }
 0xe00   :  { %v1115_v29 = vadd.f32 %v1113_v11, %v1058_v55 }
 0xe02   :  { %4084 = vtanh.f32 %v1115_v29 }
 0xe0c   :  { %v4085_v20 = vpop.eup %4084 }
 0xe0d   :  { %1119 = vrot.lane.b32.xlu0 %v4085_v20, %s4228_s1 }
 0xe7f   :  { %v1120_v56 = vpop.permute.xlu0 %1119 }
 0xe80   :  { %v1122_v63 = vmul.f32 %v1120_v56, %v1117_v57 }
 0xe82   :  { %v1124_v2 = vadd.f32 %v1123_v61, %v1122_v63 }
 0xe84   :  { %v4592_v49 = vclamps-f32 %v1124_v2, 5.0 }
 0xe86   :  { %v1127_v4 = vpack.c.bf16 %v4592_v49, %v4592_v49 }
 0xe88   :  { %1129 = vrot.lane.b32.xlu1 %v1127_v4, %s4228_s1 }
 0xefa   :  { %v1130_v7 = vpop.permute.xlu1 %1129 }
 0xefb   :  { %3783 = vmatmul.mubr.msk.bf16.vlgmr.msra.gmra.mrb[32].mxu1 %vm89_vm0, %v1130_v7 }
 0xefc   :  { %3793 = vmatpush3.bf16.msra.mxu1 %v4383_v51  ;;  %3794 = vmatprep.mubr.msk.bf16.mxu1 %vm4227_vm1, %v4226_v0 }
 0xefd   :  { %3804 = vmatprep.subr.bf16.mxu1 %v4226_v0 }
 0xf03   :  { %3795 = vmatmul.mubr.msk.bf16.vlgmr.msra.gmra.mrb[36].mxu1 %vm499_vm3, %v4551_v48 }
 0xf04   :  { %3805 = vmatpush3.bf16.msra.mxu1 %v4479_v26  ;;  %3806 = vmatprep.mubr.msk.bf16.mxu1 %vm4227_vm1, %v4226_v0 }
 0xf05   :  { %3818 = vmatprep.subr.bf16.mxu1 %v4226_v0 }
 0xfce   :  { %v4608_v8 = vpop.f32.mrb[32].mxu1 }
 0xfcf   :  { %v1205_v14 = vpack.c.bf16 %v4608_v8, %v4608_v8  ;;  %v3784_v16 = vpop.f32.mrb[33].mxu1 }
 0xfd0   :  { %v1171_v17 = vpop.f32.mrb[34].mxu1 }
 0xfd1   :  { %v3785_v6 = vpop.f32.mrb[35].mxu1  ;;  %3789 = vmatmul.mubr.msk.bf16.vlgmr.msra.gmra.mrb[36].mxu0 %vm329_vm2, %v1205_v14 }
 0xfd2   :  { %3799 = vmatpush3.bf16.msra.mxu0 %v4444_v59  ;;  %3800 = vmatprep.mubr.msk.bf16.mxu0 %vm4227_vm1, %v4226_v0 }
 0xfd3   :  { %3810 = vmatprep.subr.bf16.mxu0 %v4226_v0 }
 0xfd6   :  { %v1284_v48 = vpop.f32.mrb[36].mxu1 }
 0xfd7   :  { %v1285_v23 = vadd.f32 %v1284_v48, %v4436_v19  ;;  %v3796_v55 = vpop.f32.mrb[37].mxu1 }
 0xfd8   :  { %v1287_v58 = vpop.f32.mrb[38].mxu1 }
 0xfd9   :  { %1298 = vrot.lane.b32.xlu0 %v1285_v23, %s4228_s1  ;;  %v3797_v24 = vpop.f32.mrb[39].mxu1 }
0x104b   :  { %v1299_v20 = vpop.permute.xlu0 %1298 }
0x10a4   :  { %v1243_v30 = vpop.f32.mrb[36].mxu0 }
0x10a5   :  { %v1249_v52 = vadd.f32 %v1243_v30, %v4367_v36  ;;  %v3790_v31 = vpop.f32.mrb[37].mxu0 }
0x10a6   :  { %v1246_v33 = vpop.f32.mrb[38].mxu0 }
0x10a7   :  { %v1290_v35 = vadd.f32 %v1285_v23, %v1249_v52  ;;  %v3791_v37 = vpop.f32.mrb[39].mxu0 }
0x10a9   :  { %v3454_v41 = vmul.f32 -1.442695, %v1290_v35 }
0x10ab   :  { %4086 = vpow2.f32 %v3454_v41 }
0x10b5   :  { %v4087_v47 = vpop.eup %4086 }
0x10b6   :  { %v1294_v11 = vadd.f32 1.0, %v4087_v47 }
0x10b8   :  { %4088 = vrcp.f32 %v1294_v11 }
0x10c2   :  { %v4089_v29 = vpop.eup %4088 }
0x10c3   :  { %v1301_v57 = vmul.f32 %v4089_v29, %v1299_v20  ;;  %v1308_v36 = vsub.f32 1.0, %v4089_v29  ;;  %v1314_v4 = vmul.f32 %v4089_v29, %v4546_v45 }
0x10c5   :  { %1303 = vrot.lane.b32.xlu1 %v1301_v57, %s4229_s16 }
0x1137   :  { %v1304_v56 = vpop.permute.xlu1 %1303 }
0x1138   :  { %v1306_v61 = vadd.f32 %v1304_v56, %v1249_v52 }
0x113a   :  { %4090 = vtanh.f32 %v1306_v61 }
0x1144   :  { %v4091_v63 = vpop.eup %4090 }
0x1145   :  { %1310 = vrot.lane.b32.xlu0 %v4091_v63, %s4230_s17 }
0x1149   :  { %1370 = vrot.lane.b32.xlu0 %v4301_v13, %s4232_s19 }
0x11b7   :  { %v1311_v2 = vpop.permute.xlu0 %1310 }
0x11b8   :  { %v1313_v14 = vmul.f32 %v1311_v2, %v1308_v36 }
0x11ba   :  { %v1315_v16 = vadd.f32 %v1314_v4, %v1313_v14 }
0x11bb   :  { %v1371_v41 = vpop.permute.xlu0 %1370 }
0x11bc   :  { %v4625_v17 = vclamps-f32 %v1315_v16, 5.0 }
0x11be   :  { %v1318_v6 = vpack.c.bf16 %v4625_v17, %v4625_v17 }
0x11c0   :  { %1320 = vrot.lane.b32.xlu1 %v1318_v6, %s4230_s17 }
0x1232   :  { %v4630_v48 = vpop.permute.xlu1 %1320 }
0x1233   :  { %3801 = vmatmul.mubr.msk.bf16.vlgmr.msra.gmra.mrb[40].mxu0 %vm499_vm3, %v4630_v48 }
0x1234   :  { %3811 = vmatpush3.bf16.msra.mxu0 %v4457_v53  ;;  %3814 = vmatprep.mubr.msk.bf16.mxu0 %vm4227_vm1, %v4226_v0 }
0x1235   :  { %3812 = vmatprep.subr.bf16.mxu0 %v4226_v0 }
0x1238   :  { %3813 = vmatpush3.bf16.msra.mxu0 %v4464_v21 }
0x1239   :  { %3826 = vmatprep.subr.bf16.mxu0 %v4226_v0 }
0x123b   :  { %3815 = vmatmul.mubr.msk.bf16.vlgmr.msra.gmra.mrb[44].mxu0 %vm89_vm0, %v1130_v7 }
0x123c   :  { %3827 = vmatpush3.bf16.msra.mxu0 %v4429_v12  ;;  %3828 = vmatprep.mubr.msk.bf16.mxu0 %vm4227_vm1, %v4226_v0 }
0x123d   :  { %3838 = vmatprep.subr.bf16.mxu0 %v4226_v0 }
0x1306   :  { %v1359_v13 = vpop.f32.mrb[40].mxu0 }
0x1307   :  { %v4646_v23 = vadd.f32 %v1359_v13, %v4477_v22  ;;  %v3802_v55 = vpop.f32.mrb[41].mxu0 }
0x1308   :  { %v1362_v58 = vpop.f32.mrb[42].mxu0 }
0x1309   :  { %v1365_v24 = vmul.f32 0.5, %v4646_v23  ;;  %v3803_v30 = vpop.f32.mrb[43].mxu0 }
0x130b   :  { %v1366_v52 = vmul.f32 1.442695, %v1365_v24 }
0x130d   :  { %4092 = vpow2.f32 %v1366_v52 }
0x130e   :  { %v1458_v31 = vpop.f32.mrb[44].mxu0 }
0x130f   :  { %v1459_v7 = vadd.f32 %v1458_v31, %v4487_v39  ;;  %v3816_v33 = vpop.f32.mrb[45].mxu0 }
0x1310   :  { %v1461_v35 = vpop.f32.mrb[46].mxu0 }
0x1311   :  { %1472 = vrot.lane.b32.xlu0 %v1459_v7, %s4233_s20  ;;  %v3817_v37 = vpop.f32.mrb[47].mxu0 }
0x1317   :  { %v4651_v47 = vpop.eup %4092 }
0x1318   :  { %v1373_v11 = vmul.f32 %v4651_v47, %v1371_v41 }
0x131a   :  { %1375 = vrot.lane.b32.xlu1 %v1373_v11, %s4234_s21  ;;  %v4678_v11 = vld [vmem:[#allocation5] sm:$0xff] }
0x1383   :  { %v1473_v55 = vpop.permute.xlu0 %1472 }
0x138c   :  { %v1376_v29 = vpop.permute.xlu1 %1375 }
0x138d   :  { %v4656_v20 = vadd.f32 %v1376_v29, %v4646_v23 }
0x138f   :  { %v1379_v57 = vpack.c.bf16 %v4656_v20, %v4656_v20 }
0x1391   :  { %3807 = vmatmul.mubr.msk.bf16.vlgmr.msra.gmra.mrb[40].mxu1 %vm637_vm6, %v1379_v57 }
0x1392   :  { %3819 = vmatpush3.bf16.msra.mxu1 %v4341_v25  ;;  %3822 = vmatprep.mubr.msk.bf16.mxu1 %vm4227_vm1, %v4226_v0 }
0x1393   :  { %3820 = vmatprep.subr.bf16.mxu1 %v4226_v0 }
0x1396   :  { %3821 = vmatpush3.bf16.msra.mxu1 %v4349_v28 }
0x1397   :  { %3832 = vmatprep.subr.bf16.mxu1 %v4226_v0 }
0x1464   :  { %v1417_v56 = vpop.f32.mrb[40].mxu1 }
0x1465   :  { %v1423_v61 = vadd.f32 %v1417_v56, %v4415_v62  ;;  %v3808_v63 = vpop.f32.mrb[41].mxu1 }
0x1466   :  { %v1420_v36 = vpop.f32.mrb[42].mxu1 }
0x1467   :  { %v1464_v2 = vadd.f32 %v1459_v7, %v1423_v61  ;;  %v3809_v4 = vpop.f32.mrb[43].mxu1 }
0x1469   :  { %v3459_v14 = vmul.f32 -1.442695, %v1464_v2 }
0x146b   :  { %4094 = vpow2.f32 %v3459_v14 }
0x1475   :  { %v4095_v16 = vpop.eup %4094 }
0x1476   :  { %v1468_v6 = vadd.f32 1.0, %v4095_v16 }
0x1478   :  { %4096 = vrcp.f32 %v1468_v6 }
0x1482   :  { %v4097_v13 = vpop.eup %4096 }
0x1483   :  { %v1475_v58 = vmul.f32 %v4097_v13, %v1473_v55  ;;  %v1482_v62 = vsub.f32 1.0, %v4097_v13  ;;  %v1488_v31 = vmul.f32 %v4097_v13, %v4592_v49 }
0x1485   :  { %1477 = vrot.lane.b32.xlu1 %v1475_v58, %s4233_s20 }
0x14f7   :  { %v1478_v24 = vpop.permute.xlu1 %1477 }
0x14f8   :  { %v1480_v30 = vadd.f32 %v1478_v24, %v1423_v61 }
0x14fa   :  { %4098 = vtanh.f32 %v1480_v30 }
0x1504   :  { %v4099_v0 = vpop.eup %4098 }
0x1505   :  { %1484 = vrot.lane.b32.xlu0 %v4099_v0, %s4228_s1 }
0x1577   :  { %v1485_v52 = vpop.permute.xlu0 %1484 }
0x1578   :  { %v1487_v7 = vmul.f32 %v1485_v52, %v1482_v62 }
0x157a   :  { %v1489_v33 = vadd.f32 %v1488_v31, %v1487_v7 }
0x157c   :  { %v4671_v35 = vclamps-f32 %v1489_v33, 5.0 }
0x157e   :  { %v1492_v37 = vpack.c.bf16 %v4671_v35, %v4671_v35 }
0x1580   :  { %1494 = vrot.lane.b32.xlu1 %v1492_v37, %s4228_s1 }
0x15f2   :  { %v1495_v41 = vpop.permute.xlu1 %1494 }
0x15f3   :  { %3823 = vmatmul.mubr.msk.bf16.vlgmr.msra.gmra.mrb[44].mxu1 %vm89_vm0, %v1495_v41 }
0x15f4   :  { %3833 = vmatpush3.bf16.msra.mxu1 %v4383_v51  ;;  %3834 = vmatprep.mubr.msk.bf16.mxu1 %vm4227_vm1, %v4678_v11 }
0x15f5   :  { %3844 = vmatprep.subr.bf16.mxu1 %v4678_v11 }
0x15fb   :  { %3835 = vmatmul.mubr.msk.bf16.vlgmr.msra.gmra.mrb[48].mxu1 %vm499_vm3, %v4630_v48 }
0x15fc   :  { %3845 = vmatpush3.bf16.msra.mxu1 %v4479_v26  ;;  %3846 = vmatprep.mubr.msk.bf16.mxu1 %vm4227_vm1, %v4678_v11 }
0x15fd   :  { %3858 = vmatprep.subr.bf16.mxu1 %v4678_v11 }
0x16c6   :  { %v4689_v29 = vpop.f32.mrb[44].mxu1 }
0x16c7   :  { %v1570_v57 = vpack.c.bf16 %v4689_v29, %v4689_v29  ;;  %v3824_v56 = vpop.f32.mrb[45].mxu1 }
0x16c8   :  { %v1536_v61 = vpop.f32.mrb[46].mxu1 }
0x16c9   :  { %v3825_v63 = vpop.f32.mrb[47].mxu1  ;;  %3829 = vmatmul.mubr.msk.bf16.vlgmr.msra.gmra.mrb[48].mxu0 %vm329_vm2, %v1570_v57 }
0x16ca   :  { %3839 = vmatpush3.bf16.msra.mxu0 %v4444_v59  ;;  %3840 = vmatprep.mubr.msk.bf16.mxu0 %vm4227_vm1, %v4678_v11 }
0x16cb   :  { %3850 = vmatprep.subr.bf16.mxu0 %v4678_v11 }
0x16ce   :  { %v1649_v48 = vpop.f32.mrb[48].mxu1 }
0x16cf   :  { %v1650_v36 = vadd.f32 %v1649_v48, %v4436_v19  ;;  %v3836_v2 = vpop.f32.mrb[49].mxu1  ;;  %v1733_v48 = vld [vmem:[%s5245_s0 + $0x18] sm:$0xff] }
0x16d0   :  { %v1652_v4 = vpop.f32.mrb[50].mxu1 }
0x16d1   :  { %1663 = vrot.lane.b32.xlu0 %v1650_v36, %s4228_s1  ;;  %v3837_v14 = vpop.f32.mrb[51].mxu1 }
0x1743   :  { %v1664_v31 = vpop.permute.xlu0 %1663 }
0x179c   :  { %v1608_v16 = vpop.f32.mrb[48].mxu0 }
0x179d   :  { %v1614_v6 = vadd.f32 %v1608_v16, %v4364_v34  ;;  %v3830_v13 = vpop.f32.mrb[49].mxu0 }
0x179e   :  { %v1611_v55 = vpop.f32.mrb[50].mxu0 }
0x179f   :  { %v1655_v58 = vadd.f32 %v1650_v36, %v1614_v6  ;;  %v3831_v24 = vpop.f32.mrb[51].mxu0 }
0x17a1   :  { %v3464_v30 = vmul.f32 -1.442695, %v1655_v58 }
0x17a3   :  { %4100 = vpow2.f32 %v3464_v30 }
0x17ad   :  { %v4101_v0 = vpop.eup %4100 }
0x17ae   :  { %v1659_v62 = vadd.f32 1.0, %v4101_v0 }
0x17b0   :  { %4102 = vrcp.f32 %v1659_v62 }
0x17ba   :  { %v4103_v52 = vpop.eup %4102 }
0x17bb   :  { %v1666_v19 = vmul.f32 %v4103_v52, %v1664_v31  ;;  %v1673_v34 = vsub.f32 1.0, %v4103_v52  ;;  %v1679_v56 = vmul.f32 %v4103_v52, %v4625_v17 }
0x17bd   :  { %1668 = vrot.lane.b32.xlu1 %v1666_v19, %s4229_s16 }
0x182f   :  { %v1669_v7 = vpop.permute.xlu1 %1668 }
0x1830   :  { %v1671_v33 = vadd.f32 %v1669_v7, %v1614_v6 }
0x1832   :  { %4104 = vtanh.f32 %v1671_v33 }
0x183c   :  { %v4105_v37 = vpop.eup %4104 }
0x183d   :  { %1675 = vrot.lane.b32.xlu0 %v4105_v37, %s4230_s17 }
0x1841   :  { %1735 = vrot.lane.b32.xlu0 %v1733_v48, %s4232_s19 }
0x18af   :  { %v1676_v57 = vpop.permute.xlu0 %1675 }
0x18b0   :  { %v1678_v61 = vmul.f32 %v1676_v57, %v1673_v34 }
0x18b2   :  { %v1680_v63 = vadd.f32 %v1679_v56, %v1678_v61 }
0x18b3   :  { %v1736_v31 = vpop.permute.xlu0 %1735 }
0x18b4   :  { %v4707_v36 = vclamps-f32 %v1680_v63, 5.0 }
0x18b6   :  { %v1683_v2 = vpack.c.bf16 %v4707_v36, %v4707_v36 }
0x18b8   :  { %1685 = vrot.lane.b32.xlu1 %v1683_v2, %s4230_s17 }
0x192a   :  { %v4713_v4 = vpop.permute.xlu1 %1685 }
0x192b   :  { %3841 = vmatmul.mubr.msk.bf16.vlgmr.msra.gmra.mrb[52].mxu0 %vm499_vm3, %v4713_v4 }
0x192c   :  { %3851 = vmatpush3.bf16.msra.mxu0 %v4457_v53  ;;  %3854 = vmatprep.mubr.msk.bf16.mxu0 %vm4227_vm1, %v4678_v11 }
0x192d   :  { %3852 = vmatprep.subr.bf16.mxu0 %v4678_v11 }
0x1930   :  { %3853 = vmatpush3.bf16.msra.mxu0 %v4464_v21 }
0x1931   :  { %3866 = vmatprep.subr.bf16.mxu0 %v4678_v11 }
0x1933   :  { %3855 = vmatmul.mubr.msk.bf16.vlgmr.msra.gmra.mrb[56].mxu0 %vm89_vm0, %v1495_v41 }
0x1934   :  { %3867 = vmatpush3.bf16.msra.mxu0 %v4429_v12  ;;  %3868 = vmatprep.mubr.msk.bf16.mxu0 %vm4227_vm1, %v4678_v11 }
0x1935   :  { %3878 = vmatprep.subr.bf16.mxu0 %v4678_v11 }
0x19fe   :  { %v1724_v14 = vpop.f32.mrb[52].mxu0 }
0x19ff   :  { %v4729_v16 = vadd.f32 %v1724_v14, %v4477_v22  ;;  %v3842_v6 = vpop.f32.mrb[53].mxu0 }
0x1a00   :  { %v1727_v13 = vpop.f32.mrb[54].mxu0 }
0x1a01   :  { %v1730_v55 = vmul.f32 0.5, %v4729_v16  ;;  %v3843_v58 = vpop.f32.mrb[55].mxu0 }
0x1a03   :  { %v1731_v24 = vmul.f32 1.442695, %v1730_v55 }
0x1a05   :  { %4106 = vpow2.f32 %v1731_v24 }
0x1a06   :  { %v1823_v30 = vpop.f32.mrb[56].mxu0 }
0x1a07   :  { %v1824_v41 = vadd.f32 %v1823_v30, %v4487_v39  ;;  %v3856_v0 = vpop.f32.mrb[57].mxu0 }
0x1a08   :  { %v1826_v62 = vpop.f32.mrb[58].mxu0 }
0x1a09   :  { %1837 = vrot.lane.b32.xlu0 %v1824_v41, %s4233_s20  ;;  %v3857_v52 = vpop.f32.mrb[59].mxu0 }
0x1a0f   :  { %v4734_v19 = vpop.eup %4106 }
0x1a10   :  { %5256 = vst [vmem:[#allocation8_spill] sm:$0xff] %v4734_v19  ;;  %v1738_v7 = vmul.f32 %v4734_v19, %v1736_v31 }
0x1a12   :  { %1740 = vrot.lane.b32.xlu1 %v1738_v7, %s4234_s21 }
0x1a7b   :  { %v1838_v58 = vpop.permute.xlu0 %1837 }
0x1a84   :  { %v1741_v33 = vpop.permute.xlu1 %1740 }
0x1a85   :  { %v4739_v37 = vadd.f32 %v1741_v33, %v4729_v16 }
0x1a87   :  { %5257 = vst [vmem:[#allocation9_spill] sm:$0xff] %v4739_v37  ;;  %v1744_v34 = vpack.c.bf16 %v4739_v37, %v4739_v37 }
0x1a89   :  { %3847 = vmatmul.mubr.msk.bf16.vlgmr.msra.gmra.mrb[52].mxu1 %vm637_vm6, %v1744_v34 }
0x1a8a   :  { %3859 = vmatpush3.bf16.msra.mxu1 %v4341_v25  ;;  %3862 = vmatprep.mubr.msk.bf16.mxu1 %vm4227_vm1, %v4678_v11 }
0x1a8b   :  { %3860 = vmatprep.subr.bf16.mxu1 %v4678_v11 }
0x1a8e   :  { %3861 = vmatpush3.bf16.msra.mxu1 %v4349_v28 }
0x1a8f   :  { %3872 = vmatprep.subr.bf16.mxu1 %v4678_v11 }
0x1b5c   :  { %v1782_v57 = vpop.f32.mrb[52].mxu1 }
0x1b5d   :  { %v1788_v56 = vadd.f32 %v1782_v57, %v4412_v60  ;;  %v3848_v61 = vpop.f32.mrb[53].mxu1 }
0x1b5e   :  { %v1785_v63 = vpop.f32.mrb[54].mxu1 }
0x1b5f   :  { %v1829_v48 = vadd.f32 %v1824_v41, %v1788_v56  ;;  %v3849_v2 = vpop.f32.mrb[55].mxu1 }
0x1b61   :  { %v3469_v14 = vmul.f32 -1.442695, %v1829_v48 }
0x1b63   :  { %4108 = vpow2.f32 %v3469_v14  ;;  %v4779_v14 = vld [vmem:[#allocation2 + $0xc0] sm:$0xff] }
0x1b6d   :  { %v4109_v6 = vpop.eup %4108 }
0x1b6e   :  { %v1833_v13 = vadd.f32 1.0, %v4109_v6 }
0x1b70   :  { %4110 = vrcp.f32 %v1833_v13 }
0x1b7a   :  { %v4111_v55 = vpop.eup %4110 }
0x1b7b   :  { %v1840_v24 = vmul.f32 %v4111_v55, %v1838_v58  ;;  %v1847_v60 = vsub.f32 1.0, %v4111_v55  ;;  %v1853_v41 = vmul.f32 %v4111_v55, %v4671_v35 }
0x1b7d   :  { %1842 = vrot.lane.b32.xlu1 %v1840_v24, %s4233_s20 }
0x1bef   :  { %v1843_v30 = vpop.permute.xlu1 %1842 }
0x1bf0   :  { %v1845_v0 = vadd.f32 %v1843_v30, %v1788_v56 }
0x1bf2   :  { %4112 = vtanh.f32 %v1845_v0 }
0x1bfc   :  { %v4113_v62 = vpop.eup %4112 }
0x1bfd   :  { %1849 = vrot.lane.b32.xlu0 %v4113_v62, %s4228_s1 }
0x1c6f   :  { %v1850_v52 = vpop.permute.xlu0 %1849 }
0x1c70   :  { %v1852_v31 = vmul.f32 %v1850_v52, %v1847_v60 }
0x1c72   :  { %v1854_v7 = vadd.f32 %v1853_v41, %v1852_v31 }
0x1c74   :  { %v4754_v33 = vclamps-f32 %v1854_v7, 5.0 }
0x1c76   :  { %v1857_v34 = vpack.c.bf16 %v4754_v33, %v4754_v33 }
0x1c78   :  { %1859 = vrot.lane.b32.xlu1 %v1857_v34, %s4228_s1 }
0x1cea   :  { %v1860_v57 = vpop.permute.xlu1 %1859 }
0x1ceb   :  { %3863 = vmatmul.mubr.msk.bf16.vlgmr.msra.gmra.mrb[56].mxu1 %vm89_vm0, %v1860_v57 }
0x1cec   :  { %3873 = vmatpush3.bf16.msra.mxu1 %v4383_v51  ;;  %3874 = vmatprep.mubr.msk.bf16.mxu1 %vm4227_vm1, %v4678_v11 }
0x1ced   :  { %3884 = vmatprep.subr.bf16.mxu1 %v4678_v11 }
0x1cf3   :  { %3875 = vmatmul.mubr.msk.bf16.vlgmr.msra.gmra.mrb[60].mxu1 %vm499_vm3, %v4713_v4 }
0x1cf4   :  { %3885 = vmatpush3.bf16.msra.mxu1 %v4479_v26  ;;  %3886 = vmatprep.mubr.msk.bf16.mxu1 %vm4227_vm1, %v4678_v11 }
0x1cf5   :  { %3898 = vmatprep.subr.bf16.mxu1 %v4678_v11 }
0x1dbe   :  { %v4770_v56 = vpop.f32.mrb[56].mxu1 }
0x1dbf   :  { %5258 = vst [vmem:[#allocation10_spill] sm:$0xff] %v4770_v56  ;;  %v1935_v61 = vpack.c.bf16 %v4770_v56, %v4770_v56  ;;  %v3864_v63 = vpop.f32.mrb[57].mxu1 }
0x1dc0   :  { %v1901_v48 = vpop.f32.mrb[58].mxu1 }
0x1dc1   :  { %v3865_v2 = vpop.f32.mrb[59].mxu1  ;;  %3869 = vmatmul.mubr.msk.bf16.vlgmr.msra.gmra.mrb[60].mxu0 %vm329_vm2, %v1935_v61 }
0x1dc2   :  { %3879 = vmatpush3.bf16.msra.mxu0 %v4444_v59  ;;  %3880 = vmatprep.mubr.msk.bf16.mxu0 %vm4227_vm1, %v4678_v11 }
0x1dc3   :  { %3890 = vmatprep.subr.bf16.mxu0 %v4678_v11 }
0x1dc6   :  { %v2014_v4 = vpop.f32.mrb[60].mxu1 }
0x1dc7   :  { %v2015_v6 = vadd.f32 %v4779_v14, %v2014_v4  ;;  %v3876_v13 = vpop.f32.mrb[61].mxu1 }
0x1dc8   :  { %v2017_v55 = vpop.f32.mrb[62].mxu1 }
0x1dc9   :  { %2028 = vrot.lane.b32.xlu0 %v2015_v6, %s4228_s1  ;;  %v3877_v58 = vpop.f32.mrb[63].mxu1 }
0x1e3b   :  { %v2029_v61 = vpop.permute.xlu0 %2028 }
0x1e94   :  { %v1973_v24 = vpop.f32.mrb[60].mxu0 }
0x1e95   :  { %v1979_v30 = vadd.f32 %v1973_v24, %v4373_v40  ;;  %v3870_v0 = vpop.f32.mrb[61].mxu0  ;;  %v2098_v24 = vld [vmem:[%s5245_s0 + $0x20] sm:$0xff] }
0x1e96   :  { %v1976_v62 = vpop.f32.mrb[62].mxu0 }
0x1e97   :  { %v2020_v60 = vadd.f32 %v2015_v6, %v1979_v30  ;;  %v3871_v52 = vpop.f32.mrb[63].mxu0 }
0x1e99   :  { %v3474_v41 = vmul.f32 -1.442695, %v2020_v60 }
0x1e9b   :  { %4114 = vpow2.f32 %v3474_v41 }
0x1ea5   :  { %v4115_v31 = vpop.eup %4114 }
0x1ea6   :  { %v2024_v7 = vadd.f32 1.0, %v4115_v31 }
0x1ea8   :  { %4116 = vrcp.f32 %v2024_v7 }
0x1eb2   :  { %v4117_v34 = vpop.eup %4116 }
0x1eb3   :  { %v2031_v63 = vmul.f32 %v4117_v34, %v2029_v61  ;;  %v2038_v40 = vsub.f32 1.0, %v4117_v34  ;;  %v2044_v6 = vmul.f32 %v4117_v34, %v4707_v36 }
0x1eb5   :  { %2033 = vrot.lane.b32.xlu1 %v2031_v63, %s4229_s16 }
0x1f27   :  { %v2034_v48 = vpop.permute.xlu1 %2033 }
0x1f28   :  { %v2036_v2 = vadd.f32 %v2034_v48, %v1979_v30 }
0x1f2a   :  { %4118 = vtanh.f32 %v2036_v2 }
0x1f34   :  { %v4119_v4 = vpop.eup %4118 }
0x1f35   :  { %2040 = vrot.lane.b32.xlu0 %v4119_v4, %s4230_s17 }
0x1f39   :  { %2100 = vrot.lane.b32.xlu0 %v2098_v24, %s4232_s19 }
0x1fa7   :  { %v2041_v13 = vpop.permute.xlu0 %2040 }
0x1fa8   :  { %v2043_v55 = vmul.f32 %v2041_v13, %v2038_v40 }
0x1faa   :  { %v2045_v58 = vadd.f32 %v2044_v6, %v2043_v55 }
0x1fab   :  { %v2101_v40 = vpop.permute.xlu0 %2100 }
0x1fac   :  { %v4790_v0 = vclamps-f32 %v2045_v58, 5.0 }
0x1fae   :  { %v2048_v30 = vpack.c.bf16 %v4790_v0, %v4790_v0 }
0x1fb0   :  { %2050 = vrot.lane.b32.xlu1 %v2048_v30, %s4230_s17 }
0x2022   :  { %v4796_v62 = vpop.permute.xlu1 %2050 }
0x2023   :  { %3881 = vmatmul.mubr.msk.bf16.vlgmr.msra.gmra.mrb[64].mxu0 %vm499_vm3, %v4796_v62 }
0x2024   :  { %3891 = vmatpush3.bf16.msra.mxu0 %v4457_v53  ;;  %3894 = vmatprep.mubr.msk.bf16.mxu0 %vm4227_vm1, %v4678_v11 }
0x2025   :  { %3892 = vmatprep.subr.bf16.mxu0 %v4678_v11 }
0x2028   :  { %3893 = vmatpush3.bf16.msra.mxu0 %v4464_v21 }
0x2029   :  { %3906 = vmatprep.subr.bf16.mxu0 %v4678_v11 }
0x202b   :  { %3895 = vmatmul.mubr.msk.bf16.vlgmr.msra.gmra.mrb[68].mxu0 %vm89_vm0, %v1860_v57 }
0x202c   :  { %3907 = vmatpush3.bf16.msra.mxu0 %v4429_v12  ;;  %3908 = vmatprep.mubr.msk.bf16.mxu0 %vm4227_vm1, %v4678_v11 }
0x202d   :  { %3918 = vmatprep.subr.bf16.mxu0 %v4678_v11 }
0x20f6   :  { %v2089_v60 = vpop.f32.mrb[64].mxu0 }
0x20f7   :  { %v4812_v52 = vadd.f32 %v2089_v60, %v4477_v22  ;;  %v3882_v41 = vpop.f32.mrb[65].mxu0 }
0x20f8   :  { %v2092_v31 = vpop.f32.mrb[66].mxu0 }
0x20f9   :  { %v2095_v7 = vmul.f32 0.5, %v4812_v52  ;;  %v3883_v34 = vpop.f32.mrb[67].mxu0 }
0x20fb   :  { %v2096_v61 = vmul.f32 1.442695, %v2095_v7 }
0x20fd   :  { %4120 = vpow2.f32 %v2096_v61 }
0x20fe   :  { %v2188_v63 = vpop.f32.mrb[68].mxu0 }
0x20ff   :  { %v2189_v57 = vadd.f32 %v2188_v63, %v4487_v39  ;;  %v3896_v48 = vpop.f32.mrb[69].mxu0 }
0x2100   :  { %v2191_v2 = vpop.f32.mrb[70].mxu0 }
0x2101   :  { %2202 = vrot.lane.b32.xlu0 %v2189_v57, %s4233_s20  ;;  %v3897_v4 = vpop.f32.mrb[71].mxu0 }
0x2107   :  { %v4817_v13 = vpop.eup %4120 }
0x2108   :  { %v2103_v22 = vmul.f32 %v4817_v13, %v2101_v40 }
0x210a   :  { %2105 = vrot.lane.b32.xlu1 %v2103_v22, %s4234_s21 }
0x2173   :  { %v2203_v48 = vpop.permute.xlu0 %2202 }
0x217c   :  { %v2106_v6 = vpop.permute.xlu1 %2105 }
0x217d   :  { %v4822_v55 = vadd.f32 %v2106_v6, %v4812_v52 }
0x217f   :  { %v2109_v58 = vpack.c.bf16 %v4822_v55, %v4822_v55 }
0x2181   :  { %3887 = vmatmul.mubr.msk.bf16.vlgmr.msra.gmra.mrb[64].mxu1 %vm637_vm6, %v2109_v58 }
0x2182   :  { %3899 = vmatpush3.bf16.msra.mxu1 %v4341_v25  ;;  %3902 = vmatprep.mubr.msk.bf16.mxu1 %vm4227_vm1, %v4678_v11 }
0x2183   :  { %3900 = vmatprep.subr.bf16.mxu1 %v4678_v11 }
0x2186   :  { %3901 = vmatpush3.bf16.msra.mxu1 %v4349_v28 }
0x2187   :  { %3912 = vmatprep.subr.bf16.mxu1 %v4678_v11 }
0x2254   :  { %v2147_v39 = vpop.f32.mrb[64].mxu1 }
0x2255   :  { %v2153_v24 = vadd.f32 %v2147_v39, %v4421_v3  ;;  %v3888_v30 = vpop.f32.mrb[65].mxu1 }
0x2256   :  { %v2150_v60 = vpop.f32.mrb[66].mxu1 }
0x2257   :  { %v2194_v41 = vadd.f32 %v2189_v57, %v2153_v24  ;;  %v3889_v31 = vpop.f32.mrb[67].mxu1 }
0x2259   :  { %v3479_v7 = vmul.f32 -1.442695, %v2194_v41 }
0x225b   :  { %4122 = vpow2.f32 %v3479_v7 }
0x2265   :  { %v4123_v34 = vpop.eup %4122 }
0x2266   :  { %v2198_v61 = vadd.f32 1.0, %v4123_v34 }
0x2268   :  { %4124 = vrcp.f32 %v2198_v61 }
0x2272   :  { %v4125_v63 = vpop.eup %4124 }
0x2273   :  { %v2205_v2 = vmul.f32 %v4125_v63, %v2203_v48  ;;  %v2212_v3 = vsub.f32 1.0, %v4125_v63  ;;  %v2218_v57 = vmul.f32 %v4125_v63, %v4754_v33 }
0x2275   :  { %2207 = vrot.lane.b32.xlu1 %v2205_v2, %s4233_s20 }
0x22e7   :  { %v2208_v4 = vpop.permute.xlu1 %2207 }
0x22e8   :  { %v2210_v40 = vadd.f32 %v2208_v4, %v2153_v24 }
0x22ea   :  { %4126 = vtanh.f32 %v2210_v40 }
0x22f4   :  { %v4127_v22 = vpop.eup %4126 }
0x22f5   :  { %2214 = vrot.lane.b32.xlu0 %v4127_v22, %s4228_s1 }
0x2367   :  { %v2215_v6 = vpop.permute.xlu0 %2214 }
0x2368   :  { %v2217_v58 = vmul.f32 %v2215_v6, %v2212_v3 }
0x236a   :  { %v2219_v39 = vadd.f32 %v2218_v57, %v2217_v58 }
0x236c   :  { %v4837_v30 = vclamps-f32 %v2219_v39, 5.0 }
0x236e   :  { %v2222_v60 = vpack.c.bf16 %v4837_v30, %v4837_v30 }
0x2370   :  { %2224 = vrot.lane.b32.xlu1 %v2222_v60, %s4228_s1 }
0x23e2   :  { %v2225_v41 = vpop.permute.xlu1 %2224 }
0x23e3   :  { %3903 = vmatmul.mubr.msk.bf16.vlgmr.msra.gmra.mrb[68].mxu1 %vm89_vm0, %v2225_v41 }
0x23e4   :  { %3913 = vmatpush3.bf16.msra.mxu1 %v4383_v51  ;;  %3914 = vmatprep.mubr.msk.bf16.mxu1 %vm4227_vm1, %v4678_v11 }
0x23e5   :  { %3924 = vmatprep.subr.bf16.mxu1 %v4678_v11 }
0x23eb   :  { %3915 = vmatmul.mubr.msk.bf16.vlgmr.msra.gmra.mrb[72].mxu1 %vm499_vm3, %v4796_v62 }
0x23ec   :  { %3925 = vmatpush3.bf16.msra.mxu1 %v4479_v26  ;;  %3926 = vmatprep.mubr.msk.bf16.mxu1 %vm4227_vm1, %v4678_v11 }
0x23ed   :  { %3938 = vmatprep.subr.bf16.mxu1 %v4678_v11 }
0x24b6   :  { %v4853_v24 = vpop.f32.mrb[68].mxu1 }
0x24b7   :  { %v2300_v31 = vpack.c.bf16 %v4853_v24, %v4853_v24  ;;  %v3904_v7 = vpop.f32.mrb[69].mxu1 }
0x24b8   :  { %v2266_v34 = vpop.f32.mrb[70].mxu1 }
0x24b9   :  { %v3905_v61 = vpop.f32.mrb[71].mxu1  ;;  %3909 = vmatmul.mubr.msk.bf16.vlgmr.msra.gmra.mrb[72].mxu0 %vm329_vm2, %v2300_v31 }
0x24ba   :  { %3919 = vmatpush3.bf16.msra.mxu0 %v4444_v59  ;;  %3920 = vmatprep.mubr.msk.bf16.mxu0 %vm4227_vm1, %v4678_v11 }
0x24bb   :  { %3930 = vmatprep.subr.bf16.mxu0 %v4678_v11 }
0x24be   :  { %v2379_v62 = vpop.f32.mrb[72].mxu1 }
0x24bf   :  { %v2380_v63 = vadd.f32 %v4779_v14, %v2379_v62  ;;  %v3916_v48 = vpop.f32.mrb[73].mxu1 }
0x24c0   :  { %v2382_v2 = vpop.f32.mrb[74].mxu1 }
0x24c1   :  { %2393 = vrot.lane.b32.xlu0 %v2380_v63, %s4228_s1  ;;  %v3917_v4 = vpop.f32.mrb[75].mxu1 }
0x2533   :  { %v2394_v34 = vpop.permute.xlu0 %2393 }
0x258c   :  { %v2338_v40 = vpop.f32.mrb[72].mxu0 }
0x258d   :  { %v2344_v22 = vadd.f32 %v2338_v40, %v4370_v38  ;;  %v3910_v3 = vpop.f32.mrb[73].mxu0 }
0x258e   :  { %v2341_v6 = vpop.f32.mrb[74].mxu0 }
0x258f   :  { %v2385_v57 = vadd.f32 %v2380_v63, %v2344_v22  ;;  %v3911_v58 = vpop.f32.mrb[75].mxu0  ;;  %v2463_v6 = vld [vmem:[%s5245_s0 + $0x28] sm:$0xff] }
0x2591   :  { %v3484_v39 = vmul.f32 -1.442695, %v2385_v57 }
0x2593   :  { %4128 = vpow2.f32 %v3484_v39 }
0x259d   :  { %v4129_v60 = vpop.eup %4128 }
0x259e   :  { %v2389_v31 = vadd.f32 1.0, %v4129_v60  ;;  %v4892_v60 = vld [vmem:[#allocation2 + $0xd8] sm:$0xff] }
0x25a0   :  { %4130 = vrcp.f32 %v2389_v31 }
0x25aa   :  { %v4131_v7 = vpop.eup %4130 }
0x25ab   :  { %v2396_v61 = vmul.f32 %v4131_v7, %v2394_v34  ;;  %v2403_v38 = vsub.f32 1.0, %v4131_v7  ;;  %v2409_v63 = vmul.f32 %v4131_v7, %v4790_v0 }
0x25ad   :  { %2398 = vrot.lane.b32.xlu1 %v2396_v61, %s4229_s16 }
0x261f   :  { %v2399_v62 = vpop.permute.xlu1 %2398 }
0x2620   :  { %v2401_v48 = vadd.f32 %v2399_v62, %v2344_v22 }
0x2622   :  { %4132 = vtanh.f32 %v2401_v48 }
0x262c   :  { %v4133_v2 = vpop.eup %4132 }
0x262d   :  { %2405 = vrot.lane.b32.xlu0 %v4133_v2, %s4230_s17  ;;  %v4898_v2 = vld [vmem:[#allocation2 + $0xd0] sm:$0xff] }
0x2631   :  { %2465 = vrot.lane.b32.xlu0 %v2463_v6, %s4232_s19 }
0x269f   :  { %v2406_v4 = vpop.permute.xlu0 %2405 }
0x26a0   :  { %v2408_v40 = vmul.f32 %v2406_v4, %v2403_v38 }
0x26a2   :  { %v2410_v3 = vadd.f32 %v2409_v63, %v2408_v40 }
0x26a4   :  { %v4871_v57 = vclamps-f32 %v2410_v3, 5.0  ;;  %v2466_v3 = vpop.permute.xlu0 %2465 }
0x26a6   :  { %v2413_v22 = vpack.c.bf16 %v4871_v57, %v4871_v57 }
0x26a8   :  { %2415 = vrot.lane.b32.xlu1 %v2413_v22, %s4230_s17 }
0x271a   :  { %v4877_v58 = vpop.permute.xlu1 %2415 }
0x271b   :  { %3921 = vmatmul.mubr.msk.bf16.vlgmr.msra.gmra.mrb[76].mxu0 %vm499_vm3, %v4877_v58 }
0x271c   :  { %3931 = vmatpush3.bf16.msra.mxu0 %v4457_v53  ;;  %3934 = vmatprep.mubr.msk.bf16.mxu0 %vm4227_vm1, %v4678_v11 }
0x271d   :  { %3932 = vmatprep.subr.bf16.mxu0 %v4678_v11 }
0x2720   :  { %3933 = vmatpush3.bf16.msra.mxu0 %v4464_v21 }
0x2721   :  { %3946 = vmatprep.subr.bf16.mxu0 %v4678_v11 }
0x2723   :  { %3935 = vmatmul.mubr.msk.bf16.vlgmr.msra.gmra.mrb[80].mxu0 %vm89_vm0, %v2225_v41 }
0x2724   :  { %3947 = vmatpush3.bf16.msra.mxu0 %v4429_v12  ;;  %3948 = vmatprep.mubr.msk.bf16.mxu0 %vm4227_vm1, %v4678_v11 }
0x2725   :  { %3958 = vmatprep.subr.bf16.mxu0 %v4678_v11 }
0x27ee   :  { %v2454_v39 = vpop.f32.mrb[76].mxu0 }
0x27ef   :  { %v4895_v31 = vadd.f32 %v4892_v60, %v2454_v39  ;;  %v3922_v7 = vpop.f32.mrb[77].mxu0 }
0x27f0   :  { %v2457_v34 = vpop.f32.mrb[78].mxu0 }
0x27f1   :  { %v2460_v61 = vmul.f32 0.5, %v4895_v31  ;;  %v3923_v62 = vpop.f32.mrb[79].mxu0 }
0x27f3   :  { %v2461_v48 = vmul.f32 1.442695, %v2460_v61 }
0x27f5   :  { %4134 = vpow2.f32 %v2461_v48 }
0x27f6   :  { %v2553_v41 = vpop.f32.mrb[80].mxu0 }
0x27f7   :  { %v2554_v38 = vadd.f32 %v4898_v2, %v2553_v41  ;;  %v3936_v4 = vpop.f32.mrb[81].mxu0 }
0x27f8   :  { %v2556_v63 = vpop.f32.mrb[82].mxu0 }
0x27f9   :  { %2567 = vrot.lane.b32.xlu0 %v2554_v38, %s4233_s20  ;;  %v3937_v40 = vpop.f32.mrb[83].mxu0 }
0x27ff   :  { %v4902_v6 = vpop.eup %4134 }
0x2800   :  { %5259 = vst [vmem:[#allocation11_spill] sm:$0xff] %v4902_v6  ;;  %v2468_v22 = vmul.f32 %v4902_v6, %v2466_v3 }
0x2802   :  { %2470 = vrot.lane.b32.xlu1 %v2468_v22, %s4234_s21 }
0x2874   :  { %v2471_v39 = vpop.permute.xlu1 %2470 }
0x2875   :  { %v4907_v7 = vadd.f32 %v2471_v39, %v4895_v31 }
0x2877   :  { %5260 = vst [vmem:[#allocation12_spill] sm:$0xff] %v4907_v7  ;;  %v2474_v34 = vpack.c.bf16 %v4907_v7, %v4907_v7 }
0x2879   :  { %3927 = vmatmul.mubr.msk.bf16.vlgmr.msra.gmra.mrb[76].mxu1 %vm637_vm6, %v2474_v34  ;;  %v2568_v34 = vpop.permute.xlu0 %2567 }
0x287a   :  { %3939 = vmatpush3.bf16.msra.mxu1 %v4341_v25  ;;  %3942 = vmatprep.mubr.msk.bf16.mxu1 %vm4227_vm1, %v4678_v11 }
0x287b   :  { %3940 = vmatprep.subr.bf16.mxu1 %v4678_v11 }
0x287e   :  { %3941 = vmatpush3.bf16.msra.mxu1 %v4349_v28 }
0x287f   :  { %3952 = vmatprep.subr.bf16.mxu1 %v4678_v11 }
0x294c   :  { %v2512_v61 = vpop.f32.mrb[76].mxu1 }
0x294d   :  { %v2518_v62 = vadd.f32 %v2512_v61, %v4418_v1  ;;  %v3928_v48 = vpop.f32.mrb[77].mxu1 }
0x294e   :  { %v2515_v41 = vpop.f32.mrb[78].mxu1 }
0x294f   :  { %v2559_v4 = vadd.f32 %v2554_v38, %v2518_v62  ;;  %v3929_v63 = vpop.f32.mrb[79].mxu1 }
0x2951   :  { %v3489_v40 = vmul.f32 -1.442695, %v2559_v4 }
0x2953   :  { %4136 = vpow2.f32 %v3489_v40 }
0x295d   :  { %v4137_v3 = vpop.eup %4136 }
0x295e   :  { %v2563_v22 = vadd.f32 1.0, %v4137_v3 }
0x2960   :  { %4138 = vrcp.f32 %v2563_v22 }
0x296a   :  { %v4139_v39 = vpop.eup %4138 }
0x296b   :  { %v2570_v56 = vmul.f32 %v4139_v39, %v2568_v34  ;;  %v2577_v1 = vsub.f32 1.0, %v4139_v39  ;;  %v2583_v38 = vmul.f32 %v4139_v39, %v4837_v30 }
0x296d   :  { %2572 = vrot.lane.b32.xlu1 %v2570_v56, %s4233_s20 }
0x29df   :  { %v2573_v7 = vpop.permute.xlu1 %2572 }
0x29e0   :  { %v2575_v37 = vadd.f32 %v2573_v7, %v2518_v62 }
0x29e2   :  { %4140 = vtanh.f32 %v2575_v37 }
0x29ec   :  { %v4141_v6 = vpop.eup %4140 }
0x29ed   :  { %2579 = vrot.lane.b32.xlu0 %v4141_v6, %s4228_s1 }
0x2a5f   :  { %v2580_v61 = vpop.permute.xlu0 %2579 }
0x2a60   :  { %v2582_v48 = vmul.f32 %v2580_v61, %v2577_v1 }
0x2a62   :  { %v2584_v41 = vadd.f32 %v2583_v38, %v2582_v48 }
0x2a64   :  { %v4922_v4 = vclamps-f32 %v2584_v41, 5.0 }
0x2a66   :  { %v2587_v63 = vpack.c.bf16 %v4922_v4, %v4922_v4 }
0x2a68   :  { %2589 = vrot.lane.b32.xlu1 %v2587_v63, %s4228_s1 }
0x2ada   :  { %v2590_v56 = vpop.permute.xlu1 %2589 }
0x2adb   :  { %3943 = vmatmul.mubr.msk.bf16.vlgmr.msra.gmra.mrb[80].mxu1 %vm89_vm0, %v2590_v56 }
0x2adc   :  { %3953 = vmatpush3.bf16.msra.mxu1 %v4383_v51  ;;  %3954 = vmatprep.mubr.msk.bf16.mxu1 %vm4227_vm1, %v4678_v11 }
0x2add   :  { %3964 = vmatprep.subr.bf16.mxu1 %v4678_v11 }
0x2ae3   :  { %3955 = vmatmul.mubr.msk.bf16.vlgmr.msra.gmra.mrb[84].mxu1 %vm499_vm3, %v4877_v58 }
0x2ae4   :  { %3965 = vmatpush3.bf16.msra.mxu1 %v4479_v26  ;;  %3966 = vmatprep.mubr.msk.bf16.mxu1 %vm4227_vm1, %v4678_v11 }
0x2ae5   :  { %3978 = vmatprep.subr.bf16.mxu1 %v4678_v11 }
0x2bae   :  { %v4938_v37 = vpop.f32.mrb[80].mxu1 }
0x2baf   :  { %5261 = vst [vmem:[#allocation13_spill] sm:$0xff] %v4938_v37  ;;  %v2665_v6 = vpack.c.bf16 %v4938_v37, %v4938_v37  ;;  %v3944_v7 = vpop.f32.mrb[81].mxu1 }
0x2bb0   :  { %v2631_v62 = vpop.f32.mrb[82].mxu1 }
0x2bb1   :  { %v3945_v40 = vpop.f32.mrb[83].mxu1  ;;  %3949 = vmatmul.mubr.msk.bf16.vlgmr.msra.gmra.mrb[84].mxu0 %vm329_vm2, %v2665_v6 }
0x2bb2   :  { %3959 = vmatpush3.bf16.msra.mxu0 %v4444_v59  ;;  %3960 = vmatprep.mubr.msk.bf16.mxu0 %vm4227_vm1, %v4678_v11 }
0x2bb3   :  { %3970 = vmatprep.subr.bf16.mxu0 %v4678_v11 }
0x2bb6   :  { %v2744_v58 = vpop.f32.mrb[84].mxu1 }
0x2bb7   :  { %v2745_v3 = vadd.f32 %v4779_v14, %v2744_v58  ;;  %v3956_v22 = vpop.f32.mrb[85].mxu1 }
0x2bb8   :  { %v2747_v39 = vpop.f32.mrb[86].mxu1 }
0x2bb9   :  { %2758 = vrot.lane.b32.xlu0 %v2745_v3, %s4228_s1  ;;  %v3957_v34 = vpop.f32.mrb[87].mxu1 }
0x2c2b   :  { %v2759_v37 = vpop.permute.xlu0 %2758 }
0x2c84   :  { %v2703_v1 = vpop.f32.mrb[84].mxu0 }
0x2c85   :  { %v2709_v61 = vadd.f32 %v2703_v1, %v4379_v44  ;;  %v3950_v38 = vpop.f32.mrb[85].mxu0 }
0x2c86   :  { %v2706_v48 = vpop.f32.mrb[86].mxu0 }
0x2c87   :  { %v2750_v41 = vadd.f32 %v2745_v3, %v2709_v61  ;;  %v3951_v63 = vpop.f32.mrb[87].mxu0 }
0x2c89   :  { %v3494_v6 = vmul.f32 -1.442695, %v2750_v41  ;;  %v2828_v41 = vld [vmem:[%s5245_s0 + $0x30] sm:$0xff] }
0x2c8b   :  { %4142 = vpow2.f32 %v3494_v6 }
0x2c95   :  { %v4143_v7 = vpop.eup %4142 }
0x2c96   :  { %v2754_v62 = vadd.f32 1.0, %v4143_v7 }
0x2c98   :  { %4144 = vrcp.f32 %v2754_v62 }
0x2ca2   :  { %v4145_v40 = vpop.eup %4144 }
0x2ca3   :  { %v2761_v58 = vmul.f32 %v4145_v40, %v2759_v37  ;;  %v2768_v44 = vsub.f32 1.0, %v4145_v40  ;;  %v2774_v3 = vmul.f32 %v4145_v40, %v4871_v57 }
0x2ca5   :  { %2763 = vrot.lane.b32.xlu1 %v2761_v58, %s4229_s16 }
0x2d17   :  { %v2764_v22 = vpop.permute.xlu1 %2763 }
0x2d18   :  { %v2766_v39 = vadd.f32 %v2764_v22, %v2709_v61 }
0x2d1a   :  { %4146 = vtanh.f32 %v2766_v39 }
0x2d24   :  { %v4147_v34 = vpop.eup %4146 }
0x2d25   :  { %2770 = vrot.lane.b32.xlu0 %v4147_v34, %s4230_s17 }
0x2d29   :  { %2830 = vrot.lane.b32.xlu0 %v2828_v41, %s4232_s19 }
0x2d97   :  { %v2771_v1 = vpop.permute.xlu0 %2770 }
0x2d98   :  { %v2773_v38 = vmul.f32 %v2771_v1, %v2768_v44 }
0x2d9a   :  { %v2775_v48 = vadd.f32 %v2774_v3, %v2773_v38 }
0x2d9b   :  { %v2831_v3 = vpop.permute.xlu0 %2830 }
0x2d9c   :  { %v4956_v63 = vclamps-f32 %v2775_v48, 5.0 }
0x2d9e   :  { %v2778_v37 = vpack.c.bf16 %v4956_v63, %v4956_v63 }
0x2da0   :  { %2780 = vrot.lane.b32.xlu1 %v2778_v37, %s4230_s17 }
0x2e12   :  { %v4962_v61 = vpop.permute.xlu1 %2780 }
0x2e13   :  { %3961 = vmatmul.mubr.msk.bf16.vlgmr.msra.gmra.mrb[88].mxu0 %vm499_vm3, %v4962_v61 }
0x2e14   :  { %3971 = vmatpush3.bf16.msra.mxu0 %v4457_v53  ;;  %3974 = vmatprep.mubr.msk.bf16.mxu0 %vm4227_vm1, %v4678_v11 }
0x2e15   :  { %3972 = vmatprep.subr.bf16.mxu0 %v4678_v11 }
0x2e18   :  { %3973 = vmatpush3.bf16.msra.mxu0 %v4464_v21 }
0x2e19   :  { %3986 = vmatprep.subr.bf16.mxu0 %v4678_v11 }
0x2e1b   :  { %3975 = vmatmul.mubr.msk.bf16.vlgmr.msra.gmra.mrb[92].mxu0 %vm89_vm0, %v2590_v56 }
0x2e1c   :  { %3987 = vmatpush3.bf16.msra.mxu0 %v4429_v12  ;;  %3988 = vmatprep.mubr.msk.bf16.mxu0 %vm4227_vm1, %v4678_v11 }
0x2e1d   :  { %3998 = vmatprep.subr.bf16.mxu0 %v4678_v11 }
0x2ee6   :  { %v2819_v6 = vpop.f32.mrb[88].mxu0 }
0x2ee7   :  { %v4978_v7 = vadd.f32 %v4892_v60, %v2819_v6  ;;  %v3962_v62 = vpop.f32.mrb[89].mxu0 }
0x2ee8   :  { %v2822_v40 = vpop.f32.mrb[90].mxu0 }
0x2ee9   :  { %5262 = vst [vmem:[#allocation14_spill] sm:$0xff] %v4978_v7  ;;  %v2825_v58 = vmul.f32 0.5, %v4978_v7  ;;  %v3963_v22 = vpop.f32.mrb[91].mxu0 }
0x2eeb   :  { %v2826_v39 = vmul.f32 1.442695, %v2825_v58 }
0x2eed   :  { %4148 = vpow2.f32 %v2826_v39 }
0x2eee   :  { %v2918_v34 = vpop.f32.mrb[92].mxu0 }
0x2eef   :  { %v2919_v56 = vadd.f32 %v4898_v2, %v2918_v34  ;;  %v3976_v12 = vpop.f32.mrb[93].mxu0 }
0x2ef0   :  { %v2921_v44 = vpop.f32.mrb[94].mxu0 }
0x2ef1   :  { %2932 = vrot.lane.b32.xlu0 %v2919_v56, %s4233_s20  ;;  %v3977_v1 = vpop.f32.mrb[95].mxu0 }
0x2ef7   :  { %v4983_v38 = vpop.eup %4148 }
0x2ef8   :  { %v2833_v48 = vmul.f32 %v4983_v38, %v2831_v3 }
0x2efa   :  { %2835 = vrot.lane.b32.xlu1 %v2833_v48, %s4234_s21 }
0x2f63   :  { %v2933_v48 = vpop.permute.xlu0 %2932 }
0x2f6c   :  { %v2836_v41 = vpop.permute.xlu1 %2835 }
0x2f6d   :  { %v4988_v37 = vadd.f32 %v2836_v41, %v4978_v7 }
0x2f6f   :  { %v2839_v6 = vpack.c.bf16 %v4988_v37, %v4988_v37 }
0x2f71   :  { %3967 = vmatmul.mubr.msk.bf16.vlgmr.msra.gmra.mrb[88].mxu1 %vm637_vm6, %v2839_v6 }
0x2f72   :  { %3979 = vmatpush3.bf16.msra.mxu1 %v4341_v25  ;;  %3982 = vmatprep.mubr.msk.bf16.mxu1 %vm4227_vm1, %v4678_v11 }
0x2f73   :  { %3980 = vmatprep.subr.bf16.mxu1 %v4678_v11 }
0x2f76   :  { %3981 = vmatpush3.bf16.msra.mxu1 %v4349_v28 }
0x2f77   :  { %3992 = vmatprep.subr.bf16.mxu1 %v4678_v11 }
0x3044   :  { %v2877_v62 = vpop.f32.mrb[88].mxu1 }
0x3045   :  { %v2883_v40 = vadd.f32 %v2877_v62, %v4427_v9  ;;  %v3968_v58 = vpop.f32.mrb[89].mxu1 }
0x3046   :  { %v2880_v22 = vpop.f32.mrb[90].mxu1 }
0x3047   :  { %v2924_v39 = vadd.f32 %v2919_v56, %v2883_v40  ;;  %v3969_v34 = vpop.f32.mrb[91].mxu1 }
0x3049   :  { %v3499_v12 = vmul.f32 -1.442695, %v2924_v39 }
0x304b   :  { %4150 = vpow2.f32 %v3499_v12 }
0x3055   :  { %v4151_v44 = vpop.eup %4150 }
0x3056   :  { %v2928_v1 = vadd.f32 1.0, %v4151_v44 }
0x3058   :  { %4152 = vrcp.f32 %v2928_v1 }
0x3062   :  { %v4153_v3 = vpop.eup %4152 }
0x3063   :  { %v2935_v41 = vmul.f32 %v4153_v3, %v2933_v48  ;;  %v2942_v9 = vsub.f32 1.0, %v4153_v3  ;;  %v2948_v56 = vmul.f32 %v4153_v3, %v4922_v4 }
0x3065   :  { %2937 = vrot.lane.b32.xlu1 %v2935_v41, %s4233_s20 }
0x30d7   :  { %v2938_v6 = vpop.permute.xlu1 %2937 }
0x30d8   :  { %v2940_v19 = vadd.f32 %v2938_v6, %v2883_v40 }
0x30da   :  { %4154 = vtanh.f32 %v2940_v19 }
0x30e4   :  { %v4155_v7 = vpop.eup %4154 }
0x30e5   :  { %2944 = vrot.lane.b32.xlu0 %v4155_v7, %s4228_s1 }
0x3157   :  { %v2945_v62 = vpop.permute.xlu0 %2944 }
0x3158   :  { %v2947_v58 = vmul.f32 %v2945_v62, %v2942_v9 }
0x315a   :  { %v2949_v22 = vadd.f32 %v2948_v56, %v2947_v58 }
0x315c   :  { %v5003_v39 = vclamps-f32 %v2949_v22, 5.0 }
0x315e   :  { %v2952_v34 = vpack.c.bf16 %v5003_v39, %v5003_v39 }
0x3160   :  { %2954 = vrot.lane.b32.xlu1 %v2952_v34, %s4228_s1 }
0x31d2   :  { %v2955_v12 = vpop.permute.xlu1 %2954 }
0x31d3   :  { %3983 = vmatmul.mubr.msk.bf16.vlgmr.msra.gmra.mrb[92].mxu1 %vm89_vm0, %v2955_v12 }
0x31d4   :  { %3993 = vmatpush3.bf16.msra.mxu1 %v4383_v51  ;;  %3994 = vmatprep.mubr.msk.bf16.mxu1 %vm4227_vm1, %v4678_v11 }
0x31d5   :  { %4004 = vmatprep.subr.bf16.mxu1 %v4678_v11 }
0x31db   :  { %3995 = vmatmul.mubr.msk.bf16.vlgmr.msra.gmra.mrb[96].mxu1 %vm499_vm3, %v4962_v61 }
0x31dc   :  { %4005 = vmatpush3.bf16.msra.mxu1 %v4479_v26  ;;  %4006 = vmatprep.mubr.msk.bf16.mxu1 %vm4227_vm1, %v4678_v11 }
0x31dd   :  { %4018 = vmatprep.subr.bf16.mxu1 %v4678_v11 }
0x32a6   :  { %v5019_v19 = vpop.f32.mrb[92].mxu1 }
0x32a7   :  { %v3030_v51 = vpack.c.bf16 %v5019_v19, %v5019_v19  ;;  %v3984_v7 = vpop.f32.mrb[93].mxu1 }
0x32a8   :  { %v2996_v40 = vpop.f32.mrb[94].mxu1 }
0x32a9   :  { %v3985_v44 = vpop.f32.mrb[95].mxu1  ;;  %3989 = vmatmul.mubr.msk.bf16.vlgmr.msra.gmra.mrb[96].mxu0 %vm329_vm2, %v3030_v51 }
0x32aa   :  { %3999 = vmatpush3.bf16.msra.mxu0 %v4444_v59  ;;  %4000 = vmatprep.mubr.msk.bf16.mxu0 %vm4227_vm1, %v4678_v11 }
0x32ab   :  { %4010 = vmatprep.subr.bf16.mxu0 %v4678_v11 }
0x32ae   :  { %v3109_v26 = vpop.f32.mrb[96].mxu1 }
0x32af   :  { %v3110_v61 = vadd.f32 %v4779_v14, %v3109_v26  ;;  %v3996_v1 = vpop.f32.mrb[97].mxu1 }
0x32b0   :  { %v3112_v3 = vpop.f32.mrb[98].mxu1 }
0x32b1   :  { %3123 = vrot.lane.b32.xlu0 %v3110_v61, %s4228_s1  ;;  %v3997_v48 = vpop.f32.mrb[99].mxu1 }
0x32b2   :  { %v3193_v48 = vld [vmem:[%s5245_s0 + $0x38] sm:$0xff]  ;;  %s4235_s0 = smov 48  }
0x3323   :  { %v3124_v51 = vpop.permute.xlu0 %3123 }
0x337c   :  { %v3068_v41 = vpop.f32.mrb[96].mxu0 }
0x337d   :  { %v3074_v6 = vadd.f32 %v3068_v41, %v4376_v42  ;;  %v3990_v9 = vpop.f32.mrb[97].mxu0 }
0x337e   :  { %v3071_v62 = vpop.f32.mrb[98].mxu0 }
0x337f   :  { %v3115_v56 = vadd.f32 %v3110_v61, %v3074_v6  ;;  %v3991_v59 = vpop.f32.mrb[99].mxu0  ;;  %v4174_v62 = vld [vmem:[#allocation5] sm:$0xff] }
0x3381   :  { %v3504_v58 = vmul.f32 -1.442695, %v3115_v56 }
0x3383   :  { %4156 = vpow2.f32 %v3504_v58 }
0x338d   :  { %v4157_v22 = vpop.eup %4156 }
0x338e   :  { %v3119_v34 = vadd.f32 1.0, %v4157_v22 }
0x3390   :  { %4158 = vrcp.f32 %v3119_v34 }
0x339a   :  { %v4159_v11 = vpop.eup %4158 }
0x339b   :  { %v3126_v14 = vmul.f32 %v4159_v11, %v3124_v51  ;;  %v3133_v42 = vsub.f32 1.0, %v4159_v11  ;;  %v3139_v61 = vmul.f32 %v4159_v11, %v4956_v63 }
0x339d   :  { %3128 = vrot.lane.b32.xlu1 %v3126_v14, %s4229_s16 }
0x340f   :  { %v3129_v7 = vpop.permute.xlu1 %3128 }
0x3410   :  { %v3131_v40 = vadd.f32 %v3129_v7, %v3074_v6 }
0x3412   :  { %4160 = vtanh.f32 %v3131_v40 }
0x341c   :  { %v4161_v44 = vpop.eup %4160 }
0x341d   :  { %3135 = vrot.lane.b32.xlu0 %v4161_v44, %s4230_s17 }
0x3421   :  { %3195 = vrot.lane.b32.xlu0 %v3193_v48, %s4232_s19 }
0x348f   :  { %v3136_v26 = vpop.permute.xlu0 %3135 }
0x3490   :  { %v3138_v1 = vmul.f32 %v3136_v26, %v3133_v42 }
0x3492   :  { %v3140_v3 = vadd.f32 %v3139_v61, %v3138_v1 }
0x3494   :  { %v5037_v41 = vclamps-f32 %v3140_v3, 5.0 }
0x3496   :  { %v3143_v6 = vpack.c.bf16 %v5037_v41, %v5037_v41 }
0x3498   :  { %3145 = vrot.lane.b32.xlu1 %v3143_v6, %s4230_s17 }
0x350a   :  { %v3146_v9 = vpop.permute.xlu1 %3145 }
0x350b   :  { %4001 = vmatmul.mubr.msk.bf16.vlgmr.msra.gmra.mrb[100].mxu0 %vm499_vm3, %v3146_v9 }
0x350c   :  { %4011 = vmatpush3.bf16.msra.mxu0 %v4457_v53  ;;  %4014 = vmatprep.mubr.msk.bf16.mxu0 %vm4227_vm1, %v4174_v62 }
0x350d   :  { %4012 = vmatprep.subr.bf16.mxu0 %v4174_v62 }
0x3510   :  { %4013 = vmatpush3.bf16.msra.mxu0 %v4464_v21 }
0x3513   :  { %4015 = vmatmul.mubr.msk.bf16.vlgmr.msra.gmra.mrb[104].mxu0 %vm89_vm0, %v2955_v12  ;;  %v3196_v12 = vpop.permute.xlu0 %3195 }
0x35de   :  { %v3184_v56 = vpop.f32.mrb[100].mxu0 }
0x35df   :  { %v5049_v59 = vadd.f32 %v4892_v60, %v3184_v56  ;;  %v4002_v58 = vpop.f32.mrb[101].mxu0 }
0x35e0   :  { %v3187_v22 = vpop.f32.mrb[102].mxu0 }
0x35e1   :  { %v3190_v34 = vmul.f32 0.5, %v5049_v59  ;;  %v4003_v11 = vpop.f32.mrb[103].mxu0 }
0x35e3   :  { %v3191_v51 = vmul.f32 1.442695, %v3190_v34 }
0x35e5   :  { %4162 = vpow2.f32 %v3191_v51 }
0x35e6   :  { %v3283_v53 = vpop.f32.mrb[104].mxu0 }
0x35e7   :  { %v3284_v14 = vadd.f32 %v4898_v2, %v3283_v53  ;;  %v4016_v7 = vpop.f32.mrb[105].mxu0 }
0x35e8   :  { %v3286_v40 = vpop.f32.mrb[106].mxu0 }
0x35e9   :  { %3297 = vrot.lane.b32.xlu0 %v3284_v14, %s4233_s20  ;;  %v4017_v21 = vpop.f32.mrb[107].mxu0 }
0x35ef   :  { %v5054_v44 = vpop.eup %4162 }
0x35f0   :  { %v3198_v60 = vmul.f32 %v5054_v44, %v3196_v12 }
0x35f2   :  { %3200 = vrot.lane.b32.xlu1 %v3198_v60, %s4234_s21 }
0x365b   :  { %v3298_v11 = vpop.permute.xlu0 %3297 }
0x3664   :  { %v3201_v42 = vpop.permute.xlu1 %3200 }
0x3665   :  { %v5059_v26 = vadd.f32 %v3201_v42, %v5049_v59 }
0x3667   :  { %v3204_v61 = vpack.c.bf16 %v5059_v26, %v5059_v26 }
0x3669   :  { %4007 = vmatmul.mubr.msk.bf16.vlgmr.msra.gmra.mrb[100].mxu1 %vm637_vm6, %v3204_v61 }
0x366a   :  { %4019 = vmatpush3.bf16.msra.mxu1 %v4341_v25  ;;  %4022 = vmatprep.mubr.msk.bf16.mxu1 %vm4227_vm1, %v4174_v62 }
0x366b   :  { %4020 = vmatprep.subr.bf16.mxu1 %v4174_v62 }
0x366e   :  { %4021 = vmatpush3.bf16.msra.mxu1 %v4349_v28 }
0x373c   :  { %v3242_v2 = vpop.f32.mrb[100].mxu1 }
0x373d   :  { %v3248_v1 = vadd.f32 %v3242_v2, %v4424_v5  ;;  %v4008_v3 = vpop.f32.mrb[101].mxu1 }
0x373e   :  { %v3245_v48 = vpop.f32.mrb[102].mxu1 }
0x373f   :  { %v3289_v6 = vadd.f32 %v3284_v14, %v3248_v1  ;;  %v4009_v9 = vpop.f32.mrb[103].mxu1 }
0x3741   :  { %v3509_v56 = vmul.f32 -1.442695, %v3289_v6 }
0x3743   :  { %4164 = vpow2.f32 %v3509_v56 }
0x374d   :  { %v4165_v58 = vpop.eup %4164 }
0x374e   :  { %v3293_v22 = vadd.f32 1.0, %v4165_v58 }
0x3750   :  { %4166 = vrcp.f32 %v3293_v22 }
0x375a   :  { %v4167_v34 = vpop.eup %4166 }
0x375b   :  { %v3300_v25 = vmul.f32 %v4167_v34, %v3298_v11  ;;  %v3307_v5 = vsub.f32 1.0, %v4167_v34 }
0x375d   :  { %3302 = vrot.lane.b32.xlu1 %v3300_v25, %s4233_s20 }
0x37cf   :  { %v3303_v62 = vpop.permute.xlu1 %3302 }
0x37d0   :  { %v3305_v51 = vadd.f32 %v3303_v62, %v3248_v1 }
0x37d2   :  { %4168 = vtanh.f32 %v3305_v51 }
0x37dc   :  { %v4169_v28 = vpop.eup %4168 }
0x37dd   :  { %3309 = vrot.lane.b32.xlu0 %v4169_v28, %s4228_s1 }
0x37e1   :  { %806 = vrot.lane.b32.xlu0 %v4513_v43, %s4228_s1 }
0x37e5   :  { %817 = vrot.lane.b32.xlu0 %v4482_v27, %s4235_s0 }
0x37e9   :  { %829 = vrot.lane.b32.xlu0 %v4496_v32, %s4233_s20  ;;  %v3313_v32 = vmul.f32 %v4167_v34, %v5003_v39 }
0x37ed   :  { %1175 = vrot.lane.b32.xlu0 %v4592_v49, %s4228_s1 }
0x37f1   :  { %1186 = vrot.lane.b32.xlu0 %v4567_v54, %s4235_s0 }
0x37f5   :  { %1196 = vrot.lane.b32.xlu0 %v4577_v18, %s4233_s20 }
0x37f9   :  { %1540 = vrot.lane.b32.xlu0 %v4671_v35, %s4228_s1 }
0x37fd   :  { %1551 = vrot.lane.b32.xlu0 %v4646_v23, %s4235_s0 }
0x3801   :  { %1905 = vrot.lane.b32.xlu0 %v4754_v33, %s4228_s1 }
0x3805   :  { %2635 = vrot.lane.b32.xlu0 %v4922_v4, %s4228_s1 }
0x384f   :  { %v3310_v27 = vpop.permute.xlu0 %3309 }
0x3850   :  { %v3312_v43 = vmul.f32 %v3310_v27, %v3307_v5 }
0x3852   :  { %v3314_v54 = vadd.f32 %v3313_v32, %v3312_v43 }
0x3853   :  { %v807_v49 = vpop.permute.xlu0 %806 }
0x3854   :  { %v3510_v18 = vclamps-f32 %v3314_v54, 5.0  ;;  %809 = vst.msk [vmem:[#allocation5] sm:$0xff] %vm89_vm0, %v807_v49 }
0x3856   :  { %3365 = vrot.lane.b32.xlu0 %v3510_v18, %s4228_s1  ;;  %v3317_v35 = vpack.c.bf16 %v3510_v18, %v3510_v18 }
0x3857   :  { %v5093_v23 = vpop.permute.xlu0 %817 }
0x3858   :  { %3319 = vrot.lane.b32.xlu1 %v3317_v35, %s4228_s1 }
0x385a   :  { %2276 = vrot.lane.b32.xlu0 %v4790_v0, %s4231_s18 }
0x385b   :  { %v5098_v33 = vpop.permute.xlu0 %829 }
0x385c   :  { %811 = vrot.lane.b32.xlu1 %v4450_v10, %s4231_s18 }
0x385e   :  { %3006 = vrot.lane.b32.xlu0 %v4956_v63, %s4231_s18 }
0x385f   :  { %v1176_v4 = vpop.permute.xlu0 %1175 }
0x3860   :  { %1179 = vst.msk [vmem:[#allocation5 + $0x8] sm:$0xff] %vm89_vm0, %v1176_v4  ;;  %823 = vrot.lane.b32.xlu1 %v4491_v50, %s4236_s6 }
0x3862   :  { %1916 = vrot.lane.b32.xlu0 %v4729_v16, %s4235_s0  ;;  %v5269_v16 = vld [vmem:[#allocation13_spill] sm:$0xff] }
0x3863   :  { %v5109_v53 = vpop.permute.xlu0 %1186 }
0x3864   :  { %835 = vrot.lane.b32.xlu1 %v4529_v46, %s4237_s7 }
0x3866   :  { %2646 = vrot.lane.b32.xlu0 %v4895_v31, %s4235_s0 }
0x3867   :  { %v5115_v10 = vpop.permute.xlu0 %1196 }
0x3868   :  { %1181 = vrot.lane.b32.xlu1 %v4546_v45, %s4231_s18 }
0x386a   :  { %3376 = vrot.lane.b32.xlu0 %v5049_v59, %s4235_s0 }
0x386b   :  { %v1541_v50 = vpop.permute.xlu0 %1540 }
0x386c   :  { %1544 = vst.msk [vmem:[#allocation5 + $0x10] sm:$0xff] %vm89_vm0, %v1541_v50  ;;  %1191 = vrot.lane.b32.xlu1 %v4572_v15, %s4236_s6 }
0x386e   :  { %2286 = vrot.lane.b32.xlu0 %v4817_v13, %s4236_s6 }
0x386f   :  { %v5126_v46 = vpop.permute.xlu0 %1551 }
0x3870   :  { %1201 = vrot.lane.b32.xlu1 %v4608_v8, %s4237_s7  ;;  %v5263_v8 = vld [vmem:[#allocation14_spill] sm:$0xff] }
0x3872   :  { %3016 = vrot.lane.b32.xlu0 %v4983_v38, %s4236_s6 }
0x3873   :  { %v1906_v45 = vpop.permute.xlu0 %1905 }
0x3874   :  { %1909 = vst.msk [vmem:[#allocation5 + $0x18] sm:$0xff] %vm89_vm0, %v1906_v45  ;;  %1546 = vrot.lane.b32.xlu1 %v4625_v17, %s4231_s18  ;;  %v5264_v17 = vld [vmem:[#allocation8_spill] sm:$0xff] }
0x3876   :  { %1561 = vrot.lane.b32.xlu0 %v4656_v20, %s4233_s20  ;;  %v5266_v20 = vld [vmem:[#allocation9_spill] sm:$0xff] }
0x3877   :  { %v2636_v15 = vpop.permute.xlu0 %2635 }
0x3878   :  { %2639 = vst.msk [vmem:[#allocation5 + $0x28] sm:$0xff] %vm89_vm0, %v2636_v15  ;;  %1556 = vrot.lane.b32.xlu1 %v4651_v47, %s4236_s6  ;;  %v5265_v47 = vld [vmem:[#allocation11_spill] sm:$0xff] }
0x387a   :  { %2291 = vrot.lane.b32.xlu0 %v4822_v55, %s4233_s20 }
0x387c   :  { %2270 = vrot.lane.b32.xlu1 %v4837_v30, %s4228_s1 }
0x387e   :  { %3021 = vrot.lane.b32.xlu0 %v4988_v37, %s4233_s20 }
0x3880   :  { %3000 = vrot.lane.b32.xlu1 %v5003_v39, %s4228_s1 }
0x3882   :  { %1566 = vrot.lane.b32.xlu0 %v4689_v29, %s4237_s7  ;;  %v5267_v29 = vld [vmem:[#allocation12_spill] sm:$0xff] }
0x3884   :  { %1911 = vrot.lane.b32.xlu1 %v4707_v36, %s4231_s18  ;;  %v5268_v36 = vld [vmem:[#allocation10_spill] sm:$0xff] }
0x3886   :  { %2296 = vrot.lane.b32.xlu0 %v4853_v24, %s4237_s7 }
0x3888   :  { %2641 = vrot.lane.b32.xlu1 %v4871_v57, %s4231_s18 }
0x388a   :  { %3026 = vrot.lane.b32.xlu0 %v5019_v19, %s4237_s7 }
0x388c   :  { %3371 = vrot.lane.b32.xlu1 %v5037_v41, %s4231_s18 }
0x3890   :  { %2281 = vrot.lane.b32.xlu1 %v4812_v52, %s4235_s0 }
0x3894   :  { %3011 = vrot.lane.b32.xlu1 %v5263_v8, %s4235_s0 }
0x3898   :  { %1921 = vrot.lane.b32.xlu1 %v5264_v17, %s4236_s6 }
0x389c   :  { %2651 = vrot.lane.b32.xlu1 %v5265_v47, %s4236_s6 }
0x38a0   :  { %3381 = vrot.lane.b32.xlu1 %v5054_v44, %s4236_s6 }
0x38a4   :  { %1926 = vrot.lane.b32.xlu1 %v5266_v20, %s4233_s20 }
0x38a8   :  { %2656 = vrot.lane.b32.xlu1 %v5267_v29, %s4233_s20 }
0x38ac   :  { %3386 = vrot.lane.b32.xlu1 %v5059_v26, %s4233_s20 }
0x38b0   :  { %1931 = vrot.lane.b32.xlu1 %v5268_v36, %s4237_s7 }
0x38b4   :  { %2661 = vrot.lane.b32.xlu1 %v5269_v16, %s4237_s7 }
0x38c8   :  { %v3366_v0 = vpop.permute.xlu0 %3365 }
0x38c9   :  { %3369 = vst.msk [vmem:[#allocation5 + $0x38] sm:$0xff] %vm89_vm0, %v3366_v0 }
0x38ca   :  { %v3320_v52 = vpop.permute.xlu1 %3319 }
0x38cb   :  { %4023 = vmatmul.mubr.msk.bf16.vlgmr.msra.gmra.mrb[104].mxu1 %vm89_vm0, %v3320_v52 }
0x38cc   :  { %v2277_v13 = vpop.permute.xlu0 %2276 }
0x38ce   :  { %v812_v55 = vpop.permute.xlu1 %811 }
0x38cf   :  { %815 = vst.msk [vmem:[#allocation5] sm:$0xff] %vm814_vm7, %v812_v55 }
0x38d0   :  { %v3007_v30 = vpop.permute.xlu0 %3006  ;;  %821 = vst.msk [vmem:[#allocation5] sm:$0xff] %vm820_vm8, %v5093_v23 }
0x38d2   :  { %v824_v24 = vpop.permute.xlu1 %823 }
0x38d3   :  { %827 = vst.msk [vmem:[#allocation5] sm:$0xff] %vm826_vm9, %v824_v24 }
0x38d4   :  { %v1917_v57 = vpop.permute.xlu0 %1916  ;;  %833 = vst.msk [vmem:[#allocation5] sm:$0xff] %vm832_vm10, %v5098_v33 }
0x38d6   :  { %v836_v31 = vpop.permute.xlu1 %835 }
0x38d7   :  { %839 = vst.msk [vmem:[#allocation5] sm:$0xff] %vm838_vm11, %v836_v31 }
0x38d8   :  { %v2647_v63 = vpop.permute.xlu0 %2646 }
0x38da   :  { %v1182_v38 = vpop.permute.xlu1 %1181 }
0x38db   :  { %1184 = vst.msk [vmem:[#allocation5 + $0x8] sm:$0xff] %vm814_vm7, %v1182_v38 }
0x38dc   :  { %1189 = vst.msk [vmem:[#allocation5 + $0x8] sm:$0xff] %vm820_vm8, %v5109_v53  ;;  %v3377_v37 = vpop.permute.xlu0 %3376 }
0x38de   :  { %v1192_v39 = vpop.permute.xlu1 %1191 }
0x38df   :  { %1194 = vst.msk [vmem:[#allocation5 + $0x8] sm:$0xff] %vm826_vm9, %v1192_v39 }
0x38e0   :  { %1199 = vst.msk [vmem:[#allocation5 + $0x8] sm:$0xff] %vm832_vm10, %v5115_v10  ;;  %v2287_v19 = vpop.permute.xlu0 %2286 }
0x38e2   :  { %v1202_v41 = vpop.permute.xlu1 %1201 }
0x38e3   :  { %1204 = vst.msk [vmem:[#allocation5 + $0x8] sm:$0xff] %vm838_vm11, %v1202_v41 }
0x38e4   :  { %v3017_v59 = vpop.permute.xlu0 %3016 }
0x38e6   :  { %v1547_v14 = vpop.permute.xlu1 %1546 }
0x38e7   :  { %1549 = vst.msk [vmem:[#allocation5 + $0x10] sm:$0xff] %vm814_vm7, %v1547_v14 }
0x38e8   :  { %1554 = vst.msk [vmem:[#allocation5 + $0x10] sm:$0xff] %vm820_vm8, %v5126_v46  ;;  %v1562_v7 = vpop.permute.xlu0 %1561 }
0x38ea   :  { %v1557_v40 = vpop.permute.xlu1 %1556 }
0x38eb   :  { %1559 = vst.msk [vmem:[#allocation5 + $0x10] sm:$0xff] %vm826_vm9, %v1557_v40 }
0x38ec   :  { %1564 = vst.msk [vmem:[#allocation5 + $0x10] sm:$0xff] %vm832_vm10, %v1562_v7  ;;  %v2292_v21 = vpop.permute.xlu0 %2291 }
0x38ee   :  { %v2271_v12 = vpop.permute.xlu1 %2270 }
0x38ef   :  { %2274 = vst.msk [vmem:[#allocation5 + $0x20] sm:$0xff] %vm89_vm0, %v2271_v12 }
0x38f0   :  { %2279 = vst.msk [vmem:[#allocation5 + $0x20] sm:$0xff] %vm814_vm7, %v2277_v13  ;;  %v3022_v44 = vpop.permute.xlu0 %3021 }
0x38f2   :  { %v3001_v60 = vpop.permute.xlu1 %3000 }
0x38f3   :  { %3004 = vst.msk [vmem:[#allocation5 + $0x30] sm:$0xff] %vm89_vm0, %v3001_v60 }
0x38f4   :  { %3009 = vst.msk [vmem:[#allocation5 + $0x30] sm:$0xff] %vm814_vm7, %v3007_v30  ;;  %v1567_v42 = vpop.permute.xlu0 %1566 }
0x38f5   :  { %1569 = vst.msk [vmem:[#allocation5 + $0x10] sm:$0xff] %vm838_vm11, %v1567_v42 }
0x38f6   :  { %v1912_v26 = vpop.permute.xlu1 %1911 }
0x38f7   :  { %1914 = vst.msk [vmem:[#allocation5 + $0x18] sm:$0xff] %vm814_vm7, %v1912_v26 }
0x38f8   :  { %1919 = vst.msk [vmem:[#allocation5 + $0x18] sm:$0xff] %vm820_vm8, %v1917_v57  ;;  %v2297_v3 = vpop.permute.xlu0 %2296 }
0x38fa   :  { %v2642_v61 = vpop.permute.xlu1 %2641 }
0x38fb   :  { %2644 = vst.msk [vmem:[#allocation5 + $0x28] sm:$0xff] %vm814_vm7, %v2642_v61 }
0x38fc   :  { %2649 = vst.msk [vmem:[#allocation5 + $0x28] sm:$0xff] %vm820_vm8, %v2647_v63  ;;  %v3027_v6 = vpop.permute.xlu0 %3026 }
0x38fe   :  { %v3372_v2 = vpop.permute.xlu1 %3371 }
0x38ff   :  { %3374 = vst.msk [vmem:[#allocation5 + $0x38] sm:$0xff] %vm814_vm7, %v3372_v2 }
0x3900   :  { %3379 = vst.msk [vmem:[#allocation5 + $0x38] sm:$0xff] %vm820_vm8, %v3377_v37 }
0x3902   :  { %v2282_v1 = vpop.permute.xlu1 %2281 }
0x3903   :  { %2284 = vst.msk [vmem:[#allocation5 + $0x20] sm:$0xff] %vm820_vm8, %v2282_v1 }
0x3904   :  { %2289 = vst.msk [vmem:[#allocation5 + $0x20] sm:$0xff] %vm826_vm9, %v2287_v19 }
0x3905   :  { %2294 = vst.msk [vmem:[#allocation5 + $0x20] sm:$0xff] %vm832_vm10, %v2292_v21 }
0x3906   :  { %2299 = vst.msk [vmem:[#allocation5 + $0x20] sm:$0xff] %vm838_vm11, %v2297_v3  ;;  %v3012_v48 = vpop.permute.xlu1 %3011 }
0x3907   :  { %3014 = vst.msk [vmem:[#allocation5 + $0x30] sm:$0xff] %vm820_vm8, %v3012_v48 }
0x3908   :  { %3019 = vst.msk [vmem:[#allocation5 + $0x30] sm:$0xff] %vm826_vm9, %v3017_v59 }
0x3909   :  { %3024 = vst.msk [vmem:[#allocation5 + $0x30] sm:$0xff] %vm832_vm10, %v3022_v44 }
0x390a   :  { %3029 = vst.msk [vmem:[#allocation5 + $0x30] sm:$0xff] %vm838_vm11, %v3027_v6  ;;  %v1922_v9 = vpop.permute.xlu1 %1921 }
0x390b   :  { %1924 = vst.msk [vmem:[#allocation5 + $0x18] sm:$0xff] %vm826_vm9, %v1922_v9 }
0x390e   :  { %v2652_v56 = vpop.permute.xlu1 %2651 }
0x390f   :  { %2654 = vst.msk [vmem:[#allocation5 + $0x28] sm:$0xff] %vm826_vm9, %v2652_v56 }
0x3912   :  { %v3382_v58 = vpop.permute.xlu1 %3381 }
0x3913   :  { %3384 = vst.msk [vmem:[#allocation5 + $0x38] sm:$0xff] %vm826_vm9, %v3382_v58 }
0x3916   :  { %v1927_v22 = vpop.permute.xlu1 %1926 }
0x3917   :  { %1929 = vst.msk [vmem:[#allocation5 + $0x18] sm:$0xff] %vm832_vm10, %v1927_v22 }
0x391a   :  { %v2657_v34 = vpop.permute.xlu1 %2656 }
0x391b   :  { %2659 = vst.msk [vmem:[#allocation5 + $0x28] sm:$0xff] %vm832_vm10, %v2657_v34 }
0x391e   :  { %v3387_v11 = vpop.permute.xlu1 %3386 }
0x391f   :  { %3389 = vst.msk [vmem:[#allocation5 + $0x38] sm:$0xff] %vm832_vm10, %v3387_v11 }
0x3922   :  { %v1932_v25 = vpop.permute.xlu1 %1931 }
0x3923   :  { %1934 = vst.msk [vmem:[#allocation5 + $0x18] sm:$0xff] %vm838_vm11, %v1932_v25 }
0x3926   :  { %v2662_v62 = vpop.permute.xlu1 %2661 }
0x3927   :  { %2664 = vst.msk [vmem:[#allocation5 + $0x28] sm:$0xff] %vm838_vm11, %v2662_v62 }
0x399e   :  { %v3358_v51 = vpop.f32.mrb[104].mxu1 }
0x399f   :  { %3391 = vrot.lane.b32.xlu1 %v3358_v51, %s4237_s7  ;;  %v4024_v28 = vpop.f32.mrb[105].mxu1 }
0x39a0   :  { %v3361_v5 = vpop.f32.mrb[106].mxu1 }
0x39a1   :  { %v4025_v27 = vpop.f32.mrb[107].mxu1 }
0x3a11   :  { %v3392_v32 = vpop.permute.xlu1 %3391 }
0x3a12   :  { %3394 = vst.msk [vmem:[#allocation5 + $0x38] sm:$0xff] %vm838_vm11, %v3392_v32 }
0x3a13   :  { %4208 = shalt.err (!%p4205_p12)
}
0x3a14   :  { %s4209_s13 = scalar_lea.hbm %s5248_s3, 1152 }
0x3a15   :  { %p4210_p13 = scmp.ne.s32.totalorder %s5248_s3, %s4209_s13  ;;  %p4213_p0 = scmp.lt.u32.totalorder %s4209_s13, %s5248_s3 }
0x3a17   :  { %p4215_p1 = pnand %p4213_p0, %p4210_p13 }
0x3a19   :  { %4218 = shalt.err (!%p4215_p1)
}
0x3a1a   :  { %3406 = dma.vmem_to_hbm [thread:$0]  %s3401_s9, 1152, %s5248_s3, [#allocation4], %s4224_s22, %s4224_s22, %s4225_s23  }
0x3a1b   :  { %4221 = dma.done.wait [#allocation4], 1152  }
0x3a1c   :  { %4222 = vsyncadd [#allocation4], 4294966144 }
0x3a1d   :  { %3410 = vsyncpa [#allocation3], 1 }
0x3a1e   :  { %3411 = vsyncpa [#allocation4], 1 }

</bundles_post_ra>
